<compile_context>
chip_gen: v7x
topology: tpu7x:2x2x1
jax: 0.10.0
libtpu: 0.0.40
codegen_flags: <defaults>
</compile_context>

<pallas_src>
import numpy as np
import jax
import jax.numpy as jnp
from jax.experimental import pallas as pl
from jax.experimental.pallas import tpu as pltpu

LRELU_SLOPE = 0.2
IN_EPS = 1e-5
# Padded conv position q lives at scratch row PAD_LO + q  =>  actual position p at row 8 + p,
# so every large activation store starts on an 8-aligned sublane row.
PAD_LO = 6


def _lrelu(y):
    return jnp.where(y > 0, y, LRELU_SLOPE * y)


# ----------------------------- XLA glue (network input only) -----------------------------
def im2col_taps_sublanes(x_ncl, k, s, p):
    """(N, C, L) -> (N, k*C, L_out): row order j*C + c (tap-major), length on lanes."""
    N, C, L = x_ncl.shape
    L_out = (L + 2 * p - k) // s + 1
    xp = jnp.pad(x_ncl, ((0, 0), (0, 0), (p, p)))
    idx = jnp.arange(L_out)[None, :] * s + jnp.arange(k)[:, None]     # (k, L_out)
    patches = xp[:, :, idx]                                           # (N, C, k, L_out)
    patches = patches.transpose(0, 2, 1, 3)                           # (N, k, C, L_out)
    return patches.reshape(N, k * C, L_out), L_out


def im2col_rowmajor(x_ncl, k, s, p):
    """(N, C, L) -> (N, L_out, k*C), column order j*C + c.  Used only by the pure-JAX reference."""
    N, C, L = x_ncl.shape
    L_out = (L + 2 * p - k) // s + 1
    xp = jnp.pad(x_ncl, ((0, 0), (0, 0), (p, p)))
    idx = jnp.arange(L_out)[:, None] * s + jnp.arange(k)[None, :]     # (L_out, k)
    patches = xp[:, :, idx]                                           # (N, C, L_out, k)
    patches = patches.transpose(0, 2, 3, 1)                           # (N, L_out, k, C)
    return patches.reshape(N, L_out, k * C), L_out


# --------------------------------- fused Pallas kernel -----------------------------------
def _merged_conv(src_ref, w_ref):
    """Conv1d(k=8, s=4, p=2, no bias) from a padded row-major scratch, taps merged 4-at-a-time.

    src_ref: (L_in + 10, C_in) scratch; padded position q lives at row PAD_LO + q.
    w_ref:   (8*C_in, C_out) tap-major flattened weight.
    Returns the raw conv output (L_out, C_out) in f32.
    """
    f32 = jnp.float32
    L_in = src_ref.shape[0] - 10
    C_in = src_ref.shape[1]
    L_out = L_in // 4
    K = 4 * C_in
    # 4 stride-4 sublane reads: block u holds padded positions 4r + u for r = 0..L_out.
    taps = [src_ref[pl.ds(PAD_LO + u, L_out + 1, stride=4), :] for u in range(4)]
    x_cat = jnp.concatenate(taps, axis=1)                             # (L_out + 1, 4*C_in)
    lo = x_cat[0:L_out, :]                                            # taps 0..3 of output t
    hi = x_cat[1:L_out + 1, :]                                        # taps 4..7 of output t
    acc = jnp.dot(lo, w_ref[0:K, :], preferred_element_type=f32)
    acc = acc + jnp.dot(hi, w_ref[K:2 * K, :], preferred_element_type=f32)
    return acc


def _in_lrelu(acc, g_ref, b_ref):
    """Single-pass InstanceNorm1d(affine, eps=1e-5) + LeakyReLU(0.2), folded into one FMA."""
    inv_l = 1.0 / acc.shape[0]
    mean = jnp.sum(acc, axis=0, keepdims=True) * inv_l
    ms = jnp.sum(acc * acc, axis=0, keepdims=True) * inv_l
    var = jnp.maximum(ms - mean * mean, 0.0)
    s = g_ref[...] * jax.lax.rsqrt(var + IN_EPS)
    t = b_ref[...] - mean * s
    return _lrelu(acc * s + t)


def _store_padded(dst_ref, y):
    """Store a (L_out, C) activation at 8-aligned rows and (re)zero the 2 conv-pad rows per side."""
    L_out, C = y.shape
    z = jnp.zeros((2, C), jnp.float32)
    dst_ref[PAD_LO:PAD_LO + 2, :] = z
    dst_ref[pl.ds(PAD_LO + 2, L_out), :] = y                          # 8-aligned store
    dst_ref[PAD_LO + 2 + L_out:PAD_LO + 4 + L_out, :] = z


def _disc_kernel(p0_ref, w0_ref, b0_ref,
                 w1_ref, g1_ref, bt1_ref,
                 w2_ref, g2_ref, bt2_ref,
                 w3_ref, g3_ref, bt3_ref,
                 w4_ref, g4_ref, bt4_ref,
                 w5_ref, b5_ref,
                 o_ref,
                 s0, s1, s2, s3):
    """One batch sample per grid step; the whole 6-layer stack runs out of VMEM."""
    f32 = jnp.float32
    L0 = p0_ref.shape[1]
    fd = s0.shape[1]

    # ---- layer 0: Conv1d(channel -> fd, k=8, s=4, p=2) + bias + LeakyReLU (lane-dense) ------
    a0 = jnp.dot(w0_ref[...], p0_ref[...], preferred_element_type=f32) + b0_ref[...]
    a0 = _lrelu(a0)                                                   # (fd_pad, L0); rows >= fd are 0

    # Re-layout into the row-major padded scratch in 128-lane chunks (bounds live vregs).
    z2 = jnp.zeros((2, fd), f32)
    s0[PAD_LO:PAD_LO + 2, :] = z2
    s0[PAD_LO + 2 + L0:PAD_LO + 4 + L0, :] = z2
    for t in range(L0 // 128):
        blk = jnp.transpose(a0[:, t * 128:(t + 1) * 128])             # (128, fd_pad)
        s0[PAD_LO + 2 + t * 128:PAD_LO + 2 + (t + 1) * 128, :] = blk[:, 0:fd]

    # ---- layers 1-4: Conv1d(no bias) + InstanceNorm1d(affine) + LeakyReLU --------------------
    _store_padded(s1, _in_lrelu(_merged_conv(s0, w1_ref), g1_ref, bt1_ref))
    _store_padded(s2, _in_lrelu(_merged_conv(s1, w2_ref), g2_ref, bt2_ref))
    _store_padded(s3, _in_lrelu(_merged_conv(s2, w3_ref), g3_ref, bt3_ref))
    y4 = _in_lrelu(_merged_conv(s3, w4_ref), g4_ref, bt4_ref)         # (4, fd*16), stays in vregs

    # ---- layer 5: Conv1d(fd*16 -> 1, k=4, s=1, p=0) + bias (no activation) -------------------
    o_ref[...] = jnp.sum(y4 * w5_ref[...]) + b5_ref[...]


# ------------------------------- parameters & forward ------------------------------------
def init_params(key, channel, features_d):
    """Weights stored in kernel layout: k=8 convs flattened tap-major."""
    fd = features_d

    def conv_w(k_, cin, cout, ksz):
        bound = 1.0 / np.sqrt(cin * ksz)
        w = jax.random.uniform(k_, (cout, cin, ksz), jnp.float32, -bound, bound)
        return w, bound

    params = {}
    key, k0, kb0 = jax.random.split(key, 3)
    w0, bound0 = conv_w(k0, channel, fd, 8)
    params["w0t"] = w0.transpose(0, 2, 1).reshape(fd, 8 * channel)     # [out, j*C + c]
    params["b0"] = jax.random.uniform(kb0, (fd, 1), jnp.float32, -bound0, bound0)

    blocks = []
    cin = fd
    for _ in range(4):
        cout = cin * 2
        key, kw, kg, kb = jax.random.split(key, 4)
        w, _ = conv_w(kw, cin, cout, 8)
        wm = w.transpose(2, 1, 0).reshape(8 * cin, cout)               # [j*C_in + c, out]
        gamma = jax.random.uniform(kg, (1, cout), jnp.float32, 0.5, 1.5)
        beta = 0.1 * jax.random.normal(kb, (1, cout), jnp.float32)
        blocks.append((wm, gamma, beta))
        cin = cout
    params["blocks"] = blocks

    key, kw5, kb5 = jax.random.split(key, 3)
    w5, bound5 = conv_w(kw5, fd * 16, 1, 4)
    params["w5"] = jnp.transpose(w5[0], (1, 0))                        # (4, fd*16) [tap, channel]
    params["b5"] = jax.random.uniform(kb5, (1, 1), jnp.float32, -bound5, bound5)
    return params


def discriminator_forward(params, x):
    """x: (N, channel, L) NCL with L = 4096.  Returns (N, 1, 1) like the PyTorch module."""
    N, C, L = x.shape
    w0t = params["w0t"]
    fd = w0t.shape[0]
    assert w0t.shape[1] == 8 * C

    # layer output lengths: 4096 -> 1024 -> 256 -> 64 -> 16 -> 4 (then the k=4 valid conv -> 1)
    L_outs, l = [], L
    for _ in range(5):
        assert l % 4 == 0
        l = (l + 2 * 2 - 8) // 4 + 1
        L_outs.append(l)
    assert L_outs[-1] == 4, "final Conv1d(k=4, s=1) expects a length-4 input (L must be 4096)"
    L0, L1, L2, L3, _ = L_outs
    assert L0 % 128 == 0
    C_outs = [fd, fd * 2, fd * 4, fd * 8]

    # Lane-dense layer-0 patches: taps on sublanes, length on lanes (one cheap XLA op).
    patches0, lo = im2col_taps_sublanes(x, 8, 4, 2)                    # (N, 8*C, L0)
    assert lo == L0

    # Pad layer-0 weight/bias rows to a sublane multiple so the in-kernel transpose is (8k, 128).
    fd_pad = ((fd + 7) // 8) * 8
    w0p = jnp.zeros((fd_pad, 8 * C), jnp.float32).at[:fd, :].set(w0t)
    b0p = jnp.zeros((fd_pad, 1), jnp.float32).at[:fd, :].set(params["b0"])

    def c2(a):  # full-array, grid-invariant block: DMA'd once, stays VMEM-resident
        return pl.BlockSpec(a.shape, lambda n: (0, 0))

    flat_inputs = [patches0, w0p, b0p]
    in_specs = [pl.BlockSpec((None, 8 * C, L0), lambda n: (n, 0, 0)), c2(w0p), c2(b0p)]
    for (wm, g, b) in params["blocks"]:
        flat_inputs += [wm, g, b]
        in_specs += [c2(wm), c2(g), c2(b)]
    flat_inputs += [params["w5"], params["b5"]]
    in_specs += [c2(params["w5"]), c2(params["b5"])]

    scratch_shapes = [
        pltpu.VMEM((L0 + 10, C_outs[0]), jnp.float32),
        pltpu.VMEM((L1 + 10, C_outs[1]), jnp.float32),
        pltpu.VMEM((L2 + 10, C_outs[2]), jnp.float32),
        pltpu.VMEM((L3 + 10, C_outs[3]), jnp.float32),
    ]

    return pl.pallas_call(
        _disc_kernel,
        out_shape=jax.ShapeDtypeStruct((N, 1, 1), jnp.float32),
        grid=(N,),
        in_specs=in_specs,
        out_specs=pl.BlockSpec((None, 1, 1), lambda n: (n, 0, 0)),
        scratch_shapes=scratch_shapes,
        compiler_params=pltpu.CompilerParams(dimension_semantics=("parallel",)),
    )(*flat_inputs)


def reference_forward(params, x):
    """Pure-JAX reference (same math, no Pallas) for a numerical sanity check."""
    p, _ = im2col_rowmajor(x, 8, 4, 2)
    y = jnp.einsum("nlk,ok->nlo", p, params["w0t"]) + params["b0"][:, 0][None, None, :]
    h = jnp.transpose(_lrelu(y), (0, 2, 1))
    for (wm, gamma, beta) in params["blocks"]:
        p, _ = im2col_rowmajor(h, 8, 4, 2)
        y = jnp.einsum("nlk,kc->nlc", p, wm)
        mean = jnp.mean(y, axis=1, keepdims=True)
        var = jnp.mean(jnp.square(y - mean), axis=1, keepdims=True)
        y = (y - mean) * jax.lax.rsqrt(var + IN_EPS)
        h = jnp.transpose(_lrelu(y * gamma + beta), (0, 2, 1))
    out = jnp.einsum("ncj,jc->n", h, params["w5"]) + params["b5"][0, 0]
    return out.reshape(-1, 1, 1)


if __name__ == "__main__":
    # The 5 stride-4 convs followed by the k=4 valid conv require L = 4096
    # (4096 -> 1024 -> 256 -> 64 -> 16 -> 4 -> 1); keep batch/channels small.
    batch, channel, features_d, L = 2, 1, 4, 4096

    key = jax.random.PRNGKey(0)
    kx, kp = jax.random.split(key)
    x = jax.random.normal(kx, (batch, channel, L), jnp.float32)
    params = init_params(kp, channel, features_d)

    fwd = jax.jit(discriminator_forward)
    out = jax.block_until_ready(fwd(params, x))
    assert out.shape == (batch, 1, 1), out.shape

    ref = reference_forward(params, x)
    np.testing.assert_allclose(np.asarray(out), np.asarray(ref), rtol=5e-3, atol=5e-3)

    print("KERNEL_OK")
</pallas_src>

<mosaic_0001>
module attributes {stable_mosaic.version = 11 : i64} {
  func.func private @main(%arg0: i32) attributes {dimension_semantics = [#tpu.dimension_semantics<core_parallel>], iteration_bounds = array<i64: 2>, tpu.core_type = #tpu.core_type<sc_scalar_subcore>, window_params = []} {
    return
  }
}

module attributes {stable_mosaic.version = 11 : i64} {
  func.func private @main(%arg0: i32) attributes {dimension_semantics = [#tpu.dimension_semantics<core_parallel>], iteration_bounds = array<i64: 2>, tpu.core_type = #tpu.core_type<sc_scalar_subcore>, window_params = []} {
    return
  }
}

module attributes {stable_mosaic.version = 11 : i64} {
  func.func @_disc_kernel(%arg0: i32, %arg1: memref<1x8x1024xf32, #tpu.memory_space<vmem>>, %arg2: memref<8x8xf32, #tpu.memory_space<vmem>>, %arg3: memref<8x1xf32, #tpu.memory_space<vmem>>, %arg4: memref<32x8xf32, #tpu.memory_space<vmem>>, %arg5: memref<1x8xf32, #tpu.memory_space<vmem>>, %arg6: memref<1x8xf32, #tpu.memory_space<vmem>>, %arg7: memref<64x16xf32, #tpu.memory_space<vmem>>, %arg8: memref<1x16xf32, #tpu.memory_space<vmem>>, %arg9: memref<1x16xf32, #tpu.memory_space<vmem>>, %arg10: memref<128x32xf32, #tpu.memory_space<vmem>>, %arg11: memref<1x32xf32, #tpu.memory_space<vmem>>, %arg12: memref<1x32xf32, #tpu.memory_space<vmem>>, %arg13: memref<256x64xf32, #tpu.memory_space<vmem>>, %arg14: memref<1x64xf32, #tpu.memory_space<vmem>>, %arg15: memref<1x64xf32, #tpu.memory_space<vmem>>, %arg16: memref<4x64xf32, #tpu.memory_space<vmem>>, %arg17: memref<1x1xf32, #tpu.memory_space<vmem>>, %arg18: memref<1x1x1xf32, #tpu.memory_space<vmem>>, %arg19: memref<1034x4xf32, #tpu.memory_space<vmem>>, %arg20: memref<266x8xf32, #tpu.memory_space<vmem>>, %arg21: memref<74x16xf32, #tpu.memory_space<vmem>>, %arg22: memref<26x32xf32, #tpu.memory_space<vmem>>) attributes {dimension_semantics = [#tpu.dimension_semantics<parallel>], iteration_bounds = array<i64: 2>, scalar_prefetch = 0 : i64, scratch_operands = 4 : i64, tpu.core_type = #tpu.core_type<tc>, window_params = [{transform_indices = @transform_0, window_bounds = array<i64: 1, 8, 1024>}, {pipeline_mode = #tpu.pipeline_mode<synchronous>, transform_indices = @transform_1, window_bounds = array<i64: 8, 8>}, {pipeline_mode = #tpu.pipeline_mode<synchronous>, transform_indices = @transform_2, window_bounds = array<i64: 8, 1>}, {pipeline_mode = #tpu.pipeline_mode<synchronous>, transform_indices = @transform_3, window_bounds = array<i64: 32, 8>}, {pipeline_mode = #tpu.pipeline_mode<synchronous>, transform_indices = @transform_4, window_bounds = array<i64: 1, 8>}, {pipeline_mode = #tpu.pipeline_mode<synchronous>, transform_indices = @transform_5, window_bounds = array<i64: 1, 8>}, {pipeline_mode = #tpu.pipeline_mode<synchronous>, transform_indices = @transform_6, window_bounds = array<i64: 64, 16>}, {pipeline_mode = #tpu.pipeline_mode<synchronous>, transform_indices = @transform_7, window_bounds = array<i64: 1, 16>}, {pipeline_mode = #tpu.pipeline_mode<synchronous>, transform_indices = @transform_8, window_bounds = array<i64: 1, 16>}, {pipeline_mode = #tpu.pipeline_mode<synchronous>, transform_indices = @transform_9, window_bounds = array<i64: 128, 32>}, {pipeline_mode = #tpu.pipeline_mode<synchronous>, transform_indices = @transform_10, window_bounds = array<i64: 1, 32>}, {pipeline_mode = #tpu.pipeline_mode<synchronous>, transform_indices = @transform_11, window_bounds = array<i64: 1, 32>}, {pipeline_mode = #tpu.pipeline_mode<synchronous>, transform_indices = @transform_12, window_bounds = array<i64: 256, 64>}, {pipeline_mode = #tpu.pipeline_mode<synchronous>, transform_indices = @transform_13, window_bounds = array<i64: 1, 64>}, {pipeline_mode = #tpu.pipeline_mode<synchronous>, transform_indices = @transform_14, window_bounds = array<i64: 1, 64>}, {pipeline_mode = #tpu.pipeline_mode<synchronous>, transform_indices = @transform_15, window_bounds = array<i64: 4, 64>}, {pipeline_mode = #tpu.pipeline_mode<synchronous>, transform_indices = @transform_16, window_bounds = array<i64: 1, 1>}, {transform_indices = @transform_17, window_bounds = array<i64: 1, 1, 1>}]} {
    %c0 = arith.constant 0 : index
    %c0_0 = arith.constant 0 : index
    %0 = vector.load %arg2[%c0, %c0_0] : memref<8x8xf32, #tpu.memory_space<vmem>>, vector<8x8xf32>
    %c0_1 = arith.constant 0 : index
    %c0_2 = arith.constant 0 : index
    %c0_3 = arith.constant 0 : index
    %1 = vector.load %arg1[%c0_1, %c0_2, %c0_3] : memref<1x8x1024xf32, #tpu.memory_space<vmem>>, vector<1x8x1024xf32>
    %2 = vector.shape_cast %1 : vector<1x8x1024xf32> to vector<8x1024xf32>
    %cst = arith.constant dense<0.000000e+00> : vector<8x1024xf32>
    %3 = tpu.matmul %0, %2, %cst {dimension_numbers = #tpu.dot_dimension_numbers<[1], [0], [0], [1], [0, 0, 1, 1], [], []>} : vector<8x8xf32>, vector<8x1024xf32>, vector<8x1024xf32> -> vector<8x1024xf32>
    %c0_4 = arith.constant 0 : index
    %c0_5 = arith.constant 0 : index
    %4 = vector.load %arg3[%c0_4, %c0_5] : memref<8x1xf32, #tpu.memory_space<vmem>>, vector<8x1xf32>
    %5 = vector.broadcast %4 : vector<8x1xf32> to vector<8x1024xf32>
    %6 = arith.addf %3, %5 : vector<8x1024xf32>
    %cst_6 = arith.constant 0.000000e+00 : f32
    %7 = vector.broadcast %cst_6 : f32 to vector<8x1024xf32>
    %8 = arith.cmpf ogt, %6, %7 : vector<8x1024xf32>
    %cst_7 = arith.constant 2.000000e-01 : f32
    %9 = vector.broadcast %cst_7 : f32 to vector<8x1024xf32>
    %10 = arith.mulf %9, %6 : vector<8x1024xf32>
    %11 = arith.select %8, %6, %10 : vector<8x1024xi1>, vector<8x1024xf32>
    %cst_8 = arith.constant 0.000000e+00 : f32
    %12 = vector.broadcast %cst_8 : f32 to vector<2x4xf32>
    %c6 = arith.constant 6 : index
    %c0_9 = arith.constant 0 : index
    %13 = vector.load %arg19[%c6, %c0_9] : memref<1034x4xf32, #tpu.memory_space<vmem>>, vector<2x4xf32>
    tpu.vector_store %arg19[%c6, %c0_9], %12 {strides = array<i32>} : memref<1034x4xf32, #tpu.memory_space<vmem>>, vector<2x4xf32>,
    %c1032 = arith.constant 1032 : index
    %c0_10 = arith.constant 0 : index
    %14 = vector.load %arg19[%c1032, %c0_10] : memref<1034x4xf32, #tpu.memory_space<vmem>>, vector<2x4xf32>
    tpu.vector_store %arg19[%c1032, %c0_10], %12 {strides = array<i32>} : memref<1034x4xf32, #tpu.memory_space<vmem>>, vector<2x4xf32>,
    %15 = vector.extract_strided_slice %11 {offsets = [0, 0], sizes = [8, 128], strides = [1, 1]} : vector<8x1024xf32> to vector<8x128xf32>
    %16 = tpu.transpose %15, [1, 0] : vector<8x128xf32> -> vector<128x8xf32>
    %17 = vector.extract_strided_slice %16 {offsets = [0, 0], sizes = [128, 4], strides = [1, 1]} : vector<128x8xf32> to vector<128x4xf32>
    %c8 = arith.constant 8 : index
    %c0_11 = arith.constant 0 : index
    %18 = vector.load %arg19[%c8, %c0_11] : memref<1034x4xf32, #tpu.memory_space<vmem>>, vector<128x4xf32>
    tpu.vector_store %arg19[%c8, %c0_11], %17 {strides = array<i32>} : memref<1034x4xf32, #tpu.memory_space<vmem>>, vector<128x4xf32>,
    %19 = vector.extract_strided_slice %11 {offsets = [0, 128], sizes = [8, 128], strides = [1, 1]} : vector<8x1024xf32> to vector<8x128xf32>
    %20 = tpu.transpose %19, [1, 0] : vector<8x128xf32> -> vector<128x8xf32>
    %21 = vector.extract_strided_slice %20 {offsets = [0, 0], sizes = [128, 4], strides = [1, 1]} : vector<128x8xf32> to vector<128x4xf32>
    %c136 = arith.constant 136 : index
    %c0_12 = arith.constant 0 : index
    %22 = vector.load %arg19[%c136, %c0_12] : memref<1034x4xf32, #tpu.memory_space<vmem>>, vector<128x4xf32>
    tpu.vector_store %arg19[%c136, %c0_12], %21 {strides = array<i32>} : memref<1034x4xf32, #tpu.memory_space<vmem>>, vector<128x4xf32>,
    %23 = vector.extract_strided_slice %11 {offsets = [0, 256], sizes = [8, 128], strides = [1, 1]} : vector<8x1024xf32> to vector<8x128xf32>
    %24 = tpu.transpose %23, [1, 0] : vector<8x128xf32> -> vector<128x8xf32>
    %25 = vector.extract_strided_slice %24 {offsets = [0, 0], sizes = [128, 4], strides = [1, 1]} : vector<128x8xf32> to vector<128x4xf32>
    %c264 = arith.constant 264 : index
    %c0_13 = arith.constant 0 : index
    %26 = vector.load %arg19[%c264, %c0_13] : memref<1034x4xf32, #tpu.memory_space<vmem>>, vector<128x4xf32>
    tpu.vector_store %arg19[%c264, %c0_13], %25 {strides = array<i32>} : memref<1034x4xf32, #tpu.memory_space<vmem>>, vector<128x4xf32>,
    %27 = vector.extract_strided_slice %11 {offsets = [0, 384], sizes = [8, 128], strides = [1, 1]} : vector<8x1024xf32> to vector<8x128xf32>
    %28 = tpu.transpose %27, [1, 0] : vector<8x128xf32> -> vector<128x8xf32>
    %29 = vector.extract_strided_slice %28 {offsets = [0, 0], sizes = [128, 4], strides = [1, 1]} : vector<128x8xf32> to vector<128x4xf32>
    %c392 = arith.constant 392 : index
    %c0_14 = arith.constant 0 : index
    %30 = vector.load %arg19[%c392, %c0_14] : memref<1034x4xf32, #tpu.memory_space<vmem>>, vector<128x4xf32>
    tpu.vector_store %arg19[%c392, %c0_14], %29 {strides = array<i32>} : memref<1034x4xf32, #tpu.memory_space<vmem>>, vector<128x4xf32>,
    %31 = vector.extract_strided_slice %11 {offsets = [0, 512], sizes = [8, 128], strides = [1, 1]} : vector<8x1024xf32> to vector<8x128xf32>
    %32 = tpu.transpose %31, [1, 0] : vector<8x128xf32> -> vector<128x8xf32>
    %33 = vector.extract_strided_slice %32 {offsets = [0, 0], sizes = [128, 4], strides = [1, 1]} : vector<128x8xf32> to vector<128x4xf32>
    %c520 = arith.constant 520 : index
    %c0_15 = arith.constant 0 : index
    %34 = vector.load %arg19[%c520, %c0_15] : memref<1034x4xf32, #tpu.memory_space<vmem>>, vector<128x4xf32>
    tpu.vector_store %arg19[%c520, %c0_15], %33 {strides = array<i32>} : memref<1034x4xf32, #tpu.memory_space<vmem>>, vector<128x4xf32>,
    %35 = vector.extract_strided_slice %11 {offsets = [0, 640], sizes = [8, 128], strides = [1, 1]} : vector<8x1024xf32> to vector<8x128xf32>
    %36 = tpu.transpose %35, [1, 0] : vector<8x128xf32> -> vector<128x8xf32>
    %37 = vector.extract_strided_slice %36 {offsets = [0, 0], sizes = [128, 4], strides = [1, 1]} : vector<128x8xf32> to vector<128x4xf32>
    %c648 = arith.constant 648 : index
    %c0_16 = arith.constant 0 : index
    %38 = vector.load %arg19[%c648, %c0_16] : memref<1034x4xf32, #tpu.memory_space<vmem>>, vector<128x4xf32>
    tpu.vector_store %arg19[%c648, %c0_16], %37 {strides = array<i32>} : memref<1034x4xf32, #tpu.memory_space<vmem>>, vector<128x4xf32>,
    %39 = vector.extract_strided_slice %11 {offsets = [0, 768], sizes = [8, 128], strides = [1, 1]} : vector<8x1024xf32> to vector<8x128xf32>
    %40 = tpu.transpose %39, [1, 0] : vector<8x128xf32> -> vector<128x8xf32>
    %41 = vector.extract_strided_slice %40 {offsets = [0, 0], sizes = [128, 4], strides = [1, 1]} : vector<128x8xf32> to vector<128x4xf32>
    %c776 = arith.constant 776 : index
    %c0_17 = arith.constant 0 : index
    %42 = vector.load %arg19[%c776, %c0_17] : memref<1034x4xf32, #tpu.memory_space<vmem>>, vector<128x4xf32>
    tpu.vector_store %arg19[%c776, %c0_17], %41 {strides = array<i32>} : memref<1034x4xf32, #tpu.memory_space<vmem>>, vector<128x4xf32>,
    %43 = vector.extract_strided_slice %11 {offsets = [0, 896], sizes = [8, 128], strides = [1, 1]} : vector<8x1024xf32> to vector<8x128xf32>
    %44 = tpu.transpose %43, [1, 0] : vector<8x128xf32> -> vector<128x8xf32>
    %45 = vector.extract_strided_slice %44 {offsets = [0, 0], sizes = [128, 4], strides = [1, 1]} : vector<128x8xf32> to vector<128x4xf32>
    %c904 = arith.constant 904 : index
    %c0_18 = arith.constant 0 : index
    %46 = vector.load %arg19[%c904, %c0_18] : memref<1034x4xf32, #tpu.memory_space<vmem>>, vector<128x4xf32>
    tpu.vector_store %arg19[%c904, %c0_18], %45 {strides = array<i32>} : memref<1034x4xf32, #tpu.memory_space<vmem>>, vector<128x4xf32>,
    %c6_19 = arith.constant 6 : index
    %c0_20 = arith.constant 0 : index
    %47 = tpu.strided_load %arg19[%c6_19, %c0_20] {strides = array<i32: 4, 1>} : memref<1034x4xf32, #tpu.memory_space<vmem>>, vector<257x4xf32>
    %c7 = arith.constant 7 : index
    %c0_21 = arith.constant 0 : index
    %48 = tpu.strided_load %arg19[%c7, %c0_21] {strides = array<i32: 4, 1>} : memref<1034x4xf32, #tpu.memory_space<vmem>>, vector<257x4xf32>
    %c8_22 = arith.constant 8 : index
    %c0_23 = arith.constant 0 : index
    %49 = tpu.strided_load %arg19[%c8_22, %c0_23] {strides = array<i32: 4, 1>} : memref<1034x4xf32, #tpu.memory_space<vmem>>, vector<257x4xf32>
    %c9 = arith.constant 9 : index
    %c0_24 = arith.constant 0 : index
    %50 = tpu.strided_load %arg19[%c9, %c0_24] {strides = array<i32: 4, 1>} : memref<1034x4xf32, #tpu.memory_space<vmem>>, vector<257x4xf32>
    %51 = tpu.concatenate %47, %48, %49, %50 in 1 : vector<257x4xf32>, vector<257x4xf32>, vector<257x4xf32>, vector<257x4xf32> -> vector<257x16xf32>
    %52 = vector.extract_strided_slice %51 {offsets = [0, 0], sizes = [256, 16], strides = [1, 1]} : vector<257x16xf32> to vector<256x16xf32>
    %53 = vector.extract_strided_slice %51 {offsets = [1, 0], sizes = [256, 16], strides = [1, 1]} : vector<257x16xf32> to vector<256x16xf32>
    %c0_25 = arith.constant 0 : index
    %c0_26 = arith.constant 0 : index
    %54 = vector.load %arg4[%c0_25, %c0_26] : memref<32x8xf32, #tpu.memory_space<vmem>>, vector<16x8xf32>
    %cst_27 = arith.constant dense<0.000000e+00> : vector<256x8xf32>
    %55 = tpu.matmul %52, %54, %cst_27 {dimension_numbers = #tpu.dot_dimension_numbers<[1], [0], [0], [1], [0, 0, 1, 1], [], []>} : vector<256x16xf32>, vector<16x8xf32>, vector<256x8xf32> -> vector<256x8xf32>
    %c16 = arith.constant 16 : index
    %c0_28 = arith.constant 0 : index
    %56 = vector.load %arg4[%c16, %c0_28] : memref<32x8xf32, #tpu.memory_space<vmem>>, vector<16x8xf32>
    %cst_29 = arith.constant dense<0.000000e+00> : vector<256x8xf32>
    %57 = tpu.matmul %53, %56, %cst_29 {dimension_numbers = #tpu.dot_dimension_numbers<[1], [0], [0], [1], [0, 0, 1, 1], [], []>} : vector<256x16xf32>, vector<16x8xf32>, vector<256x8xf32> -> vector<256x8xf32>
    %58 = arith.addf %55, %57 : vector<256x8xf32>
    %cst_30 = arith.constant dense<0.000000e+00> : vector<8xf32>
    %59 = vector.multi_reduction <add>, %58, %cst_30 [0] : vector<256x8xf32> to vector<8xf32>
    %60 = vector.shape_cast %59 : vector<8xf32> to vector<1x8xf32>
    %cst_31 = arith.constant 3.906250e-03 : f32
    %61 = vector.broadcast %cst_31 : f32 to vector<1x8xf32>
    %62 = arith.mulf %60, %61 : vector<1x8xf32>
    %63 = arith.mulf %58, %58 : vector<256x8xf32>
    %cst_32 = arith.constant dense<0.000000e+00> : vector<8xf32>
    %64 = vector.multi_reduction <add>, %63, %cst_32 [0] : vector<256x8xf32> to vector<8xf32>
    %65 = vector.shape_cast %64 : vector<8xf32> to vector<1x8xf32>
    %cst_33 = arith.constant 3.906250e-03 : f32
    %66 = vector.broadcast %cst_33 : f32 to vector<1x8xf32>
    %67 = arith.mulf %65, %66 : vector<1x8xf32>
    %68 = arith.mulf %62, %62 : vector<1x8xf32>
    %69 = arith.subf %67, %68 : vector<1x8xf32>
    %cst_34 = arith.constant 0.000000e+00 : f32
    %70 = vector.broadcast %cst_34 : f32 to vector<1x8xf32>
    %71 = arith.maximumf %69, %70 : vector<1x8xf32>
    %c0_35 = arith.constant 0 : index
    %c0_36 = arith.constant 0 : index
    %72 = vector.load %arg5[%c0_35, %c0_36] : memref<1x8xf32, #tpu.memory_space<vmem>>, vector<1x8xf32>
    %cst_37 = arith.constant 9.99999974E-6 : f32
    %73 = vector.broadcast %cst_37 : f32 to vector<1x8xf32>
    %74 = arith.addf %71, %73 : vector<1x8xf32>
    %75 = math.rsqrt %74 : vector<1x8xf32>
    %76 = arith.mulf %72, %75 : vector<1x8xf32>
    %c0_38 = arith.constant 0 : index
    %c0_39 = arith.constant 0 : index
    %77 = vector.load %arg6[%c0_38, %c0_39] : memref<1x8xf32, #tpu.memory_space<vmem>>, vector<1x8xf32>
    %78 = arith.mulf %62, %76 : vector<1x8xf32>
    %79 = arith.subf %77, %78 : vector<1x8xf32>
    %80 = vector.broadcast %76 : vector<1x8xf32> to vector<256x8xf32>
    %81 = arith.mulf %58, %80 : vector<256x8xf32>
    %82 = vector.broadcast %79 : vector<1x8xf32> to vector<256x8xf32>
    %83 = arith.addf %81, %82 : vector<256x8xf32>
    %cst_40 = arith.constant 0.000000e+00 : f32
    %84 = vector.broadcast %cst_40 : f32 to vector<256x8xf32>
    %85 = arith.cmpf ogt, %83, %84 : vector<256x8xf32>
    %cst_41 = arith.constant 2.000000e-01 : f32
    %86 = vector.broadcast %cst_41 : f32 to vector<256x8xf32>
    %87 = arith.mulf %86, %83 : vector<256x8xf32>
    %88 = arith.select %85, %83, %87 : vector<256x8xi1>, vector<256x8xf32>
    %cst_42 = arith.constant 0.000000e+00 : f32
    %89 = vector.broadcast %cst_42 : f32 to vector<2x8xf32>
    %c6_43 = arith.constant 6 : index
    %c0_44 = arith.constant 0 : index
    %90 = vector.load %arg20[%c6_43, %c0_44] : memref<266x8xf32, #tpu.memory_space<vmem>>, vector<2x8xf32>
    tpu.vector_store %arg20[%c6_43, %c0_44], %89 {strides = array<i32>} : memref<266x8xf32, #tpu.memory_space<vmem>>, vector<2x8xf32>,
    %c8_45 = arith.constant 8 : index
    %c0_46 = arith.constant 0 : index
    %91 = vector.load %arg20[%c8_45, %c0_46] : memref<266x8xf32, #tpu.memory_space<vmem>>, vector<256x8xf32>
    tpu.vector_store %arg20[%c8_45, %c0_46], %88 {strides = array<i32>} : memref<266x8xf32, #tpu.memory_space<vmem>>, vector<256x8xf32>,
    %c264_47 = arith.constant 264 : index
    %c0_48 = arith.constant 0 : index
    %92 = vector.load %arg20[%c264_47, %c0_48] : memref<266x8xf32, #tpu.memory_space<vmem>>, vector<2x8xf32>
    tpu.vector_store %arg20[%c264_47, %c0_48], %89 {strides = array<i32>} : memref<266x8xf32, #tpu.memory_space<vmem>>, vector<2x8xf32>,
    %c6_49 = arith.constant 6 : index
    %c0_50 = arith.constant 0 : index
    %93 = tpu.strided_load %arg20[%c6_49, %c0_50] {strides = array<i32: 4, 1>} : memref<266x8xf32, #tpu.memory_space<vmem>>, vector<65x8xf32>
    %c7_51 = arith.constant 7 : index
    %c0_52 = arith.constant 0 : index
    %94 = tpu.strided_load %arg20[%c7_51, %c0_52] {strides = array<i32: 4, 1>} : memref<266x8xf32, #tpu.memory_space<vmem>>, vector<65x8xf32>
    %c8_53 = arith.constant 8 : index
    %c0_54 = arith.constant 0 : index
    %95 = tpu.strided_load %arg20[%c8_53, %c0_54] {strides = array<i32: 4, 1>} : memref<266x8xf32, #tpu.memory_space<vmem>>, vector<65x8xf32>
    %c9_55 = arith.constant 9 : index
    %c0_56 = arith.constant 0 : index
    %96 = tpu.strided_load %arg20[%c9_55, %c0_56] {strides = array<i32: 4, 1>} : memref<266x8xf32, #tpu.memory_space<vmem>>, vector<65x8xf32>
    %97 = tpu.concatenate %93, %94, %95, %96 in 1 : vector<65x8xf32>, vector<65x8xf32>, vector<65x8xf32>, vector<65x8xf32> -> vector<65x32xf32>
    %98 = vector.extract_strided_slice %97 {offsets = [0, 0], sizes = [64, 32], strides = [1, 1]} : vector<65x32xf32> to vector<64x32xf32>
    %99 = vector.extract_strided_slice %97 {offsets = [1, 0], sizes = [64, 32], strides = [1, 1]} : vector<65x32xf32> to vector<64x32xf32>
    %c0_57 = arith.constant 0 : index
    %c0_58 = arith.constant 0 : index
    %100 = vector.load %arg7[%c0_57, %c0_58] : memref<64x16xf32, #tpu.memory_space<vmem>>, vector<32x16xf32>
    %cst_59 = arith.constant dense<0.000000e+00> : vector<64x16xf32>
    %101 = tpu.matmul %98, %100, %cst_59 {dimension_numbers = #tpu.dot_dimension_numbers<[1], [0], [0], [1], [0, 0, 1, 1], [], []>} : vector<64x32xf32>, vector<32x16xf32>, vector<64x16xf32> -> vector<64x16xf32>
    %c32 = arith.constant 32 : index
    %c0_60 = arith.constant 0 : index
    %102 = vector.load %arg7[%c32, %c0_60] : memref<64x16xf32, #tpu.memory_space<vmem>>, vector<32x16xf32>
    %cst_61 = arith.constant dense<0.000000e+00> : vector<64x16xf32>
    %103 = tpu.matmul %99, %102, %cst_61 {dimension_numbers = #tpu.dot_dimension_numbers<[1], [0], [0], [1], [0, 0, 1, 1], [], []>} : vector<64x32xf32>, vector<32x16xf32>, vector<64x16xf32> -> vector<64x16xf32>
    %104 = arith.addf %101, %103 : vector<64x16xf32>
    %cst_62 = arith.constant dense<0.000000e+00> : vector<16xf32>
    %105 = vector.multi_reduction <add>, %104, %cst_62 [0] : vector<64x16xf32> to vector<16xf32>
    %106 = vector.shape_cast %105 : vector<16xf32> to vector<1x16xf32>
    %cst_63 = arith.constant 1.562500e-02 : f32
    %107 = vector.broadcast %cst_63 : f32 to vector<1x16xf32>
    %108 = arith.mulf %106, %107 : vector<1x16xf32>
    %109 = arith.mulf %104, %104 : vector<64x16xf32>
    %cst_64 = arith.constant dense<0.000000e+00> : vector<16xf32>
    %110 = vector.multi_reduction <add>, %109, %cst_64 [0] : vector<64x16xf32> to vector<16xf32>
    %111 = vector.shape_cast %110 : vector<16xf32> to vector<1x16xf32>
    %cst_65 = arith.constant 1.562500e-02 : f32
    %112 = vector.broadcast %cst_65 : f32 to vector<1x16xf32>
    %113 = arith.mulf %111, %112 : vector<1x16xf32>
    %114 = arith.mulf %108, %108 : vector<1x16xf32>
    %115 = arith.subf %113, %114 : vector<1x16xf32>
    %cst_66 = arith.constant 0.000000e+00 : f32
    %116 = vector.broadcast %cst_66 : f32 to vector<1x16xf32>
    %117 = arith.maximumf %115, %116 : vector<1x16xf32>
    %c0_67 = arith.constant 0 : index
    %c0_68 = arith.constant 0 : index
    %118 = vector.load %arg8[%c0_67, %c0_68] : memref<1x16xf32, #tpu.memory_space<vmem>>, vector<1x16xf32>
    %cst_69 = arith.constant 9.99999974E-6 : f32
    %119 = vector.broadcast %cst_69 : f32 to vector<1x16xf32>
    %120 = arith.addf %117, %119 : vector<1x16xf32>
    %121 = math.rsqrt %120 : vector<1x16xf32>
    %122 = arith.mulf %118, %121 : vector<1x16xf32>
    %c0_70 = arith.constant 0 : index
    %c0_71 = arith.constant 0 : index
    %123 = vector.load %arg9[%c0_70, %c0_71] : memref<1x16xf32, #tpu.memory_space<vmem>>, vector<1x16xf32>
    %124 = arith.mulf %108, %122 : vector<1x16xf32>
    %125 = arith.subf %123, %124 : vector<1x16xf32>
    %126 = vector.broadcast %122 : vector<1x16xf32> to vector<64x16xf32>
    %127 = arith.mulf %104, %126 : vector<64x16xf32>
    %128 = vector.broadcast %125 : vector<1x16xf32> to vector<64x16xf32>
    %129 = arith.addf %127, %128 : vector<64x16xf32>
    %cst_72 = arith.constant 0.000000e+00 : f32
    %130 = vector.broadcast %cst_72 : f32 to vector<64x16xf32>
    %131 = arith.cmpf ogt, %129, %130 : vector<64x16xf32>
    %cst_73 = arith.constant 2.000000e-01 : f32
    %132 = vector.broadcast %cst_73 : f32 to vector<64x16xf32>
    %133 = arith.mulf %132, %129 : vector<64x16xf32>
    %134 = arith.select %131, %129, %133 : vector<64x16xi1>, vector<64x16xf32>
    %cst_74 = arith.constant 0.000000e+00 : f32
    %135 = vector.broadcast %cst_74 : f32 to vector<2x16xf32>
    %c6_75 = arith.constant 6 : index
    %c0_76 = arith.constant 0 : index
    %136 = vector.load %arg21[%c6_75, %c0_76] : memref<74x16xf32, #tpu.memory_space<vmem>>, vector<2x16xf32>
    tpu.vector_store %arg21[%c6_75, %c0_76], %135 {strides = array<i32>} : memref<74x16xf32, #tpu.memory_space<vmem>>, vector<2x16xf32>,
    %c8_77 = arith.constant 8 : index
    %c0_78 = arith.constant 0 : index
    %137 = vector.load %arg21[%c8_77, %c0_78] : memref<74x16xf32, #tpu.memory_space<vmem>>, vector<64x16xf32>
    tpu.vector_store %arg21[%c8_77, %c0_78], %134 {strides = array<i32>} : memref<74x16xf32, #tpu.memory_space<vmem>>, vector<64x16xf32>,
    %c72 = arith.constant 72 : index
    %c0_79 = arith.constant 0 : index
    %138 = vector.load %arg21[%c72, %c0_79] : memref<74x16xf32, #tpu.memory_space<vmem>>, vector<2x16xf32>
    tpu.vector_store %arg21[%c72, %c0_79], %135 {strides = array<i32>} : memref<74x16xf32, #tpu.memory_space<vmem>>, vector<2x16xf32>,
    %c6_80 = arith.constant 6 : index
    %c0_81 = arith.constant 0 : index
    %139 = tpu.strided_load %arg21[%c6_80, %c0_81] {strides = array<i32: 4, 1>} : memref<74x16xf32, #tpu.memory_space<vmem>>, vector<17x16xf32>
    %c7_82 = arith.constant 7 : index
    %c0_83 = arith.constant 0 : index
    %140 = tpu.strided_load %arg21[%c7_82, %c0_83] {strides = array<i32: 4, 1>} : memref<74x16xf32, #tpu.memory_space<vmem>>, vector<17x16xf32>
    %c8_84 = arith.constant 8 : index
    %c0_85 = arith.constant 0 : index
    %141 = tpu.strided_load %arg21[%c8_84, %c0_85] {strides = array<i32: 4, 1>} : memref<74x16xf32, #tpu.memory_space<vmem>>, vector<17x16xf32>
    %c9_86 = arith.constant 9 : index
    %c0_87 = arith.constant 0 : index
    %142 = tpu.strided_load %arg21[%c9_86, %c0_87] {strides = array<i32: 4, 1>} : memref<74x16xf32, #tpu.memory_space<vmem>>, vector<17x16xf32>
    %143 = tpu.concatenate %139, %140, %141, %142 in 1 : vector<17x16xf32>, vector<17x16xf32>, vector<17x16xf32>, vector<17x16xf32> -> vector<17x64xf32>
    %144 = vector.extract_strided_slice %143 {offsets = [0, 0], sizes = [16, 64], strides = [1, 1]} : vector<17x64xf32> to vector<16x64xf32>
    %145 = vector.extract_strided_slice %143 {offsets = [1, 0], sizes = [16, 64], strides = [1, 1]} : vector<17x64xf32> to vector<16x64xf32>
    %c0_88 = arith.constant 0 : index
    %c0_89 = arith.constant 0 : index
    %146 = vector.load %arg10[%c0_88, %c0_89] : memref<128x32xf32, #tpu.memory_space<vmem>>, vector<64x32xf32>
    %cst_90 = arith.constant dense<0.000000e+00> : vector<16x32xf32>
    %147 = tpu.matmul %144, %146, %cst_90 {dimension_numbers = #tpu.dot_dimension_numbers<[1], [0], [0], [1], [0, 0, 1, 1], [], []>} : vector<16x64xf32>, vector<64x32xf32>, vector<16x32xf32> -> vector<16x32xf32>
    %c64 = arith.constant 64 : index
    %c0_91 = arith.constant 0 : index
    %148 = vector.load %arg10[%c64, %c0_91] : memref<128x32xf32, #tpu.memory_space<vmem>>, vector<64x32xf32>
    %cst_92 = arith.constant dense<0.000000e+00> : vector<16x32xf32>
    %149 = tpu.matmul %145, %148, %cst_92 {dimension_numbers = #tpu.dot_dimension_numbers<[1], [0], [0], [1], [0, 0, 1, 1], [], []>} : vector<16x64xf32>, vector<64x32xf32>, vector<16x32xf32> -> vector<16x32xf32>
    %150 = arith.addf %147, %149 : vector<16x32xf32>
    %cst_93 = arith.constant dense<0.000000e+00> : vector<32xf32>
    %151 = vector.multi_reduction <add>, %150, %cst_93 [0] : vector<16x32xf32> to vector<32xf32>
    %152 = vector.shape_cast %151 : vector<32xf32> to vector<1x32xf32>
    %cst_94 = arith.constant 6.250000e-02 : f32
    %153 = vector.broadcast %cst_94 : f32 to vector<1x32xf32>
    %154 = arith.mulf %152, %153 : vector<1x32xf32>
    %155 = arith.mulf %150, %150 : vector<16x32xf32>
    %cst_95 = arith.constant dense<0.000000e+00> : vector<32xf32>
    %156 = vector.multi_reduction <add>, %155, %cst_95 [0] : vector<16x32xf32> to vector<32xf32>
    %157 = vector.shape_cast %156 : vector<32xf32> to vector<1x32xf32>
    %cst_96 = arith.constant 6.250000e-02 : f32
    %158 = vector.broadcast %cst_96 : f32 to vector<1x32xf32>
    %159 = arith.mulf %157, %158 : vector<1x32xf32>
    %160 = arith.mulf %154, %154 : vector<1x32xf32>
    %161 = arith.subf %159, %160 : vector<1x32xf32>
    %cst_97 = arith.constant 0.000000e+00 : f32
    %162 = vector.broadcast %cst_97 : f32 to vector<1x32xf32>
    %163 = arith.maximumf %161, %162 : vector<1x32xf32>
    %c0_98 = arith.constant 0 : index
    %c0_99 = arith.constant 0 : index
    %164 = vector.load %arg11[%c0_98, %c0_99] : memref<1x32xf32, #tpu.memory_space<vmem>>, vector<1x32xf32>
    %cst_100 = arith.constant 9.99999974E-6 : f32
    %165 = vector.broadcast %cst_100 : f32 to vector<1x32xf32>
    %166 = arith.addf %163, %165 : vector<1x32xf32>
    %167 = math.rsqrt %166 : vector<1x32xf32>
    %168 = arith.mulf %164, %167 : vector<1x32xf32>
    %c0_101 = arith.constant 0 : index
    %c0_102 = arith.constant 0 : index
    %169 = vector.load %arg12[%c0_101, %c0_102] : memref<1x32xf32, #tpu.memory_space<vmem>>, vector<1x32xf32>
    %170 = arith.mulf %154, %168 : vector<1x32xf32>
    %171 = arith.subf %169, %170 : vector<1x32xf32>
    %172 = vector.broadcast %168 : vector<1x32xf32> to vector<16x32xf32>
    %173 = arith.mulf %150, %172 : vector<16x32xf32>
    %174 = vector.broadcast %171 : vector<1x32xf32> to vector<16x32xf32>
    %175 = arith.addf %173, %174 : vector<16x32xf32>
    %cst_103 = arith.constant 0.000000e+00 : f32
    %176 = vector.broadcast %cst_103 : f32 to vector<16x32xf32>
    %177 = arith.cmpf ogt, %175, %176 : vector<16x32xf32>
    %cst_104 = arith.constant 2.000000e-01 : f32
    %178 = vector.broadcast %cst_104 : f32 to vector<16x32xf32>
    %179 = arith.mulf %178, %175 : vector<16x32xf32>
    %180 = arith.select %177, %175, %179 : vector<16x32xi1>, vector<16x32xf32>
    %cst_105 = arith.constant 0.000000e+00 : f32
    %181 = vector.broadcast %cst_105 : f32 to vector<2x32xf32>
    %c6_106 = arith.constant 6 : index
    %c0_107 = arith.constant 0 : index
    %182 = vector.load %arg22[%c6_106, %c0_107] : memref<26x32xf32, #tpu.memory_space<vmem>>, vector<2x32xf32>
    tpu.vector_store %arg22[%c6_106, %c0_107], %181 {strides = array<i32>} : memref<26x32xf32, #tpu.memory_space<vmem>>, vector<2x32xf32>,
    %c8_108 = arith.constant 8 : index
    %c0_109 = arith.constant 0 : index
    %183 = vector.load %arg22[%c8_108, %c0_109] : memref<26x32xf32, #tpu.memory_space<vmem>>, vector<16x32xf32>
    tpu.vector_store %arg22[%c8_108, %c0_109], %180 {strides = array<i32>} : memref<26x32xf32, #tpu.memory_space<vmem>>, vector<16x32xf32>,
    %c24 = arith.constant 24 : index
    %c0_110 = arith.constant 0 : index
    %184 = vector.load %arg22[%c24, %c0_110] : memref<26x32xf32, #tpu.memory_space<vmem>>, vector<2x32xf32>
    tpu.vector_store %arg22[%c24, %c0_110], %181 {strides = array<i32>} : memref<26x32xf32, #tpu.memory_space<vmem>>, vector<2x32xf32>,
    %c6_111 = arith.constant 6 : index
    %c0_112 = arith.constant 0 : index
    %185 = tpu.strided_load %arg22[%c6_111, %c0_112] {strides = array<i32: 4, 1>} : memref<26x32xf32, #tpu.memory_space<vmem>>, vector<5x32xf32>
    %c7_113 = arith.constant 7 : index
    %c0_114 = arith.constant 0 : index
    %186 = tpu.strided_load %arg22[%c7_113, %c0_114] {strides = array<i32: 4, 1>} : memref<26x32xf32, #tpu.memory_space<vmem>>, vector<5x32xf32>
    %c8_115 = arith.constant 8 : index
    %c0_116 = arith.constant 0 : index
    %187 = tpu.strided_load %arg22[%c8_115, %c0_116] {strides = array<i32: 4, 1>} : memref<26x32xf32, #tpu.memory_space<vmem>>, vector<5x32xf32>
    %c9_117 = arith.constant 9 : index
    %c0_118 = arith.constant 0 : index
    %188 = tpu.strided_load %arg22[%c9_117, %c0_118] {strides = array<i32: 4, 1>} : memref<26x32xf32, #tpu.memory_space<vmem>>, vector<5x32xf32>
    %189 = tpu.concatenate %185, %186, %187, %188 in 1 : vector<5x32xf32>, vector<5x32xf32>, vector<5x32xf32>, vector<5x32xf32> -> vector<5x128xf32>
    %190 = vector.extract_strided_slice %189 {offsets = [0, 0], sizes = [4, 128], strides = [1, 1]} : vector<5x128xf32> to vector<4x128xf32>
    %191 = vector.extract_strided_slice %189 {offsets = [1, 0], sizes = [4, 128], strides = [1, 1]} : vector<5x128xf32> to vector<4x128xf32>
    %c0_119 = arith.constant 0 : index
    %c0_120 = arith.constant 0 : index
    %192 = vector.load %arg13[%c0_119, %c0_120] : memref<256x64xf32, #tpu.memory_space<vmem>>, vector<128x64xf32>
    %cst_121 = arith.constant dense<0.000000e+00> : vector<4x64xf32>
    %193 = tpu.matmul %190, %192, %cst_121 {dimension_numbers = #tpu.dot_dimension_numbers<[1], [0], [0], [1], [0, 0, 1, 1], [], []>} : vector<4x128xf32>, vector<128x64xf32>, vector<4x64xf32> -> vector<4x64xf32>
    %c128 = arith.constant 128 : index
    %c0_122 = arith.constant 0 : index
    %194 = vector.load %arg13[%c128, %c0_122] : memref<256x64xf32, #tpu.memory_space<vmem>>, vector<128x64xf32>
    %cst_123 = arith.constant dense<0.000000e+00> : vector<4x64xf32>
    %195 = tpu.matmul %191, %194, %cst_123 {dimension_numbers = #tpu.dot_dimension_numbers<[1], [0], [0], [1], [0, 0, 1, 1], [], []>} : vector<4x128xf32>, vector<128x64xf32>, vector<4x64xf32> -> vector<4x64xf32>
    %196 = arith.addf %193, %195 : vector<4x64xf32>
    %cst_124 = arith.constant dense<0.000000e+00> : vector<64xf32>
    %197 = vector.multi_reduction <add>, %196, %cst_124 [0] : vector<4x64xf32> to vector<64xf32>
    %198 = vector.shape_cast %197 : vector<64xf32> to vector<1x64xf32>
    %cst_125 = arith.constant 2.500000e-01 : f32
    %199 = vector.broadcast %cst_125 : f32 to vector<1x64xf32>
    %200 = arith.mulf %198, %199 : vector<1x64xf32>
    %201 = arith.mulf %196, %196 : vector<4x64xf32>
    %cst_126 = arith.constant dense<0.000000e+00> : vector<64xf32>
    %202 = vector.multi_reduction <add>, %201, %cst_126 [0] : vector<4x64xf32> to vector<64xf32>
    %203 = vector.shape_cast %202 : vector<64xf32> to vector<1x64xf32>
    %cst_127 = arith.constant 2.500000e-01 : f32
    %204 = vector.broadcast %cst_127 : f32 to vector<1x64xf32>
    %205 = arith.mulf %203, %204 : vector<1x64xf32>
    %206 = arith.mulf %200, %200 : vector<1x64xf32>
    %207 = arith.subf %205, %206 : vector<1x64xf32>
    %cst_128 = arith.constant 0.000000e+00 : f32
    %208 = vector.broadcast %cst_128 : f32 to vector<1x64xf32>
    %209 = arith.maximumf %207, %208 : vector<1x64xf32>
    %c0_129 = arith.constant 0 : index
    %c0_130 = arith.constant 0 : index
    %210 = vector.load %arg14[%c0_129, %c0_130] : memref<1x64xf32, #tpu.memory_space<vmem>>, vector<1x64xf32>
    %cst_131 = arith.constant 9.99999974E-6 : f32
    %211 = vector.broadcast %cst_131 : f32 to vector<1x64xf32>
    %212 = arith.addf %209, %211 : vector<1x64xf32>
    %213 = math.rsqrt %212 : vector<1x64xf32>
    %214 = arith.mulf %210, %213 : vector<1x64xf32>
    %c0_132 = arith.constant 0 : index
    %c0_133 = arith.constant 0 : index
    %215 = vector.load %arg15[%c0_132, %c0_133] : memref<1x64xf32, #tpu.memory_space<vmem>>, vector<1x64xf32>
    %216 = arith.mulf %200, %214 : vector<1x64xf32>
    %217 = arith.subf %215, %216 : vector<1x64xf32>
    %218 = vector.broadcast %214 : vector<1x64xf32> to vector<4x64xf32>
    %219 = arith.mulf %196, %218 : vector<4x64xf32>
    %220 = vector.broadcast %217 : vector<1x64xf32> to vector<4x64xf32>
    %221 = arith.addf %219, %220 : vector<4x64xf32>
    %cst_134 = arith.constant 0.000000e+00 : f32
    %222 = vector.broadcast %cst_134 : f32 to vector<4x64xf32>
    %223 = arith.cmpf ogt, %221, %222 : vector<4x64xf32>
    %cst_135 = arith.constant 2.000000e-01 : f32
    %224 = vector.broadcast %cst_135 : f32 to vector<4x64xf32>
    %225 = arith.mulf %224, %221 : vector<4x64xf32>
    %226 = arith.select %223, %221, %225 : vector<4x64xi1>, vector<4x64xf32>
    %c0_136 = arith.constant 0 : index
    %c0_137 = arith.constant 0 : index
    %227 = vector.load %arg16[%c0_136, %c0_137] : memref<4x64xf32, #tpu.memory_space<vmem>>, vector<4x64xf32>
    %228 = arith.mulf %226, %227 : vector<4x64xf32>
    %229 = vector.shape_cast %228 : vector<4x64xf32> to vector<1x4x64xf32>
    %cst_138 = arith.constant dense<0.000000e+00> : vector<1xf32>
    %230 = vector.multi_reduction <add>, %229, %cst_138 [1, 2] : vector<1x4x64xf32> to vector<1xf32>
    %231 = vector.shape_cast %230 : vector<1xf32> to vector<1x1x1xf32>
    %232 = vector.extract %231[0, 0, 0] : f32 from vector<1x1x1xf32>
    %c0_139 = arith.constant 0 : index
    %c0_140 = arith.constant 0 : index
    %233 = vector.load %arg17[%c0_139, %c0_140] : memref<1x1xf32, #tpu.memory_space<vmem>>, vector<1x1xf32>
    %234 = vector.broadcast %232 : f32 to vector<1x1xf32>
    %235 = arith.addf %234, %233 : vector<1x1xf32>
    %c0_141 = arith.constant 0 : index
    %c0_142 = arith.constant 0 : index
    %c0_143 = arith.constant 0 : index
    %236 = vector.load %arg18[%c0_141, %c0_142, %c0_143] : memref<1x1x1xf32, #tpu.memory_space<vmem>>, vector<1x1x1xf32>
    %237 = vector.shape_cast %236 : vector<1x1x1xf32> to vector<1x1xf32>
    %238 = vector.shape_cast %235 : vector<1x1xf32> to vector<1x1x1xf32>
    tpu.vector_store %arg18[%c0_141, %c0_142, %c0_143], %238 {strides = array<i32>} : memref<1x1x1xf32, #tpu.memory_space<vmem>>, vector<1x1x1xf32>,
    return
  }
  func.func @transform_0(%arg0: i32) -> (i32, i32, i32) {
    %c0_i32 = arith.constant 0 : i32
    %c0_i32_0 = arith.constant 0 : i32
    %c0_i32_1 = arith.constant 0 : i32
    return %arg0, %c0_i32, %c0_i32_0 : i32, i32, i32
  }
  func.func @transform_1(%arg0: i32) -> (i32, i32) {
    %c0_i32 = arith.constant 0 : i32
    %c0_i32_0 = arith.constant 0 : i32
    %c0_i32_1 = arith.constant 0 : i32
    return %c0_i32, %c0_i32_0 : i32, i32
  }
  func.func @transform_2(%arg0: i32) -> (i32, i32) {
    %c0_i32 = arith.constant 0 : i32
    %c0_i32_0 = arith.constant 0 : i32
    %c0_i32_1 = arith.constant 0 : i32
    return %c0_i32, %c0_i32_0 : i32, i32
  }
  func.func @transform_3(%arg0: i32) -> (i32, i32) {
    %c0_i32 = arith.constant 0 : i32
    %c0_i32_0 = arith.constant 0 : i32
    %c0_i32_1 = arith.constant 0 : i32
    return %c0_i32, %c0_i32_0 : i32, i32
  }
  func.func @transform_4(%arg0: i32) -> (i32, i32) {
    %c0_i32 = arith.constant 0 : i32
    %c0_i32_0 = arith.constant 0 : i32
    %c0_i32_1 = arith.constant 0 : i32
    return %c0_i32, %c0_i32_0 : i32, i32
  }
  func.func @transform_5(%arg0: i32) -> (i32, i32) {
    %c0_i32 = arith.constant 0 : i32
    %c0_i32_0 = arith.constant 0 : i32
    %c0_i32_1 = arith.constant 0 : i32
    return %c0_i32, %c0_i32_0 : i32, i32
  }
  func.func @transform_6(%arg0: i32) -> (i32, i32) {
    %c0_i32 = arith.constant 0 : i32
    %c0_i32_0 = arith.constant 0 : i32
    %c0_i32_1 = arith.constant 0 : i32
    return %c0_i32, %c0_i32_0 : i32, i32
  }
  func.func @transform_7(%arg0: i32) -> (i32, i32) {
    %c0_i32 = arith.constant 0 : i32
    %c0_i32_0 = arith.constant 0 : i32
    %c0_i32_1 = arith.constant 0 : i32
    return %c0_i32, %c0_i32_0 : i32, i32
  }
  func.func @transform_8(%arg0: i32) -> (i32, i32) {
    %c0_i32 = arith.constant 0 : i32
    %c0_i32_0 = arith.constant 0 : i32
    %c0_i32_1 = arith.constant 0 : i32
    return %c0_i32, %c0_i32_0 : i32, i32
  }
  func.func @transform_9(%arg0: i32) -> (i32, i32) {
    %c0_i32 = arith.constant 0 : i32
    %c0_i32_0 = arith.constant 0 : i32
    %c0_i32_1 = arith.constant 0 : i32
    return %c0_i32, %c0_i32_0 : i32, i32
  }
  func.func @transform_10(%arg0: i32) -> (i32, i32) {
    %c0_i32 = arith.constant 0 : i32
    %c0_i32_0 = arith.constant 0 : i32
    %c0_i32_1 = arith.constant 0 : i32
    return %c0_i32, %c0_i32_0 : i32, i32
  }
  func.func @transform_11(%arg0: i32) -> (i32, i32) {
    %c0_i32 = arith.constant 0 : i32
    %c0_i32_0 = arith.constant 0 : i32
    %c0_i32_1 = arith.constant 0 : i32
    return %c0_i32, %c0_i32_0 : i32, i32
  }
  func.func @transform_12(%arg0: i32) -> (i32, i32) {
    %c0_i32 = arith.constant 0 : i32
    %c0_i32_0 = arith.constant 0 : i32
    %c0_i32_1 = arith.constant 0 : i32
    return %c0_i32, %c0_i32_0 : i32, i32
  }
  func.func @transform_13(%arg0: i32) -> (i32, i32) {
    %c0_i32 = arith.constant 0 : i32
    %c0_i32_0 = arith.constant 0 : i32
    %c0_i32_1 = arith.constant 0 : i32
    return %c0_i32, %c0_i32_0 : i32, i32
  }
  func.func @transform_14(%arg0: i32) -> (i32, i32) {
    %c0_i32 = arith.constant 0 : i32
    %c0_i32_0 = arith.constant 0 : i32
    %c0_i32_1 = arith.constant 0 : i32
    return %c0_i32, %c0_i32_0 : i32, i32
  }
  func.func @transform_15(%arg0: i32) -> (i32, i32) {
    %c0_i32 = arith.constant 0 : i32
    %c0_i32_0 = arith.constant 0 : i32
    %c0_i32_1 = arith.constant 0 : i32
    return %c0_i32, %c0_i32_0 : i32, i32
  }
  func.func @transform_16(%arg0: i32) -> (i32, i32) {
    %c0_i32 = arith.constant 0 : i32
    %c0_i32_0 = arith.constant 0 : i32
    %c0_i32_1 = arith.constant 0 : i32
    return %c0_i32, %c0_i32_0 : i32, i32
  }
  func.func @transform_17(%arg0: i32) -> (i32, i32, i32) {
    %c0_i32 = arith.constant 0 : i32
    %c0_i32_0 = arith.constant 0 : i32
    %c0_i32_1 = arith.constant 0 : i32
    return %arg0, %c0_i32, %c0_i32_0 : i32, i32, i32
  }
}

</mosaic_0001>

<bundles_post_ra>
// kernel: discriminator_forward.1
= control target key start
LH: loop header
LB: loop body
LE: loop exit
PB: predicated region body
PF: predicated region fallthrough
CT: control target
= control target key end

     0   :  { %s5113_s26 = smov 0   ;;  %s6682_s0 = inlined_call_operand.vmem [shape: f32[2,8,1024], index: 0, kind: input, shape index: {}]   ;;  %s6683_s1 = inlined_call_operand.vmem [shape: f32[8,8], index: 1, kind: input, shape index: {}]   ;;  %s6684_s2 = inlined_call_operand.vmem [shape: f32[8,1], index: 2, kind: input, shape index: {}]   ;;  %s6685_s3 = inlined_call_operand.vmem [shape: f32[32,8], index: 3, kind: input, shape index: {}]   ;;  %s6686_s4 = inlined_call_operand.vmem [shape: f32[1,8], index: 4, kind: input, shape index: {}]   ;;  %s6687_s5 = inlined_call_operand.vmem [shape: f32[1,8], index: 5, kind: input, shape index: {}]   ;;  %s6688_s6 = inlined_call_operand.vmem [shape: f32[64,16], index: 6, kind: input, shape index: {}]   ;;  %s6689_s7 = inlined_call_operand.vmem [shape: f32[1,16], index: 7, kind: input, shape index: {}]   ;;  %s6690_s8 = inlined_call_operand.vmem [shape: f32[1,16], index: 8, kind: input, shape index: {}]   ;;  %s6691_s9 = inlined_call_operand.vmem [shape: f32[128,32], index: 9, kind: input, shape index: {}]   ;;  %s6692_s10 = inlined_call_operand.vmem [shape: f32[1,32], index: 10, kind: input, shape index: {}]   ;;  %s6693_s11 = inlined_call_operand.vmem [shape: f32[1,32], index: 11, kind: input, shape index: {}]   ;;  %s6694_s12 = inlined_call_operand.vmem [shape: f32[256,64], index: 12, kind: input, shape index: {}]   ;;  %s6695_s13 = inlined_call_operand.vmem [shape: f32[1,64], index: 13, kind: input, shape index: {}]   ;;  %s6696_s14 = inlined_call_operand.vmem [shape: f32[1,64], index: 14, kind: input, shape index: {}]   ;;  %s6697_s15 = inlined_call_operand.vmem [shape: f32[4,64], index: 15, kind: input, shape index: {}]   ;;  %s6698_s16 = inlined_call_operand.<no memory space> [shape: f32[1,1], index: 16, kind: input, shape index: {}]   ;;  %s6699_s17 = inlined_call_operand.vmem [shape: f32[2,1,1], index: 17, kind: output, shape index: {}]  }
   0x1   :  { %6702 = sst [smem:[#allocation7_spill]] %s6682_s0  ;;  %v22_v0 = vstv %s6698_s16 }
   0x2   :  { %6703 = sst [smem:[#allocation8_spill]] %s6683_s1  ;;  %23 = vst [vmem:[#allocation6] sm:$0x1] %v22_v0 }
   0x3 LB: > { %s4323_s27 = sadd.s32 4294967295, %s5005_s26   ;;  %p4327_p0 = scmp.ge.s32.totalorder %s5005_s26, 1  ;;  %s5005_s26 = sphi %s5113_s26, %s29_s26  }
   0x4   : > { %p489_p1 = scmp.lt.s32.totalorder %s5005_s26, 3 }
   0x6   : > { %p490_p2 = pnand %p4327_p0, %p489_p1 }
   0x7   : > { %p539_p3 = scmp.lt.s32.totalorder (!%p490_p2), %s4323_s27, 1  ;;  %v556_v1 = vld [vmem:[%s6684_s2] sm:$0xff] (!%p490_p2)  ;;  %v5007_v2 = vmov (!%p490_p2), 0.0   ;;  %v5008_v3 = vmov (!%p490_p2), 0   ;;  %s6704_s18 = sld [smem:[#allocation7_spill]] (!%p490_p2)  ;;  %vm562_vm0 = vcmask (!%p490_p2), 64512  }
   0x8   : > { %493 = sbr.rel (%p490_p2) target bundleno = 2714 (0xa9a), region = 88  ;;  %630 = vmatprep.mubr.f32.mxu1 (!%p490_p2), %v5007_v2  ;;  %772 = vmatprep.mubr.f32.mxu0 (!%p490_p2), %v5007_v2  ;;  %s6705_s21 = sld [smem:[#allocation8_spill]] (!%p490_p2)  ;;  %vm874_vm3 = vcmask (!%p490_p2), 25600   ;;  %vm909_vm8 = vcmask (!%p490_p2), 31744   ;;  %vm1988_vm11 = vcmask (!%p490_p2), 97280   ;;  %vm6700_vm12 = vcmask (!%p490_p2), 1046528  }
   0x9   : > { %4990 = vset.pattern.permute.xlu0 (!%p490_p2), %v5008_v3  ;;  %875 = vst.msk [vmem:[#allocation2 + $0x6] sm:$0x3] (!%p490_p2), %vm874_vm3, %v5007_v2  ;;  %876 = vst.msk [vmem:[#allocation2 + $0x408] sm:$0x3] (!%p490_p2), %vm874_vm3, %v5007_v2  ;;  %s5009_s22 = smov (!%p490_p2), 4   ;;  %s5010_s23 = smov (!%p490_p2), 8  }
   0xa   : > { %559 = vperm.xlu0 (!%p490_p2), %4990, %v556_v1   ;;  %s5011_s24 = smov (!%p490_p2), 12   ;;  %vm6701_vm13 = vcmask (!%p490_p2), 130048   ;;  %vm3058_vm14 = vcmask (!%p490_p2), 58368   ;;  %s5012_s1 = smov (!%p490_p2), 16  }
   0xb   : > { %3092 = vst.msk [vmem:[#allocation3 + $0x108] sm:$0x3] (!%p490_p2), %vm3058_vm14, %v5007_v2  ;;  %3059 = vst.msk [vmem:[#allocation3 + $0x6] sm:$0x3] (!%p490_p2), %vm3058_vm14, %v5007_v2  ;;  %s5013_s20 = smov (!%p490_p2), 24   ;;  %s5014_s0 = smov (!%p490_p2), 32  }
   0xc   : > { %s5018_s28 = smov (!%p490_p2), 64   ;;  %s5019_s29 = smov (!%p490_p2), 96  }
   0xe   : > { %v547_v4 = vld [vmem:[%s6705_s21] sm:$0xff] (!%p490_p2) }
   0xf   : > { %s6763_s27 = smov (!%p539_p3, %s4323_s27), 1 }
  0x10   : > { %s4420_s16 = sshll.u32 %s6763_s27, 6 }
  0x11   : > { %s543_s19 = scalar_lea.vmem %s6704_s18, %s4420_s16 }
  0x12   : > { %v549_v5 = vld [vmem:[%s543_s19 + $0x8] sm:$0xff]  ;;  %v548_v7 = vld [vmem:[%s543_s19] sm:$0xff]  ;;  %v551_v9 = vld [vmem:[%s543_s19 + $0x18] sm:$0xff] }
  0x13   : > { %v553_v6 = vld [vmem:[%s543_s19 + $0x28] sm:$0xff]  ;;  %566 = vmatprep.subr.mxu1 %v549_v5  ;;  %v552_v8 = vld [vmem:[%s543_s19 + $0x20] sm:$0xff]  ;;  %v550_v10 = vld [vmem:[%s543_s19 + $0x10] sm:$0xff] }
  0x14   : > { %708 = vmatprep.subr.mxu0 %v553_v6  ;;  %567 = vmatpush1.msra.mxu1 %v548_v7  ;;  %v555_v11 = vld [vmem:[%s543_s19 + $0x38] sm:$0xff]  ;;  %v554_v12 = vld [vmem:[%s543_s19 + $0x30] sm:$0xff] }
  0x15   : > { %709 = vmatpush1.msra.mxu0 %v552_v8  ;;  %4330 = vmatmul.mubr.msk.f32.vlgmr.msra.gmra.mrb[0].mxu1 %vm562_vm0, %v547_v4 }
  0x16   : > { %4332 = vmatmul.mubr.msk.f32.vlgmr.msra.gmra.mrb[0].mxu0 %vm562_vm0, %v547_v4  ;;  %637 = vmatprep.subr.mxu1 %v551_v9 }
  0x17   : > { %701 = vmatprep.mubr.f32.mxu1 %v5007_v2  ;;  %638 = vmatpush1.msra.mxu1 %v550_v10 }
  0x18   : > { %779 = vmatprep.subr.mxu1 %v555_v11 }
  0x19   : > { %4331 = vmatmul.mubr.msk.f32.vlgmr.msra.gmra.mrb[2].mxu1 %vm562_vm0, %v547_v4 }
  0x1a   : > { %780 = vmatpush1.msra.mxu1 %v554_v12  ;;  %843 = vmatprep.mubr.f32.mxu1 %v5007_v2 }
  0x1d   : > { %4333 = vmatmul.mubr.msk.f32.vlgmr.msra.gmra.mrb[4].mxu1 %vm562_vm0, %v547_v4 }
  0x89   : > { %v5141_v13 = vpop.permute.xlu0 %559 }
  0xe8   : > { %v632_v14 = vpop.f32.mrb[0].mxu1 }
  0xe9   : > { %v774_v15 = vpop.f32.mrb[0].mxu0  ;;  %v633_v16 = vadd.f32 %v632_v14, %v5141_v13  ;;  %v634_v18 = vpop.f32.mrb[1].mxu1 }
  0xea   : > { %v775_v17 = vadd.f32 %v774_v15, %v5141_v13  ;;  %v776_v19 = vpop.f32.mrb[1].mxu0  ;;  %v635_v28 = vadd.f32 %v634_v18, %v5141_v13 }
  0xeb   : > { %v858_v20 = vmul.f32 0.2, %v633_v16  ;;  %vm850_vm2 = vcmp.gt.f32.partialorder %v633_v16, 0.0  ;;  %v777_v29 = vadd.f32 %v776_v19, %v5141_v13 }
  0xec   : > { %vm854_vm1 = vcmp.gt.f32.partialorder %v775_v17, 0.0  ;;  %v862_v21 = vmul.f32 0.2, %v775_v17  ;;  %v703_v22 = vpop.f32.mrb[2].mxu1  ;;  %v859_v31 = vmul.f32 0.2, %v635_v28 }
  0xed   : > { %v705_v23 = vpop.f32.mrb[3].mxu1  ;;  %v866_v25 = vsel %vm850_vm2, %v633_v16, %v858_v20  ;;  %v863_v30 = vmul.f32 0.2, %v777_v29  ;;  %vm851_vm4 = vcmp.gt.f32.partialorder %v635_v28, 0.0  ;;  %vm855_vm5 = vcmp.gt.f32.partialorder %v777_v29, 0.0 }
  0xee   : > { %v870_v24 = vsel %vm854_vm1, %v775_v17, %v862_v21  ;;  %877 = vxpose.xlu0.b32.start.end [1/1] (short) %v866_v25, 128  ;;  %v867_v32 = vsel %vm851_vm4, %v635_v28, %v859_v31  ;;  %v704_v34 = vadd.f32 %v703_v22, %v5141_v13  ;;  %v706_v35 = vadd.f32 %v705_v23, %v5141_v13 }
  0xef   : > { %1070 = vxpose.xlu1.b32.start.end [1/1] (short) %v870_v24, 128  ;;  %v871_v33 = vsel %vm855_vm5, %v777_v29, %v863_v30 }
  0xf0   : > { %v5145_v26 = vpop.f32.mrb[4].mxu1  ;;  %v861_v36 = vmul.f32 0.2, %v706_v35  ;;  %v860_v37 = vmul.f32 0.2, %v704_v34  ;;  %vm852_vm6 = vcmp.gt.f32.partialorder %v704_v34, 0.0 }
  0xf1   : > { %v5147_v27 = vpop.f32.mrb[5].mxu1  ;;  %vm853_vm7 = vcmp.gt.f32.partialorder %v706_v35, 0.0  ;;  %v846_v0 = vadd.f32 %v5145_v26, %v5141_v13 }
  0xf2   : > { %v868_v38 = vsel %vm852_vm6, %v704_v34, %v860_v37  ;;  %v869_v39 = vsel %vm853_vm7, %v706_v35, %v861_v36  ;;  %v848_v1 = vadd.f32 %v5147_v27, %v5141_v13 }
  0xf3   : > { %v864_v5 = vmul.f32 0.2, %v846_v0  ;;  %vm856_vm10 = vcmp.gt.f32.partialorder %v846_v0, 0.0 }
  0xf4   : > { %v865_v6 = vmul.f32 0.2, %v848_v1  ;;  %vm857_vm9 = vcmp.gt.f32.partialorder %v848_v1, 0.0 }
  0xf5   : > { %v872_v9 = vsel %vm856_vm10, %v846_v0, %v864_v5 }
  0xf6   : > { %v873_v10 = vsel %vm857_vm9, %v848_v1, %v865_v6 }
 0x12b   : > { %1118 = vxpose.xlu0.b32.start.end [1/1] (short) %v871_v33, 128 }
 0x12c   : > { %926 = vxpose.xlu1.b32.start.end [1/1] (short) %v867_v32, 128 }
 0x168   : > { %1022 = vxpose.xlu0.b32.start.end [1/1] (short) %v869_v39, 128 }
 0x169   : > { %974 = vxpose.xlu1.b32.start.end [1/1] (short) %v868_v38, 128 }
 0x16e   : > { %v893_v41 = vpop.trf.xlu0 }
 0x16f   : > { %v1086_v40 = vpop.trf.xlu1  ;;  %910 = vst.msk [vmem:[#allocation2 + $0x8] sm:$0xff] %vm909_vm8, %v893_v41 }
 0x170   : > { %1102 = vst.msk [vmem:[#allocation2 + $0x208] sm:$0xff] %vm909_vm8, %v1086_v40 }
 0x172   : > { %v894_v43 = vpop.trf.xlu0 }
 0x173   : > { %v1087_v42 = vpop.trf.xlu1  ;;  %911 = vst.msk [vmem:[#allocation2 + $0x10] sm:$0xff] %vm909_vm8, %v894_v43 }
 0x174   : > { %1103 = vst.msk [vmem:[#allocation2 + $0x210] sm:$0xff] %vm909_vm8, %v1087_v42 }
 0x176   : > { %v895_v45 = vpop.trf.xlu0 }
 0x177   : > { %v1088_v44 = vpop.trf.xlu1  ;;  %912 = vst.msk [vmem:[#allocation2 + $0x18] sm:$0xff] %vm909_vm8, %v895_v45 }
 0x178   : > { %1104 = vst.msk [vmem:[#allocation2 + $0x218] sm:$0xff] %vm909_vm8, %v1088_v44 }
 0x17a   : > { %v896_v47 = vpop.trf.xlu0 }
 0x17b   : > { %v1089_v46 = vpop.trf.xlu1  ;;  %913 = vst.msk [vmem:[#allocation2 + $0x20] sm:$0xff] %vm909_vm8, %v896_v47 }
 0x17c   : > { %1105 = vst.msk [vmem:[#allocation2 + $0x220] sm:$0xff] %vm909_vm8, %v1089_v46 }
 0x17e   : > { %v897_v49 = vpop.trf.xlu0 }
 0x17f   : > { %v1090_v48 = vpop.trf.xlu1  ;;  %914 = vst.msk [vmem:[#allocation2 + $0x28] sm:$0xff] %vm909_vm8, %v897_v49 }
 0x180   : > { %1106 = vst.msk [vmem:[#allocation2 + $0x228] sm:$0xff] %vm909_vm8, %v1090_v48 }
 0x182   : > { %v898_v51 = vpop.trf.xlu0 }
 0x183   : > { %v1091_v50 = vpop.trf.xlu1  ;;  %915 = vst.msk [vmem:[#allocation2 + $0x30] sm:$0xff] %vm909_vm8, %v898_v51 }
 0x184   : > { %1107 = vst.msk [vmem:[#allocation2 + $0x230] sm:$0xff] %vm909_vm8, %v1091_v50 }
 0x186   : > { %v899_v53 = vpop.trf.xlu0 }
 0x187   : > { %v1092_v52 = vpop.trf.xlu1  ;;  %916 = vst.msk [vmem:[#allocation2 + $0x38] sm:$0xff] %vm909_vm8, %v899_v53 }
 0x188   : > { %1108 = vst.msk [vmem:[#allocation2 + $0x238] sm:$0xff] %vm909_vm8, %v1092_v52 }
 0x18a   : > { %v900_v55 = vpop.trf.xlu0 }
 0x18b   : > { %v1093_v54 = vpop.trf.xlu1  ;;  %917 = vst.msk [vmem:[#allocation2 + $0x40] sm:$0xff] %vm909_vm8, %v900_v55 }
 0x18c   : > { %1109 = vst.msk [vmem:[#allocation2 + $0x240] sm:$0xff] %vm909_vm8, %v1093_v54 }
 0x18e   : > { %v901_v57 = vpop.trf.xlu0 }
 0x18f   : > { %v1094_v56 = vpop.trf.xlu1  ;;  %918 = vst.msk [vmem:[#allocation2 + $0x48] sm:$0xff] %vm909_vm8, %v901_v57  ;;  %v1329_v57 = vld [vmem:[#allocation2 + $0x7] ss:$4 sm:$0xff] }
 0x190   : > { %1110 = vst.msk [vmem:[#allocation2 + $0x248] sm:$0xff] %vm909_vm8, %v1094_v56 }
 0x192   : > { %v902_v59 = vpop.trf.xlu0 }
 0x193   : > { %v1095_v58 = vpop.trf.xlu1  ;;  %919 = vst.msk [vmem:[#allocation2 + $0x50] sm:$0xff] %vm909_vm8, %v902_v59 }
 0x194   : > { %1111 = vst.msk [vmem:[#allocation2 + $0x250] sm:$0xff] %vm909_vm8, %v1095_v58 }
 0x196   : > { %v903_v61 = vpop.trf.xlu0 }
 0x197   : > { %v1096_v60 = vpop.trf.xlu1  ;;  %920 = vst.msk [vmem:[#allocation2 + $0x58] sm:$0xff] %vm909_vm8, %v903_v61 }
 0x198   : > { %1112 = vst.msk [vmem:[#allocation2 + $0x258] sm:$0xff] %vm909_vm8, %v1096_v60  ;;  %v1395_v60 = vld [vmem:[#allocation2 + $0x8] ss:$4 sm:$0xff] }
 0x19a   : > { %v904_v63 = vpop.trf.xlu0 }
 0x19b   : > { %v1097_v62 = vpop.trf.xlu1  ;;  %921 = vst.msk [vmem:[#allocation2 + $0x60] sm:$0xff] %vm909_vm8, %v904_v63  ;;  %v1461_v63 = vld [vmem:[#allocation2 + $0x9] ss:$4 sm:$0xff] }
 0x19c   : > { %1113 = vst.msk [vmem:[#allocation2 + $0x260] sm:$0xff] %vm909_vm8, %v1097_v62 }
 0x19e   : > { %v905_v4 = vpop.trf.xlu0 }
 0x19f   : > { %v1098_v3 = vpop.trf.xlu1  ;;  %922 = vst.msk [vmem:[#allocation2 + $0x68] sm:$0xff] %vm909_vm8, %v905_v4 }
 0x1a0   : > { %1114 = vst.msk [vmem:[#allocation2 + $0x268] sm:$0xff] %vm909_vm8, %v1098_v3  ;;  %v1331_v3 = vld [vmem:[#allocation2 + $0x27] ss:$4 sm:$0xff] }
 0x1a2   : > { %v906_v8 = vpop.trf.xlu0 }
 0x1a3   : > { %v1099_v7 = vpop.trf.xlu1  ;;  %923 = vst.msk [vmem:[#allocation2 + $0x70] sm:$0xff] %vm909_vm8, %v906_v8 }
 0x1a4   : > { %1115 = vst.msk [vmem:[#allocation2 + $0x270] sm:$0xff] %vm909_vm8, %v1099_v7 }
 0x1a6   : > { %v907_v12 = vpop.trf.xlu0  ;;  %1214 = vxpose.xlu0.b32.start.end [1/1] (short) %v873_v10, 128 }
 0x1a7   : > { %v1100_v11 = vpop.trf.xlu1  ;;  %1166 = vxpose.xlu1.b32.start.end [1/1] (short) %v872_v9, 128  ;;  %924 = vst.msk [vmem:[#allocation2 + $0x78] sm:$0xff] %vm909_vm8, %v907_v12 }
 0x1a8   : > { %1116 = vst.msk [vmem:[#allocation2 + $0x278] sm:$0xff] %vm909_vm8, %v1100_v11 }
 0x1aa   : > { %v908_v14 = vpop.trf.xlu0 }
 0x1ab   : > { %v1101_v13 = vpop.trf.xlu1  ;;  %925 = vst.msk [vmem:[#allocation2 + $0x80] sm:$0xff] %vm909_vm8, %v908_v14 }
 0x1ac   : > { %1117 = vst.msk [vmem:[#allocation2 + $0x280] sm:$0xff] %vm909_vm8, %v1101_v13 }
 0x1ae   : > { %v1134_v16 = vpop.trf.xlu0 }
 0x1af   : > { %v942_v15 = vpop.trf.xlu1  ;;  %1150 = vst.msk [vmem:[#allocation2 + $0x288] sm:$0xff] %vm909_vm8, %v1134_v16 }
 0x1b0   : > { %958 = vst.msk [vmem:[#allocation2 + $0x88] sm:$0xff] %vm909_vm8, %v942_v15 }
 0x1b2   : > { %v1135_v18 = vpop.trf.xlu0 }
 0x1b3   : > { %v943_v17 = vpop.trf.xlu1  ;;  %1151 = vst.msk [vmem:[#allocation2 + $0x290] sm:$0xff] %vm909_vm8, %v1135_v18 }
 0x1b4   : > { %959 = vst.msk [vmem:[#allocation2 + $0x90] sm:$0xff] %vm909_vm8, %v943_v17 }
 0x1b6   : > { %v1136_v20 = vpop.trf.xlu0 }
 0x1b7   : > { %v944_v19 = vpop.trf.xlu1  ;;  %1152 = vst.msk [vmem:[#allocation2 + $0x298] sm:$0xff] %vm909_vm8, %v1136_v20  ;;  %v1397_v20 = vld [vmem:[#allocation2 + $0x28] ss:$4 sm:$0xff] }
 0x1b8   : > { %960 = vst.msk [vmem:[#allocation2 + $0x98] sm:$0xff] %vm909_vm8, %v944_v19 }
 0x1ba   : > { %v1137_v22 = vpop.trf.xlu0 }
 0x1bb   : > { %v945_v21 = vpop.trf.xlu1  ;;  %1153 = vst.msk [vmem:[#allocation2 + $0x2a0] sm:$0xff] %vm909_vm8, %v1137_v22 }
 0x1bc   : > { %961 = vst.msk [vmem:[#allocation2 + $0xa0] sm:$0xff] %vm909_vm8, %v945_v21 }
 0x1be   : > { %v1138_v24 = vpop.trf.xlu0 }
 0x1bf   : > { %v946_v23 = vpop.trf.xlu1  ;;  %1154 = vst.msk [vmem:[#allocation2 + $0x2a8] sm:$0xff] %vm909_vm8, %v1138_v24  ;;  %v1463_v24 = vld [vmem:[#allocation2 + $0x29] ss:$4 sm:$0xff] }
 0x1c0   : > { %962 = vst.msk [vmem:[#allocation2 + $0xa8] sm:$0xff] %vm909_vm8, %v946_v23 }
 0x1c2   : > { %v1139_v26 = vpop.trf.xlu0 }
 0x1c3   : > { %v947_v25 = vpop.trf.xlu1  ;;  %1155 = vst.msk [vmem:[#allocation2 + $0x2b0] sm:$0xff] %vm909_vm8, %v1139_v26  ;;  %v1403_v4 = vld [vmem:[#allocation2 + $0x88] ss:$4 sm:$0xff]  ;;  %v1469_v8 = vld [vmem:[#allocation2 + $0x89] ss:$4 sm:$0xff] }
 0x1c4   : > { %963 = vst.msk [vmem:[#allocation2 + $0xb0] sm:$0xff] %vm909_vm8, %v947_v25 }
 0x1c6   : > { %v1140_v28 = vpop.trf.xlu0 }
 0x1c7   : > { %v948_v27 = vpop.trf.xlu1  ;;  %1156 = vst.msk [vmem:[#allocation2 + $0x2b8] sm:$0xff] %vm909_vm8, %v1140_v28 }
 0x1c8   : > { %964 = vst.msk [vmem:[#allocation2 + $0xb8] sm:$0xff] %vm909_vm8, %v948_v27 }
 0x1ca   : > { %v1141_v30 = vpop.trf.xlu0 }
 0x1cb   : > { %v949_v29 = vpop.trf.xlu1  ;;  %1157 = vst.msk [vmem:[#allocation2 + $0x2c0] sm:$0xff] %vm909_vm8, %v1141_v30  ;;  %v2025_v30 = vld [vmem:[%s6685_s3 + $0x18] sm:$0xff] }
 0x1cc   : > { %965 = vst.msk [vmem:[#allocation2 + $0xc0] sm:$0xff] %vm909_vm8, %v949_v29  ;;  %v2024_v29 = vld [vmem:[%s6685_s3 + $0x10] sm:$0xff] }
 0x1ce   : > { %v1142_v32 = vpop.trf.xlu0 }
 0x1cf   : > { %v950_v31 = vpop.trf.xlu1  ;;  %1158 = vst.msk [vmem:[#allocation2 + $0x2c8] sm:$0xff] %vm909_vm8, %v1142_v32 }
 0x1d0   : > { %966 = vst.msk [vmem:[#allocation2 + $0xc8] sm:$0xff] %vm909_vm8, %v950_v31  ;;  %v4819_v31 = vpack.c.bf16 %v2025_v30, %v2024_v29  ;;  %v1495_v30 = vld [vmem:[#allocation2 + $0x229] ss:$4 sm:$0xff] }
 0x1d2   : > { %v1143_v34 = vpop.trf.xlu0  ;;  %4820 = vmatprep.subr.bf16.mxu0 %v4819_v31 }
 0x1d3   : > { %v951_v33 = vpop.trf.xlu1  ;;  %1159 = vst.msk [vmem:[#allocation2 + $0x2d0] sm:$0xff] %vm909_vm8, %v1143_v34  ;;  %v1339_v7 = vld [vmem:[#allocation2 + $0xa7] ss:$4 sm:$0xff]  ;;  %v1405_v11 = vld [vmem:[#allocation2 + $0xa8] ss:$4 sm:$0xff]  ;;  %4822 = vmatpush3.bf16.msra.mxu0 %v4819_v31 }
 0x1d4   : > { %967 = vst.msk [vmem:[#allocation2 + $0xd0] sm:$0xff] %vm909_vm8, %v951_v33  ;;  %v1471_v15 = vld [vmem:[#allocation2 + $0xa9] ss:$4 sm:$0xff] }
 0x1d5   : > { %v1467_v34 = vld [vmem:[#allocation2 + $0x69] ss:$4 sm:$0xff] }
 0x1d6   : > { %v1144_v36 = vpop.trf.xlu0 }
 0x1d7   : > { %v952_v35 = vpop.trf.xlu1  ;;  %1160 = vst.msk [vmem:[#allocation2 + $0x2d8] sm:$0xff] %vm909_vm8, %v1144_v36 }
 0x1d8   : > { %968 = vst.msk [vmem:[#allocation2 + $0xd8] sm:$0xff] %vm909_vm8, %v952_v35  ;;  %v1333_v35 = vld [vmem:[#allocation2 + $0x47] ss:$4 sm:$0xff] }
 0x1da   : > { %v1145_v38 = vpop.trf.xlu0 }
 0x1db   : > { %v953_v37 = vpop.trf.xlu1  ;;  %1161 = vst.msk [vmem:[#allocation2 + $0x2e0] sm:$0xff] %vm909_vm8, %v1145_v38 }
 0x1dc   : > { %969 = vst.msk [vmem:[#allocation2 + $0xe0] sm:$0xff] %vm909_vm8, %v953_v37 }
 0x1de   : > { %v1146_v40 = vpop.trf.xlu0 }
 0x1df   : > { %v954_v39 = vpop.trf.xlu1  ;;  %1162 = vst.msk [vmem:[#allocation2 + $0x2e8] sm:$0xff] %vm909_vm8, %v1146_v40 }
 0x1e0   : > { %970 = vst.msk [vmem:[#allocation2 + $0xe8] sm:$0xff] %vm909_vm8, %v954_v39  ;;  %v1399_v39 = vld [vmem:[#allocation2 + $0x48] ss:$4 sm:$0xff] }
 0x1e2   : > { %v1147_v42 = vpop.trf.xlu0 }
 0x1e3   : > { %v955_v41 = vpop.trf.xlu1  ;;  %1163 = vst.msk [vmem:[#allocation2 + $0x2f0] sm:$0xff] %vm909_vm8, %v1147_v42 }
 0x1e4   : > { %971 = vst.msk [vmem:[#allocation2 + $0xf0] sm:$0xff] %vm909_vm8, %v955_v41 }
 0x1e6   : > { %v1148_v44 = vpop.trf.xlu0 }
 0x1e7   : > { %v956_v43 = vpop.trf.xlu1  ;;  %1164 = vst.msk [vmem:[#allocation2 + $0x2f8] sm:$0xff] %vm909_vm8, %v1148_v44 }
 0x1e8   : > { %972 = vst.msk [vmem:[#allocation2 + $0xf8] sm:$0xff] %vm909_vm8, %v956_v43  ;;  %v1465_v43 = vld [vmem:[#allocation2 + $0x49] ss:$4 sm:$0xff] }
 0x1ea   : > { %v1149_v46 = vpop.trf.xlu0 }
 0x1eb   : > { %v957_v45 = vpop.trf.xlu1  ;;  %1165 = vst.msk [vmem:[#allocation2 + $0x300] sm:$0xff] %vm909_vm8, %v1149_v46 }
 0x1ec   : > { %973 = vst.msk [vmem:[#allocation2 + $0x100] sm:$0xff] %vm909_vm8, %v957_v45 }
 0x1ee   : > { %v1038_v48 = vpop.trf.xlu0 }
 0x1ef   : > { %v990_v47 = vpop.trf.xlu1  ;;  %1054 = vst.msk [vmem:[#allocation2 + $0x188] sm:$0xff] %vm909_vm8, %v1038_v48 }
 0x1f0   : > { %1006 = vst.msk [vmem:[#allocation2 + $0x108] sm:$0xff] %vm909_vm8, %v990_v47  ;;  %v1341_v47 = vld [vmem:[#allocation2 + $0xc7] ss:$4 sm:$0xff] }
 0x1f2   : > { %v1039_v50 = vpop.trf.xlu0 }
 0x1f3   : > { %v991_v49 = vpop.trf.xlu1  ;;  %1055 = vst.msk [vmem:[#allocation2 + $0x190] sm:$0xff] %vm909_vm8, %v1039_v50  ;;  %v1343_v38 = vld [vmem:[#allocation2 + $0xe7] ss:$4 sm:$0xff]  ;;  %v1409_v41 = vld [vmem:[#allocation2 + $0xe8] ss:$4 sm:$0xff] }
 0x1f4   : > { %1007 = vst.msk [vmem:[#allocation2 + $0x110] sm:$0xff] %vm909_vm8, %v991_v49  ;;  %v1475_v45 = vld [vmem:[#allocation2 + $0xe9] ss:$4 sm:$0xff] }
 0x1f6   : > { %v1040_v52 = vpop.trf.xlu0 }
 0x1f7   : > { %v992_v51 = vpop.trf.xlu1  ;;  %1056 = vst.msk [vmem:[#allocation2 + $0x198] sm:$0xff] %vm909_vm8, %v1040_v52 }
 0x1f8   : > { %1008 = vst.msk [vmem:[#allocation2 + $0x118] sm:$0xff] %vm909_vm8, %v992_v51  ;;  %v1407_v51 = vld [vmem:[#allocation2 + $0xc8] ss:$4 sm:$0xff] }
 0x1fa   : > { %v1041_v54 = vpop.trf.xlu0 }
 0x1fb   : > { %v993_v53 = vpop.trf.xlu1  ;;  %1057 = vst.msk [vmem:[#allocation2 + $0x1a0] sm:$0xff] %vm909_vm8, %v1041_v54 }
 0x1fc   : > { %1009 = vst.msk [vmem:[#allocation2 + $0x120] sm:$0xff] %vm909_vm8, %v993_v53 }
 0x1fe   : > { %v1042_v56 = vpop.trf.xlu0 }
 0x1ff   : > { %v994_v55 = vpop.trf.xlu1  ;;  %1058 = vst.msk [vmem:[#allocation2 + $0x1a8] sm:$0xff] %vm909_vm8, %v1042_v56 }
 0x200   : > { %1010 = vst.msk [vmem:[#allocation2 + $0x128] sm:$0xff] %vm909_vm8, %v994_v55  ;;  %v1473_v55 = vld [vmem:[#allocation2 + $0xc9] ss:$4 sm:$0xff] }
 0x201   : > { %1559 = vrot.lane.b32.xlu1 %v1329_v57, %s5009_s22 }
 0x202   : > { %v1043_v59 = vpop.trf.xlu0  ;;  %v1419_v28 = vld [vmem:[#allocation2 + $0x188] ss:$4 sm:$0xff] }
 0x203   : > { %v995_v58 = vpop.trf.xlu1  ;;  %1059 = vst.msk [vmem:[#allocation2 + $0x1b0] sm:$0xff] %vm909_vm8, %v1043_v59  ;;  %v1411_v12 = vld [vmem:[#allocation2 + $0x108] ss:$4 sm:$0xff]  ;;  %v1477_v16 = vld [vmem:[#allocation2 + $0x109] ss:$4 sm:$0xff] }
 0x204   : > { %1011 = vst.msk [vmem:[#allocation2 + $0x130] sm:$0xff] %vm909_vm8, %v995_v58 }
 0x205   : > { %1691 = vrot.lane.b32.xlu1 %v1395_v60, %s5010_s23 }
 0x206   : > { %v1044_v62 = vpop.trf.xlu0 }
 0x207   : > { %v996_v61 = vpop.trf.xlu1  ;;  %1060 = vst.msk [vmem:[#allocation2 + $0x1b8] sm:$0xff] %vm909_vm8, %v1044_v62 }
 0x208   : > { %1012 = vst.msk [vmem:[#allocation2 + $0x138] sm:$0xff] %vm909_vm8, %v996_v61 }
 0x209   : > { %1823 = vrot.lane.b32.xlu1 %v1461_v63, %s5011_s24 }
 0x20a   : > { %v1045_v1 = vpop.trf.xlu0 }
 0x20b   : > { %v997_v0 = vpop.trf.xlu1  ;;  %1061 = vst.msk [vmem:[#allocation2 + $0x1c0] sm:$0xff] %vm909_vm8, %v1045_v1  ;;  %1561 = vrot.lane.b32.xlu0 %v1331_v3, %s5009_s22 }
 0x20c   : > { %1013 = vst.msk [vmem:[#allocation2 + $0x140] sm:$0xff] %vm909_vm8, %v997_v0 }
 0x20d   : > { %1699 = vrot.lane.b32.xlu1 %v1403_v4, %s5010_s23 }
 0x20e   : > { %v1046_v6 = vpop.trf.xlu0 }
 0x20f   : > { %v998_v5 = vpop.trf.xlu1  ;;  %1062 = vst.msk [vmem:[#allocation2 + $0x1c8] sm:$0xff] %vm909_vm8, %v1046_v6  ;;  %1569 = vrot.lane.b32.xlu0 %v1339_v7, %s5009_s22 }
 0x210   : > { %1014 = vst.msk [vmem:[#allocation2 + $0x148] sm:$0xff] %vm909_vm8, %v998_v5 }
 0x211   : > { %1831 = vrot.lane.b32.xlu1 %v1469_v8, %s5011_s24  ;;  %v1335_v8 = vld [vmem:[#allocation2 + $0x67] ss:$4 sm:$0xff] }
 0x212   : > { %v1047_v10 = vpop.trf.xlu0  ;;  %v1355_v61 = vld [vmem:[#allocation2 + $0x1a7] ss:$4 sm:$0xff]  ;;  %v1421_v1 = vld [vmem:[#allocation2 + $0x1a8] ss:$4 sm:$0xff]  ;;  %v1487_v6 = vld [vmem:[#allocation2 + $0x1a9] ss:$4 sm:$0xff] }
 0x213   : > { %v999_v9 = vpop.trf.xlu1  ;;  %1063 = vst.msk [vmem:[#allocation2 + $0x1d0] sm:$0xff] %vm909_vm8, %v1047_v10  ;;  %1701 = vrot.lane.b32.xlu0 %v1405_v11, %s5010_s23  ;;  %v1347_v19 = vld [vmem:[#allocation2 + $0x127] ss:$4 sm:$0xff]  ;;  %v1413_v23 = vld [vmem:[#allocation2 + $0x128] ss:$4 sm:$0xff] }
 0x214   : > { %1015 = vst.msk [vmem:[#allocation2 + $0x150] sm:$0xff] %vm909_vm8, %v999_v9  ;;  %v1479_v27 = vld [vmem:[#allocation2 + $0x129] ss:$4 sm:$0xff] }
 0x215   : > { %1707 = vrot.lane.b32.xlu1 %v1411_v12, %s5010_s23  ;;  %v1337_v12 = vld [vmem:[#allocation2 + $0x87] ss:$4 sm:$0xff] }
 0x216   : > { %v1048_v14 = vpop.trf.xlu0 }
 0x217   : > { %v1000_v13 = vpop.trf.xlu1  ;;  %1064 = vst.msk [vmem:[#allocation2 + $0x1d8] sm:$0xff] %vm909_vm8, %v1048_v14  ;;  %1833 = vrot.lane.b32.xlu0 %v1471_v15, %s5011_s24 }
 0x218   : > { %1016 = vst.msk [vmem:[#allocation2 + $0x158] sm:$0xff] %vm909_vm8, %v1000_v13 }
 0x219   : > { %1839 = vrot.lane.b32.xlu1 %v1477_v16, %s5011_s24  ;;  %v1401_v16 = vld [vmem:[#allocation2 + $0x68] ss:$4 sm:$0xff] }
 0x21a   : > { %v1049_v18 = vpop.trf.xlu0 }
 0x21b   : > { %v1001_v17 = vpop.trf.xlu1  ;;  %1065 = vst.msk [vmem:[#allocation2 + $0x1e0] sm:$0xff] %vm909_vm8, %v1049_v18  ;;  %1577 = vrot.lane.b32.xlu0 %v1347_v19, %s5009_s22 }
 0x21c   : > { %1017 = vst.msk [vmem:[#allocation2 + $0x160] sm:$0xff] %vm909_vm8, %v1001_v17 }
 0x21d   : > { %1693 = vrot.lane.b32.xlu1 %v1397_v20, %s5010_s23  ;;  %v1345_v20 = vld [vmem:[#allocation2 + $0x107] ss:$4 sm:$0xff] }
 0x21e   : > { %v1050_v22 = vpop.trf.xlu0 }
 0x21f   : > { %v1002_v21 = vpop.trf.xlu1  ;;  %1066 = vst.msk [vmem:[#allocation2 + $0x1e8] sm:$0xff] %vm909_vm8, %v1050_v22  ;;  %1709 = vrot.lane.b32.xlu0 %v1413_v23, %s5010_s23  ;;  %v1363_v22 = vld [vmem:[#allocation2 + $0x227] ss:$4 sm:$0xff] }
 0x220   : > { %1018 = vst.msk [vmem:[#allocation2 + $0x168] sm:$0xff] %vm909_vm8, %v1002_v21 }
 0x221   : > { %1825 = vrot.lane.b32.xlu1 %v1463_v24, %s5011_s24 }
 0x222   : > { %v1051_v26 = vpop.trf.xlu0 }
 0x223   : > { %v1003_v25 = vpop.trf.xlu1  ;;  %1067 = vst.msk [vmem:[#allocation2 + $0x1f0] sm:$0xff] %vm909_vm8, %v1051_v26  ;;  %1841 = vrot.lane.b32.xlu0 %v1479_v27, %s5011_s24  ;;  %v1349_v59 = vld [vmem:[#allocation2 + $0x147] ss:$4 sm:$0xff]  ;;  %v1415_v63 = vld [vmem:[#allocation2 + $0x148] ss:$4 sm:$0xff] }
 0x224   : > { %1019 = vst.msk [vmem:[#allocation2 + $0x170] sm:$0xff] %vm909_vm8, %v1003_v25  ;;  %v1481_v4 = vld [vmem:[#allocation2 + $0x149] ss:$4 sm:$0xff]  ;;  %v1429_v26 = vld [vmem:[#allocation2 + $0x228] ss:$4 sm:$0xff] }
 0x225   : > { %1715 = vrot.lane.b32.xlu1 %v1419_v28, %s5010_s23  ;;  %v1485_v28 = vld [vmem:[#allocation2 + $0x189] ss:$4 sm:$0xff] }
 0x226   : > { %v1052_v33 = vpop.trf.xlu0 }
 0x227   : > { %v1004_v32 = vpop.trf.xlu1  ;;  %1068 = vst.msk [vmem:[#allocation2 + $0x1f8] sm:$0xff] %vm909_vm8, %v1052_v33  ;;  %1829 = vrot.lane.b32.xlu0 %v1467_v34, %s5011_s24  ;;  %v1367_v34 = vld [vmem:[#allocation2 + $0x267] ss:$4 sm:$0xff] }
 0x228   : > { %1020 = vst.msk [vmem:[#allocation2 + $0x178] sm:$0xff] %vm909_vm8, %v1004_v32  ;;  %v1357_v32 = vld [vmem:[#allocation2 + $0x1c7] ss:$4 sm:$0xff] }
 0x229   : > { %1563 = vrot.lane.b32.xlu1 %v1333_v35, %s5009_s22 }
 0x22a   : > { %v1053_v37 = vpop.trf.xlu0 }
 0x22b   : > { %v1005_v36 = vpop.trf.xlu1  ;;  %1069 = vst.msk [vmem:[#allocation2 + $0x200] sm:$0xff] %vm909_vm8, %v1053_v37  ;;  %1573 = vrot.lane.b32.xlu0 %v1343_v38, %s5009_s22  ;;  %v1433_v38 = vld [vmem:[#allocation2 + $0x268] ss:$4 sm:$0xff] }
 0x22c   : > { %1021 = vst.msk [vmem:[#allocation2 + $0x180] sm:$0xff] %vm909_vm8, %v1005_v36  ;;  %v1423_v36 = vld [vmem:[#allocation2 + $0x1c8] ss:$4 sm:$0xff] }
 0x22d   : > { %1695 = vrot.lane.b32.xlu1 %v1399_v39, %s5010_s23 }
 0x22e   : > { %v1230_v42 = vpop.trf.xlu0 }
 0x22f   : > { %v1182_v40 = vpop.trf.xlu1  ;;  %1705 = vrot.lane.b32.xlu0 %v1409_v41, %s5010_s23  ;;  %1246 = vst.msk [vmem:[#allocation2 + $0x388] sm:$0xff] %vm909_vm8, %v1230_v42  ;;  %v1499_v41 = vld [vmem:[#allocation2 + $0x269] ss:$4 sm:$0xff] }
 0x230   : > { %1198 = vst.msk [vmem:[#allocation2 + $0x308] sm:$0xff] %vm909_vm8, %v1182_v40  ;;  %v1489_v40 = vld [vmem:[#allocation2 + $0x1c9] ss:$4 sm:$0xff] }
 0x231   : > { %1827 = vrot.lane.b32.xlu1 %v1465_v43, %s5011_s24 }
 0x232   : > { %v1231_v46 = vpop.trf.xlu0  ;;  %v1359_v9 = vld [vmem:[#allocation2 + $0x1e7] ss:$4 sm:$0xff]  ;;  %v1425_v13 = vld [vmem:[#allocation2 + $0x1e8] ss:$4 sm:$0xff]  ;;  %v1491_v17 = vld [vmem:[#allocation2 + $0x1e9] ss:$4 sm:$0xff] }
 0x233   : > { %v1183_v44 = vpop.trf.xlu1  ;;  %1837 = vrot.lane.b32.xlu0 %v1475_v45, %s5011_s24  ;;  %1247 = vst.msk [vmem:[#allocation2 + $0x390] sm:$0xff] %vm909_vm8, %v1231_v46  ;;  %v1351_v49 = vld [vmem:[#allocation2 + $0x167] ss:$4 sm:$0xff]  ;;  %v1417_v53 = vld [vmem:[#allocation2 + $0x168] ss:$4 sm:$0xff] }
 0x234   : > { %1199 = vst.msk [vmem:[#allocation2 + $0x310] sm:$0xff] %vm909_vm8, %v1183_v44  ;;  %v1483_v57 = vld [vmem:[#allocation2 + $0x169] ss:$4 sm:$0xff]  ;;  %v1353_v24 = vld [vmem:[#allocation2 + $0x187] ss:$4 sm:$0xff] }
 0x235   : > { %1571 = vrot.lane.b32.xlu1 %v1341_v47, %s5009_s22  ;;  %v1361_v42 = vld [vmem:[#allocation2 + $0x207] ss:$4 sm:$0xff]  ;;  %v1427_v45 = vld [vmem:[#allocation2 + $0x208] ss:$4 sm:$0xff] }
 0x236   : > { %v1232_v50 = vpop.trf.xlu0  ;;  %v1371_v44 = vld [vmem:[#allocation2 + $0x2a7] ss:$4 sm:$0xff]  ;;  %v1437_v47 = vld [vmem:[#allocation2 + $0x2a8] ss:$4 sm:$0xff] }
 0x237   : > { %v1184_v48 = vpop.trf.xlu1  ;;  %1581 = vrot.lane.b32.xlu0 %v1351_v49, %s5009_s22  ;;  %1248 = vst.msk [vmem:[#allocation2 + $0x398] sm:$0xff] %vm909_vm8, %v1232_v50  ;;  %v1503_v50 = vld [vmem:[#allocation2 + $0x2a9] ss:$4 sm:$0xff] }
 0x238   : > { %1200 = vst.msk [vmem:[#allocation2 + $0x318] sm:$0xff] %vm909_vm8, %v1184_v48  ;;  %v1493_v48 = vld [vmem:[#allocation2 + $0x209] ss:$4 sm:$0xff] }
 0x239   : > { %1703 = vrot.lane.b32.xlu1 %v1407_v51, %s5010_s23  ;;  %v1365_v51 = vld [vmem:[#allocation2 + $0x247] ss:$4 sm:$0xff] }
 0x23a   : > { %v1233_v54 = vpop.trf.xlu0 }
 0x23b   : > { %v1185_v52 = vpop.trf.xlu1  ;;  %1713 = vrot.lane.b32.xlu0 %v1417_v53, %s5010_s23  ;;  %1249 = vst.msk [vmem:[#allocation2 + $0x3a0] sm:$0xff] %vm909_vm8, %v1233_v54  ;;  %v1375_v54 = vld [vmem:[#allocation2 + $0x2e7] ss:$4 sm:$0xff] }
 0x23c   : > { %1201 = vst.msk [vmem:[#allocation2 + $0x320] sm:$0xff] %vm909_vm8, %v1185_v52 }
 0x23d   : > { %1835 = vrot.lane.b32.xlu1 %v1473_v55, %s5011_s24  ;;  %v1431_v55 = vld [vmem:[#allocation2 + $0x248] ss:$4 sm:$0xff] }
 0x23e   : > { %v1234_v58 = vpop.trf.xlu0 }
 0x23f   : > { %v1186_v56 = vpop.trf.xlu1  ;;  %1845 = vrot.lane.b32.xlu0 %v1483_v57, %s5011_s24  ;;  %1250 = vst.msk [vmem:[#allocation2 + $0x3a8] sm:$0xff] %vm909_vm8, %v1234_v58  ;;  %v1441_v58 = vld [vmem:[#allocation2 + $0x2e8] ss:$4 sm:$0xff] }
 0x240   : > { %1202 = vst.msk [vmem:[#allocation2 + $0x328] sm:$0xff] %vm909_vm8, %v1186_v56 }
 0x241   : > { %1579 = vrot.lane.b32.xlu1 %v1349_v59, %s5009_s22  ;;  %v1497_v59 = vld [vmem:[#allocation2 + $0x249] ss:$4 sm:$0xff] }
 0x242   : > { %v1235_v62 = vpop.trf.xlu0 }
 0x243   : > { %v1187_v60 = vpop.trf.xlu1  ;;  %1585 = vrot.lane.b32.xlu0 %v1355_v61, %s5009_s22  ;;  %1251 = vst.msk [vmem:[#allocation2 + $0x3b0] sm:$0xff] %vm909_vm8, %v1235_v62  ;;  %v1507_v62 = vld [vmem:[#allocation2 + $0x2e9] ss:$4 sm:$0xff] }
 0x244   : > { %1203 = vst.msk [vmem:[#allocation2 + $0x330] sm:$0xff] %vm909_vm8, %v1187_v60 }
 0x245   : > { %1711 = vrot.lane.b32.xlu1 %v1415_v63, %s5010_s23  ;;  %v1369_v63 = vld [vmem:[#allocation2 + $0x287] ss:$4 sm:$0xff] }
 0x246   : > { %v1236_v3 = vpop.trf.xlu0 }
 0x247   : > { %v1188_v0 = vpop.trf.xlu1  ;;  %1717 = vrot.lane.b32.xlu0 %v1421_v1, %s5010_s23  ;;  %1252 = vst.msk [vmem:[#allocation2 + $0x3b8] sm:$0xff] %vm909_vm8, %v1236_v3 }
 0x248   : > { %1204 = vst.msk [vmem:[#allocation2 + $0x338] sm:$0xff] %vm909_vm8, %v1188_v0 }
 0x249   : > { %1843 = vrot.lane.b32.xlu1 %v1481_v4, %s5011_s24  ;;  %v1435_v4 = vld [vmem:[#allocation2 + $0x288] ss:$4 sm:$0xff] }
 0x24a   : > { %v1237_v7 = vpop.trf.xlu0 }
 0x24b   : > { %v1189_v5 = vpop.trf.xlu1  ;;  %1849 = vrot.lane.b32.xlu0 %v1487_v6, %s5011_s24  ;;  %1253 = vst.msk [vmem:[#allocation2 + $0x3c0] sm:$0xff] %vm909_vm8, %v1237_v7  ;;  %v1263_v6 = vld [vmem:[#allocation2 + $0x6] ss:$4 sm:$0xff] }
 0x24c   : > { %1205 = vst.msk [vmem:[#allocation2 + $0x340] sm:$0xff] %vm909_vm8, %v1189_v5 }
 0x24d   : > { %1565 = vrot.lane.b32.xlu1 %v1335_v8, %s5009_s22 }
 0x24e   : > { %v1238_v11 = vpop.trf.xlu0 }
 0x24f   : > { %v1190_v10 = vpop.trf.xlu1  ;;  %1589 = vrot.lane.b32.xlu0 %v1359_v9, %s5009_s22  ;;  %1254 = vst.msk [vmem:[#allocation2 + $0x3c8] sm:$0xff] %vm909_vm8, %v1238_v11 }
 0x250   : > { %1206 = vst.msk [vmem:[#allocation2 + $0x348] sm:$0xff] %vm909_vm8, %v1190_v10  ;;  %v1501_v10 = vld [vmem:[#allocation2 + $0x289] ss:$4 sm:$0xff] }
 0x251   : > { %1567 = vrot.lane.b32.xlu1 %v1337_v12, %s5009_s22  ;;  %v1265_v12 = vld [vmem:[#allocation2 + $0x26] ss:$4 sm:$0xff] }
 0x252   : > { %v1239_v15 = vpop.trf.xlu0 }
 0x253   : > { %v1191_v14 = vpop.trf.xlu1  ;;  %1721 = vrot.lane.b32.xlu0 %v1425_v13, %s5010_s23  ;;  %1255 = vst.msk [vmem:[#allocation2 + $0x3d0] sm:$0xff] %vm909_vm8, %v1239_v15  ;;  %v1379_v3 = vld [vmem:[#allocation2 + $0x327] ss:$4 sm:$0xff]  ;;  %v1445_v8 = vld [vmem:[#allocation2 + $0x328] ss:$4 sm:$0xff] }
 0x254   : > { %1207 = vst.msk [vmem:[#allocation2 + $0x350] sm:$0xff] %vm909_vm8, %v1191_v14 }
 0x255   : > { %1697 = vrot.lane.b32.xlu1 %v1401_v16, %s5010_s23 }
 0x256   : > { %v1240_v19 = vpop.trf.xlu0 }
 0x257   : > { %v1192_v18 = vpop.trf.xlu1  ;;  %1853 = vrot.lane.b32.xlu0 %v1491_v17, %s5011_s24  ;;  %1256 = vst.msk [vmem:[#allocation2 + $0x3d8] sm:$0xff] %vm909_vm8, %v1240_v19 }
 0x258   : > { %1208 = vst.msk [vmem:[#allocation2 + $0x358] sm:$0xff] %vm909_vm8, %v1192_v18  ;;  %v1511_v18 = vld [vmem:[#allocation2 + $0x329] ss:$4 sm:$0xff] }
 0x259   : > { %1575 = vrot.lane.b32.xlu1 %v1345_v20, %s5009_s22  ;;  %v1373_v20 = vld [vmem:[#allocation2 + $0x2c7] ss:$4 sm:$0xff] }
 0x25a   : > { %v1241_v23 = vpop.trf.xlu0 }
 0x25b   : > { %v1193_v21 = vpop.trf.xlu1  ;;  %1593 = vrot.lane.b32.xlu0 %v1363_v22, %s5009_s22  ;;  %1257 = vst.msk [vmem:[#allocation2 + $0x3e0] sm:$0xff] %vm909_vm8, %v1241_v23  ;;  %v2023_v22 = vld [vmem:[%s6685_s3 + $0x8] sm:$0xff] }
 0x25c   : > { %1209 = vst.msk [vmem:[#allocation2 + $0x360] sm:$0xff] %vm909_vm8, %v1193_v21  ;;  %v2022_v21 = vld [vmem:[%s6685_s3] sm:$0xff] }
 0x25d   : > { %1583 = vrot.lane.b32.xlu1 %v1353_v24, %s5009_s22 }
 0x25e   : > { %v1242_v27 = vpop.trf.xlu0 }
 0x25f   : > { %v1194_v25 = vpop.trf.xlu1  ;;  %1725 = vrot.lane.b32.xlu0 %v1429_v26, %s5010_s23  ;;  %1258 = vst.msk [vmem:[#allocation2 + $0x3e8] sm:$0xff] %vm909_vm8, %v1242_v27 }
 0x260   : > { %1210 = vst.msk [vmem:[#allocation2 + $0x368] sm:$0xff] %vm909_vm8, %v1194_v25  ;;  %v4823_v25 = vpack.c.bf16 %v2023_v22, %v2022_v21  ;;  %v1517_v22 = vld [vmem:[#allocation2 + $0x389] ss:$4 sm:$0xff] }
 0x261   : > { %1847 = vrot.lane.b32.xlu1 %v1485_v28, %s5011_s24 }
 0x262   : > { %v1243_v31 = vpop.trf.xlu0  ;;  %4824 = vmatprep.subr.bf16.mxu0 %v4823_v25 }
 0x263   : > { %v1195_v29 = vpop.trf.xlu1  ;;  %1857 = vrot.lane.b32.xlu0 %v1495_v30, %s5011_s24  ;;  %1259 = vst.msk [vmem:[#allocation2 + $0x3f0] sm:$0xff] %vm909_vm8, %v1243_v31  ;;  %v1439_v30 = vld [vmem:[#allocation2 + $0x2c8] ss:$4 sm:$0xff] }
 0x264   : > { %1211 = vst.msk [vmem:[#allocation2 + $0x370] sm:$0xff] %vm909_vm8, %v1195_v29 }
 0x265   : > { %1587 = vrot.lane.b32.xlu1 %v1357_v32, %s5009_s22 }
 0x266   : > { %v1244_v35 = vpop.trf.xlu0 }
 0x267   : > { %v1196_v33 = vpop.trf.xlu1  ;;  %1597 = vrot.lane.b32.xlu0 %v1367_v34, %s5009_s22  ;;  %1260 = vst.msk [vmem:[#allocation2 + $0x3f8] sm:$0xff] %vm909_vm8, %v1244_v35  ;;  %v1505_v34 = vld [vmem:[#allocation2 + $0x2c9] ss:$4 sm:$0xff] }
 0x268   : > { %1212 = vst.msk [vmem:[#allocation2 + $0x378] sm:$0xff] %vm909_vm8, %v1196_v33 }
 0x269   : > { %1719 = vrot.lane.b32.xlu1 %v1423_v36, %s5010_s23 }
 0x26a   : > { %v1245_v39 = vpop.trf.xlu0 }
 0x26b   : > { %v1197_v37 = vpop.trf.xlu1  ;;  %1729 = vrot.lane.b32.xlu0 %v1433_v38, %s5010_s23  ;;  %1261 = vst.msk [vmem:[#allocation2 + $0x400] sm:$0xff] %vm909_vm8, %v1245_v39  ;;  %v1377_v38 = vld [vmem:[#allocation2 + $0x307] ss:$4 sm:$0xff]  ;;  %v1267_v39 = vld [vmem:[#allocation2 + $0x46] ss:$4 sm:$0xff] }
 0x26c   : > { %1213 = vst.msk [vmem:[#allocation2 + $0x380] sm:$0xff] %vm909_vm8, %v1197_v37 }
 0x26d   : > { %1851 = vrot.lane.b32.xlu1 %v1489_v40, %s5011_s24 }
 0x26f   : > { %1861 = vrot.lane.b32.xlu0 %v1499_v41, %s5011_s24 }
 0x271   : > { %1591 = vrot.lane.b32.xlu1 %v1361_v42, %s5009_s22 }
 0x273   : > { %v1560_v43 = vpop.permute.xlu1 %1559  ;;  %1601 = vrot.lane.b32.xlu0 %v1371_v44, %s5009_s22  ;;  %v1383_v28 = vld [vmem:[#allocation2 + $0x367] ss:$4 sm:$0xff]  ;;  %v1449_v33 = vld [vmem:[#allocation2 + $0x368] ss:$4 sm:$0xff]  ;;  %v1515_v37 = vld [vmem:[#allocation2 + $0x369] ss:$4 sm:$0xff] }
 0x274   : > { %v1922_v9 = vsel %vm909_vm8, %v1263_v6, %v1560_v43  ;;  %v1387_v44 = vld [vmem:[#allocation2 + $0x3a7] ss:$4 sm:$0xff] }
 0x275   : > { %1723 = vrot.lane.b32.xlu1 %v1427_v45, %s5010_s23 }
 0x277   : > { %v1692_v46 = vpop.permute.xlu1 %1691  ;;  %1733 = vrot.lane.b32.xlu0 %v1437_v47, %s5010_s23 }
 0x278   : > { %v1955_v11 = vsel %vm562_vm0, %v1922_v9, %v1692_v46  ;;  %v1443_v46 = vld [vmem:[#allocation2 + $0x308] ss:$4 sm:$0xff]  ;;  %v1513_v9 = vld [vmem:[#allocation2 + $0x349] ss:$4 sm:$0xff] }
 0x279   : > { %1855 = vrot.lane.b32.xlu1 %v1493_v48, %s5011_s24 }
 0x27b   : > { %v1824_v49 = vpop.permute.xlu1 %1823  ;;  %1865 = vrot.lane.b32.xlu0 %v1503_v50, %s5011_s24  ;;  %v1453_v50 = vld [vmem:[#allocation2 + $0x3a8] ss:$4 sm:$0xff] }
 0x27c   : > { %v5383_v13 = vsel %vm1988_vm11, %v1955_v11, %v1824_v49 }
 0x27d   : > { %1595 = vrot.lane.b32.xlu1 %v1365_v51, %s5009_s22  ;;  %v1562_v52 = vpop.permute.xlu0 %1561  ;;  %v2060_v23 = vrot.slane %v5383_v13, 1 }
 0x27e   : > { %v1923_v14 = vsel %vm909_vm8, %v1265_v12, %v1562_v52  ;;  %v1509_v52 = vld [vmem:[#allocation2 + $0x309] ss:$4 sm:$0xff] }
 0x27f   : > { %v5354_v53 = vpop.permute.xlu1 %1699  ;;  %1605 = vrot.lane.b32.xlu0 %v1375_v54, %s5009_s22  ;;  %v1523_v12 = vld [vmem:[#allocation2 + $0x3e9] ss:$4 sm:$0xff] }
 0x281   : > { %1727 = vrot.lane.b32.xlu1 %v1431_v55, %s5010_s23  ;;  %v5358_v56 = vpop.permute.xlu0 %1569 }
 0x283   : > { %v5360_v57 = vpop.permute.xlu1 %1831  ;;  %1737 = vrot.lane.b32.xlu0 %v1441_v58, %s5010_s23  ;;  %v1519_v58 = vld [vmem:[#allocation2 + $0x3a9] ss:$4 sm:$0xff] }
 0x285   : > { %1859 = vrot.lane.b32.xlu1 %v1497_v59, %s5011_s24  ;;  %v5364_v60 = vpop.permute.xlu0 %1701  ;;  %v1381_v59 = vld [vmem:[#allocation2 + $0x347] ss:$4 sm:$0xff] }
 0x287   : > { %v5366_v61 = vpop.permute.xlu1 %1707  ;;  %1869 = vrot.lane.b32.xlu0 %v1507_v62, %s5011_s24 }
 0x289   : > { %1599 = vrot.lane.b32.xlu1 %v1369_v63, %s5009_s22  ;;  %v5370_v0 = vpop.permute.xlu0 %1833 }
 0x28b   : > { %v5372_v1 = vpop.permute.xlu1 %1839  ;;  %1609 = vrot.lane.b32.xlu0 %v1379_v3, %s5009_s22  ;;  %v1391_v3 = vld [vmem:[#allocation2 + $0x3e7] ss:$4 sm:$0xff] }
 0x28d   : > { %1731 = vrot.lane.b32.xlu1 %v1435_v4, %s5010_s23  ;;  %v5376_v5 = vpop.permute.xlu0 %1577  ;;  %v1447_v4 = vld [vmem:[#allocation2 + $0x348] ss:$4 sm:$0xff] }
 0x28f   : > { %v1694_v7 = vpop.permute.xlu1 %1693  ;;  %1741 = vrot.lane.b32.xlu0 %v1445_v8, %s5010_s23  ;;  %v1457_v8 = vld [vmem:[#allocation2 + $0x3e8] ss:$4 sm:$0xff] }
 0x290   : > { %v1956_v16 = vsel %vm562_vm0, %v1923_v14, %v1694_v7  ;;  %v1385_v14 = vld [vmem:[#allocation2 + $0x387] ss:$4 sm:$0xff] }
 0x291   : > { %1863 = vrot.lane.b32.xlu1 %v1501_v10, %s5011_s24  ;;  %v5386_v15 = vpop.permute.xlu0 %1709 }
 0x293   : > { %v1826_v17 = vpop.permute.xlu1 %1825  ;;  %1873 = vrot.lane.b32.xlu0 %v1511_v18, %s5011_s24  ;;  %v1451_v18 = vld [vmem:[#allocation2 + $0x388] ss:$4 sm:$0xff] }
 0x294   : > { %v5390_v19 = vsel %vm1988_vm11, %v1956_v16, %v1826_v17 }
 0x295   : > { %v2061_v24 = vrot.slane %v5390_v19, 1  ;;  %1603 = vrot.lane.b32.xlu1 %v1373_v20, %s5009_s22  ;;  %v5402_v26 = vpop.permute.xlu0 %1841 }
 0x297   : > { %v5404_v27 = vpop.permute.xlu1 %1715  ;;  %v2062_v29 = vsel %vm6700_vm12, %v2060_v23, %v2061_v24  ;;  %1613 = vrot.lane.b32.xlu0 %v1383_v28, %s5009_s22 }
 0x298   : > { %4571 = vmatprep.mubr.msk.f32.mxu0 %vm6701_vm13, %v2062_v29  ;;  %v1389_v29 = vld [vmem:[#allocation2 + $0x3c7] ss:$4 sm:$0xff] }
 0x299   : > { %1735 = vrot.lane.b32.xlu1 %v1439_v30, %s5010_s23  ;;  %v5410_v31 = vpop.permute.xlu0 %1829  ;;  %v1273_v30 = vld [vmem:[#allocation2 + $0xa6] ss:$4 sm:$0xff] }
 0x29b   : > { %v1564_v32 = vpop.permute.xlu1 %1563  ;;  %1745 = vrot.lane.b32.xlu0 %v1449_v33, %s5010_s23  ;;  %v1927_v33 = vsel %vm909_vm8, %v1273_v30, %v5358_v56  ;;  %v1287_v30 = vld [vmem:[#allocation2 + $0x186] ss:$4 sm:$0xff] }
 0x29c   : > { %v1924_v40 = vsel %vm909_vm8, %v1267_v39, %v1564_v32 }
 0x29d   : > { %1867 = vrot.lane.b32.xlu1 %v1505_v34, %s5011_s24  ;;  %v5414_v35 = vpop.permute.xlu0 %1573  ;;  %v1269_v34 = vld [vmem:[#allocation2 + $0x66] ss:$4 sm:$0xff] }
 0x29f   : > { %v1696_v36 = vpop.permute.xlu1 %1695  ;;  %1877 = vrot.lane.b32.xlu0 %v1515_v37, %s5011_s24  ;;  %v1960_v37 = vsel %vm562_vm0, %v1927_v33, %v5364_v60 }
 0x2a0   : > { %v1957_v42 = vsel %vm562_vm0, %v1924_v40, %v1696_v36 }
 0x2a1   : > { %1607 = vrot.lane.b32.xlu1 %v1377_v38, %s5009_s22  ;;  %v5419_v41 = vpop.permute.xlu0 %1705  ;;  %v1275_v38 = vld [vmem:[#allocation2 + $0xc6] ss:$4 sm:$0xff] }
 0x2a3   : > { %v1828_v43 = vpop.permute.xlu1 %1827  ;;  %1617 = vrot.lane.b32.xlu0 %v1387_v44, %s5009_s22  ;;  %v1455_v44 = vld [vmem:[#allocation2 + $0x3c8] ss:$4 sm:$0xff] }
 0x2a4   : > { %v5423_v45 = vsel %vm1988_vm11, %v1957_v42, %v1828_v43 }
 0x2a5   : > { %v2063_v47 = vrot.slane %v5423_v45, 1  ;;  %1739 = vrot.lane.b32.xlu1 %v1443_v46, %s5010_s23  ;;  %v5428_v48 = vpop.permute.xlu0 %1837 }
 0x2a7   : > { %v1572_v49 = vpop.permute.xlu1 %1571  ;;  %v2064_v51 = vsel %vm6700_vm12, %v2061_v24, %v2063_v47  ;;  %1749 = vrot.lane.b32.xlu0 %v1453_v50, %s5010_s23  ;;  %v1271_v24 = vld [vmem:[#allocation2 + $0x86] ss:$4 sm:$0xff] }
 0x2a8   : > { %4572 = vmatmul.mubr.msk.f32.vlgmr.msra.gmra.mrb[2].mxu0 %vm6701_vm13, %v2064_v51  ;;  %v1928_v56 = vsel %vm909_vm8, %v1275_v38, %v1572_v49 }
 0x2a9   : > { %1871 = vrot.lane.b32.xlu1 %v1509_v52, %s5011_s24  ;;  %4826 = vmatpush3.bf16.msra.mxu0 %v4823_v25  ;;  %v5436_v54 = vpop.permute.xlu0 %1581 }
 0x2ab   : > { %v1704_v55 = vpop.permute.xlu1 %1703  ;;  %1881 = vrot.lane.b32.xlu0 %v1519_v58, %s5011_s24  ;;  %v1279_v58 = vld [vmem:[#allocation2 + $0x106] ss:$4 sm:$0xff] }
 0x2ac   : > { %v1961_v46 = vsel %vm562_vm0, %v1928_v56, %v1704_v55 }
 0x2ad   : > { %1611 = vrot.lane.b32.xlu1 %v1381_v59, %s5009_s22  ;;  %v5440_v62 = vpop.permute.xlu0 %1713 }
 0x2af   : > { %v1836_v63 = vpop.permute.xlu1 %1835  ;;  %1621 = vrot.lane.b32.xlu0 %v1391_v3, %s5009_s22 }
 0x2b0   : > { %v5494_v50 = vsel %vm1988_vm11, %v1961_v46, %v1836_v63  ;;  %v1521_v63 = vld [vmem:[#allocation2 + $0x3c9] ss:$4 sm:$0xff] }
 0x2b1   : > { %1743 = vrot.lane.b32.xlu1 %v1447_v4, %s5010_s23  ;;  %v5444_v6 = vpop.permute.xlu0 %1845 }
 0x2b3   : > { %v5446_v7 = vpop.permute.xlu1 %1579  ;;  %1753 = vrot.lane.b32.xlu0 %v1457_v8, %s5010_s23 }
 0x2b5   : > { %1875 = vrot.lane.b32.xlu1 %v1513_v9, %s5011_s24  ;;  %v5450_v10 = vpop.permute.xlu0 %1585 }
 0x2b7   : > { %v5452_v11 = vpop.permute.xlu1 %1711  ;;  %1885 = vrot.lane.b32.xlu0 %v1523_v12, %s5011_s24 }
 0x2b9   : > { %1615 = vrot.lane.b32.xlu1 %v1385_v14, %s5009_s22  ;;  %v5456_v16 = vpop.permute.xlu0 %1717 }
 0x2bb   : > { %v5458_v17 = vpop.permute.xlu1 %1843 }
 0x2bd   : > { %1747 = vrot.lane.b32.xlu1 %v1451_v18, %s5010_s23  ;;  %v5461_v20 = vpop.permute.xlu0 %1849 }
 0x2bf   : > { %v1566_v21 = vpop.permute.xlu1 %1565 }
 0x2c0   : > { %v1925_v39 = vsel %vm909_vm8, %v1269_v34, %v1566_v21  ;;  %v1283_v21 = vld [vmem:[#allocation2 + $0x146] ss:$4 sm:$0xff] }
 0x2c1   : > { %1879 = vrot.lane.b32.xlu1 %v1517_v22, %s5011_s24  ;;  %v5464_v23 = vpop.permute.xlu0 %1589 }
 0x2c3   : > { %v1568_v25 = vpop.permute.xlu1 %1567 }
 0x2c4   : > { %v1926_v28 = vsel %vm909_vm8, %v1271_v24, %v1568_v25  ;;  %v1393_v25 = vld [vmem:[#allocation2 + $0x407] ss:$4 sm:$0x1] }
 0x2c5   : > { %v1959_v32 = vsel %vm562_vm0, %v1926_v28, %v5354_v53  ;;  %1619 = vrot.lane.b32.xlu1 %v1389_v29, %s5009_s22  ;;  %v5472_v36 = vpop.permute.xlu0 %1721  ;;  %v5483_v53 = vsel %vm1988_vm11, %v1960_v37, %v5370_v0 }
 0x2c6   : > { %v5479_v40 = vsel %vm1988_vm11, %v1959_v32, %v5360_v57  ;;  %v1277_v57 = vld [vmem:[#allocation2 + $0xe6] ss:$4 sm:$0xff]  ;;  %v2069_v52 = vrot.slane %v5483_v53, 1 }
 0x2c7   : > { %v1698_v42 = vpop.permute.xlu1 %1697  ;;  %v2067_v0 = vrot.slane %v5479_v40, 1  ;;  %v1929_v55 = vsel %vm909_vm8, %v1277_v57, %v5414_v35  ;;  %v2071_v35 = vrot.slane %v5494_v50, 1  ;;  %v1285_v32 = vld [vmem:[#allocation2 + $0x166] ss:$4 sm:$0xff] }
 0x2c8   : > { %v1958_v43 = vsel %vm562_vm0, %v1925_v39, %v1698_v42  ;;  %v1962_v59 = vsel %vm562_vm0, %v1929_v55, %v5419_v41  ;;  %v1281_v41 = vld [vmem:[#allocation2 + $0x126] ss:$4 sm:$0xff]  ;;  %v1933_v37 = vsel %vm909_vm8, %v1285_v32, %v5436_v54 }
 0x2c9   : > { %v5490_v60 = vsel %vm1988_vm11, %v1958_v43, %v5410_v31  ;;  %1751 = vrot.lane.b32.xlu1 %v1455_v44, %s5010_s23  ;;  %v5498_v49 = vpop.permute.xlu0 %1853  ;;  %v5512_v9 = vsel %vm1988_vm11, %v1962_v59, %v5428_v48  ;;  %v2070_v48 = vsel %vm6700_vm12, %v2067_v0, %v2069_v52  ;;  %v1931_v18 = vsel %vm909_vm8, %v1281_v41, %v5376_v5  ;;  %v1289_v44 = vld [vmem:[#allocation2 + $0x1a6] ss:$4 sm:$0xff] }
 0x2ca   : > { %v2065_v51 = vrot.slane %v5490_v60, 1  ;;  %v1964_v22 = vsel %vm562_vm0, %v1931_v18, %v5386_v15  ;;  %v2073_v24 = vrot.slane %v5512_v9, 1  ;;  %v2072_v15 = vsel %vm6700_vm12, %v2069_v52, %v2071_v35 }
 0x2cb   : > { %v1576_v31 = vpop.permute.xlu1 %1575  ;;  %v5537_v28 = vsel %vm1988_vm11, %v1964_v22, %v5402_v26 }
 0x2cc   : > { %v1930_v3 = vsel %vm909_vm8, %v1279_v58, %v1576_v31  ;;  %v2066_v4 = vsel %vm6700_vm12, %v2063_v47, %v2065_v51  ;;  %v2068_v8 = vsel %vm6700_vm12, %v2065_v51, %v2067_v0  ;;  %v2074_v34 = vsel %vm6700_vm12, %v2071_v35, %v2073_v24 }
 0x2cd   : > { %v1963_v12 = vsel %vm562_vm0, %v1930_v3, %v5366_v61  ;;  %1883 = vrot.lane.b32.xlu1 %v1521_v63, %s5011_s24  ;;  %4574 = vmatprep.mubr.msk.f32.mxu0 %vm6701_vm13, %v2066_v4  ;;  %v5524_v47 = vpop.permute.xlu0 %1593  ;;  %v2077_v39 = vrot.slane %v5537_v28, 1  ;;  %v1935_v0 = vsel %vm909_vm8, %v1289_v44, %v5450_v10  ;;  %v1293_v3 = vld [vmem:[#allocation2 + $0x1e6] ss:$4 sm:$0xff] }
 0x2ce   : > { %v5521_v14 = vsel %vm1988_vm11, %v1963_v12, %v5372_v1  ;;  %4575 = vmatmul.mubr.msk.f32.gmra.mrb[4].mxu0 %vm6701_vm13, %v2068_v8  ;;  %v1932_v1 = vsel %vm909_vm8, %v1283_v21, %v5446_v7  ;;  %v1968_v52 = vsel %vm562_vm0, %v1935_v0, %v5456_v16  ;;  %v1291_v8 = vld [vmem:[#allocation2 + $0x1c6] ss:$4 sm:$0xff] }
 0x2cf   : > { %v1584_v61 = vpop.permute.xlu1 %1583  ;;  %4577 = vmatprep.mubr.msk.f32.mxu0 %vm6701_vm13, %v2070_v48  ;;  %v1965_v5 = vsel %vm562_vm0, %v1932_v1, %v5452_v11  ;;  %v2075_v29 = vrot.slane %v5521_v14, 1  ;;  %v1459_v11 = vld [vmem:[#allocation2 + $0x408] ss:$4 sm:$0x1]  ;;  %v5579_v55 = vsel %vm1988_vm11, %v1968_v52, %v5461_v20  ;;  %v1937_v20 = vsel %vm909_vm8, %v1293_v3, %v5464_v23 }
 0x2d0   : > { %v5546_v33 = vsel %vm1988_vm11, %v1965_v5, %v5458_v17  ;;  %v1934_v7 = vsel %vm909_vm8, %v1287_v30, %v1584_v61  ;;  %v1966_v17 = vsel %vm562_vm0, %v1933_v37, %v5440_v62  ;;  %v2085_v16 = vrot.slane %v5579_v55, 1 }
 0x2d1   : > { %1623 = vrot.lane.b32.xlu1 %v1393_v25, %s5009_s22  ;;  %v1726_v26 = vpop.permute.xlu0 %1725  ;;  %v5559_v42 = vsel %vm1988_vm11, %v1966_v17, %v5444_v6  ;;  %v2079_v56 = vrot.slane %v5546_v33, 1  ;;  %v1967_v43 = vsel %vm562_vm0, %v1934_v7, %v5404_v27  ;;  %v2076_v54 = vsel %vm6700_vm12, %v2073_v24, %v2075_v29  ;;  %v1525_v6 = vld [vmem:[#allocation2 + $0x409] ss:$4 sm:$0x1]  ;;  %v1295_v7 = vld [vmem:[#allocation2 + $0x206] ss:$4 sm:$0xff] }
 0x2d2   : > { %4578 = vmatmul.mubr.msk.f32.gmra.mrb[6].mxu0 %vm6701_vm13, %v2072_v15  ;;  %v2078_v57 = vsel %vm6700_vm12, %v2075_v29, %v2077_v39  ;;  %v2081_v27 = vrot.slane %v5559_v42, 1  ;;  %v1970_v4 = vsel %vm562_vm0, %v1937_v20, %v5472_v36  ;;  %v1297_v29 = vld [vmem:[#allocation2 + $0x226] ss:$4 sm:$0xff] }
 0x2d3   : > { %v1848_v38 = vpop.permute.xlu1 %1847  ;;  %4580 = vmatprep.mubr.msk.f32.mxu0 %vm6701_vm13, %v2074_v34  ;;  %v2080_v31 = vsel %vm6700_vm12, %v2077_v39, %v2079_v56  ;;  %v5595_v12 = vsel %vm1988_vm11, %v1970_v4, %v5498_v49  ;;  %v1939_v15 = vsel %vm909_vm8, %v1297_v29, %v5524_v47 }
 0x2d4   : > { %v5567_v46 = vsel %vm1988_vm11, %v1967_v43, %v1848_v38  ;;  %v2082_v59 = vsel %vm6700_vm12, %v2079_v56, %v2081_v27  ;;  %v2089_v61 = vrot.slane %v5595_v12, 1  ;;  %v1972_v32 = vsel %vm562_vm0, %v1939_v15, %v1726_v26 }
 0x2d5   : > { %1755 = vrot.lane.b32.xlu1 %v1459_v11, %s5010_s23  ;;  %v1858_v62 = vpop.permute.xlu0 %1857  ;;  %v2083_v58 = vrot.slane %v5567_v46, 1 }
 0x2d6   : > { %4581 = vmatmul.mubr.msk.f32.gmra.mrb[8].mxu0 %vm6701_vm13, %v2076_v54  ;;  %v5615_v34 = vsel %vm1988_vm11, %v1972_v32, %v1858_v62 }
 0x2d7   : > { %v1588_v51 = vpop.permute.xlu1 %1587  ;;  %4583 = vmatprep.mubr.msk.f32.mxu0 %vm6701_vm13, %v2078_v57  ;;  %v2084_v35 = vsel %vm6700_vm12, %v2081_v27, %v2083_v58  ;;  %v2086_v18 = vsel %vm6700_vm12, %v2083_v58, %v2085_v16  ;;  %v2093_v56 = vrot.slane %v5615_v34, 1  ;;  %v1301_v57 = vld [vmem:[#allocation2 + $0x266] ss:$4 sm:$0xff] }
 0x2d8   : > { %v1936_v41 = vsel %vm909_vm8, %v1291_v8, %v1588_v51  ;;  %v1299_v27 = vld [vmem:[#allocation2 + $0x246] ss:$4 sm:$0xff] }
 0x2d9   : > { %1887 = vrot.lane.b32.xlu1 %v1525_v6, %s5011_s24  ;;  %v1598_v10 = vpop.permute.xlu0 %1597 }
 0x2da   : > { %4584 = vmatmul.mubr.msk.f32.gmra.mrb[10].mxu0 %vm6701_vm13, %v2080_v31  ;;  %v1941_v0 = vsel %vm909_vm8, %v1301_v57, %v1598_v10 }
 0x2db   : > { %v1720_v63 = vpop.permute.xlu1 %1719  ;;  %4586 = vmatprep.mubr.msk.f32.mxu0 %vm6701_vm13, %v2082_v59 }
 0x2dc   : > { %v1969_v21 = vsel %vm562_vm0, %v1936_v41, %v1720_v63 }
 0x2dd   : > { %v1730_v48 = vpop.permute.xlu0 %1729 }
 0x2de   : > { %4587 = vmatmul.mubr.msk.f32.gmra.mrb[12].mxu0 %vm6701_vm13, %v2084_v35  ;;  %v1974_v51 = vsel %vm562_vm0, %v1941_v0, %v1730_v48  ;;  %v1305_v48 = vld [vmem:[#allocation2 + $0x2a6] ss:$4 sm:$0xff] }
 0x2df   : > { %v1852_v23 = vpop.permute.xlu1 %1851  ;;  %4589 = vmatprep.mubr.msk.f32.mxu0 %vm6701_vm13, %v2086_v18 }
 0x2e0   : > { %v5603_v36 = vsel %vm1988_vm11, %v1969_v21, %v1852_v23 }
 0x2e1   : > { %v2087_v49 = vrot.slane %v5603_v36, 1  ;;  %v1862_v22 = vpop.permute.xlu0 %1861 }
 0x2e2   : > { %v5631_v52 = vsel %vm1988_vm11, %v1974_v51, %v1862_v22 }
 0x2e3   : > { %v1592_v24 = vpop.permute.xlu1 %1591  ;;  %v2088_v1 = vsel %vm6700_vm12, %v2085_v16, %v2087_v49  ;;  %v2090_v25 = vsel %vm6700_vm12, %v2087_v49, %v2089_v61  ;;  %v2097_v16 = vrot.slane %v5631_v52, 1 }
 0x2e4   : > { %4590 = vmatmul.mubr.msk.f32.gmra.mrb[14].mxu0 %vm6701_vm13, %v2088_v1  ;;  %v1938_v11 = vsel %vm909_vm8, %v1295_v7, %v1592_v24 }
 0x2e5   : > { %4592 = vmatprep.mubr.msk.f32.mxu0 %vm6701_vm13, %v2090_v25  ;;  %v1602_v5 = vpop.permute.xlu0 %1601 }
 0x2e6   : > { %v1943_v21 = vsel %vm909_vm8, %v1305_v48, %v1602_v5 }
 0x2e7   : > { %v1724_v30 = vpop.permute.xlu1 %1723 }
 0x2e8   : > { %v1971_v38 = vsel %vm562_vm0, %v1938_v11, %v1724_v30 }
 0x2e9   : > { %v1734_v37 = vpop.permute.xlu0 %1733 }
 0x2ea   : > { %v1976_v23 = vsel %vm562_vm0, %v1943_v21, %v1734_v37  ;;  %v1309_v37 = vld [vmem:[#allocation2 + $0x2e6] ss:$4 sm:$0xff] }
 0x2eb   : > { %v1856_v39 = vpop.permute.xlu1 %1855 }
 0x2ec   : > { %v5620_v17 = vsel %vm1988_vm11, %v1971_v38, %v1856_v39 }
 0x2ed   : > { %v2091_v43 = vrot.slane %v5620_v17, 1  ;;  %v1866_v47 = vpop.permute.xlu0 %1865 }
 0x2ee   : > { %v5647_v49 = vsel %vm1988_vm11, %v1976_v23, %v1866_v47  ;;  %v1307_v47 = vld [vmem:[#allocation2 + $0x2c6] ss:$4 sm:$0xff] }
 0x2ef   : > { %v1596_v54 = vpop.permute.xlu1 %1595  ;;  %v2092_v26 = vsel %vm6700_vm12, %v2089_v61, %v2091_v43  ;;  %v2094_v44 = vsel %vm6700_vm12, %v2091_v43, %v2093_v56  ;;  %v1303_v61 = vld [vmem:[#allocation2 + $0x286] ss:$4 sm:$0xff]  ;;  %v2101_v30 = vrot.slane %v5647_v49, 1 }
 0x2f0   : > { %4593 = vmatmul.mubr.msk.f32.gmra.mrb[16].mxu0 %vm6701_vm13, %v2092_v26  ;;  %v1940_v58 = vsel %vm909_vm8, %v1299_v27, %v1596_v54 }
 0x2f1   : > { %4595 = vmatprep.mubr.msk.f32.mxu0 %vm6701_vm13, %v2094_v44  ;;  %v1606_v62 = vpop.permute.xlu0 %1605 }
 0x2f3   : > { %v1728_v6 = vpop.permute.xlu1 %1727 }
 0x2f4   : > { %v1973_v59 = vsel %vm562_vm0, %v1940_v58, %v1728_v6 }
 0x2f5   : > { %v1738_v31 = vpop.permute.xlu0 %1737 }
 0x2f7   : > { %v1860_v3 = vpop.permute.xlu1 %1859 }
 0x2f8   : > { %v5636_v63 = vsel %vm1988_vm11, %v1973_v59, %v1860_v3  ;;  %v1313_v59 = vld [vmem:[#allocation2 + $0x326] ss:$4 sm:$0xff] }
 0x2f9   : > { %v2095_v20 = vrot.slane %v5636_v63, 1  ;;  %v1870_v10 = vpop.permute.xlu0 %1869 }
 0x2fb   : > { %v1600_v4 = vpop.permute.xlu1 %1599  ;;  %v2096_v8 = vsel %vm6700_vm12, %v2093_v56, %v2095_v20  ;;  %v2098_v35 = vsel %vm6700_vm12, %v2095_v20, %v2097_v16  ;;  %v1945_v56 = vsel %vm909_vm8, %v1309_v37, %v1606_v62 }
 0x2fc   : > { %4596 = vmatmul.mubr.msk.f32.gmra.mrb[18].mxu0 %vm6701_vm13, %v2096_v8  ;;  %v1942_v22 = vsel %vm909_vm8, %v1303_v61, %v1600_v4  ;;  %v1978_v43 = vsel %vm562_vm0, %v1945_v56, %v1738_v31  ;;  %v1311_v4 = vld [vmem:[#allocation2 + $0x306] ss:$4 sm:$0xff] }
 0x2fd   : > { %4598 = vmatprep.mubr.msk.f32.mxu0 %vm6701_vm13, %v2098_v35  ;;  %v1610_v41 = vpop.permute.xlu0 %1609  ;;  %v5663_v54 = vsel %vm1988_vm11, %v1978_v43, %v1870_v10 }
 0x2fe   : > { %v2105_v0 = vrot.slane %v5663_v54, 1  ;;  %v1947_v20 = vsel %vm909_vm8, %v1313_v59, %v1610_v41  ;;  %v1319_v59 = vld [vmem:[#allocation2 + $0x386] ss:$4 sm:$0xff] }
 0x2ff   : > { %v1732_v18 = vpop.permute.xlu1 %1731 }
 0x300   : > { %v1975_v1 = vsel %vm562_vm0, %v1942_v22, %v1732_v18 }
 0x301   : > { %v1742_v24 = vpop.permute.xlu0 %1741 }
 0x302   : > { %v1980_v10 = vsel %vm562_vm0, %v1947_v20, %v1742_v24 }
 0x303   : > { %v1864_v25 = vpop.permute.xlu1 %1863 }
 0x304   : > { %v5652_v29 = vsel %vm1988_vm11, %v1975_v1, %v1864_v25  ;;  %v1317_v25 = vld [vmem:[#allocation2 + $0x366] ss:$4 sm:$0xff] }
 0x305   : > { %v2099_v15 = vrot.slane %v5652_v29, 1  ;;  %v1874_v5 = vpop.permute.xlu0 %1873 }
 0x306   : > { %v5679_v8 = vsel %vm1988_vm11, %v1980_v10, %v1874_v5 }
 0x307   : > { %v1604_v32 = vpop.permute.xlu1 %1603  ;;  %v2100_v7 = vsel %vm6700_vm12, %v2097_v16, %v2099_v15  ;;  %v2102_v11 = vsel %vm6700_vm12, %v2099_v15, %v2101_v30  ;;  %v2109_v23 = vrot.slane %v5679_v8, 1 }
 0x308   : > { %4599 = vmatmul.mubr.msk.f32.gmra.mrb[20].mxu0 %vm6701_vm13, %v2100_v7  ;;  %v1944_v26 = vsel %vm909_vm8, %v1307_v47, %v1604_v32  ;;  %v1315_v7 = vld [vmem:[#allocation2 + $0x346] ss:$4 sm:$0xff] }
 0x309   : > { %4601 = vmatprep.mubr.msk.f32.mxu0 %vm6701_vm13, %v2102_v11  ;;  %v1614_v38 = vpop.permute.xlu0 %1613 }
 0x30a   : > { %v1949_v5 = vsel %vm909_vm8, %v1317_v25, %v1614_v38 }
 0x30b   : > { %v1736_v39 = vpop.permute.xlu1 %1735 }
 0x30c   : > { %v1977_v44 = vsel %vm562_vm0, %v1944_v26, %v1736_v39 }
 0x30d   : > { %v1746_v51 = vpop.permute.xlu0 %1745 }
 0x30e   : > { %v1982_v32 = vsel %vm562_vm0, %v1949_v5, %v1746_v51  ;;  %v1321_v51 = vld [vmem:[#allocation2 + $0x3a6] ss:$4 sm:$0xff] }
 0x30f   : > { %v1868_v57 = vpop.permute.xlu1 %1867 }
 0x310   : > { %v5668_v6 = vsel %vm1988_vm11, %v1977_v44, %v1868_v57 }
 0x311   : > { %v2103_v27 = vrot.slane %v5668_v6, 1  ;;  %v1878_v3 = vpop.permute.xlu0 %1877 }
 0x312   : > { %v5695_v11 = vsel %vm1988_vm11, %v1982_v32, %v1878_v3 }
 0x313   : > { %v1608_v62 = vpop.permute.xlu1 %1607  ;;  %v2104_v58 = vsel %vm6700_vm12, %v2101_v30, %v2103_v27  ;;  %v2106_v31 = vsel %vm6700_vm12, %v2103_v27, %v2105_v0  ;;  %v2113_v47 = vrot.slane %v5695_v11, 1 }
 0x314   : > { %4602 = vmatmul.mubr.msk.f32.gmra.mrb[22].mxu0 %vm6701_vm13, %v2104_v58  ;;  %v1946_v35 = vsel %vm909_vm8, %v1311_v4, %v1608_v62 }
 0x315   : > { %4604 = vmatprep.mubr.msk.f32.mxu0 %vm6701_vm13, %v2106_v31  ;;  %v1618_v61 = vpop.permute.xlu0 %1617 }
 0x316   : > { %v1951_v58 = vsel %vm909_vm8, %v1321_v51, %v1618_v61 }
 0x317   : > { %v1740_v16 = vpop.permute.xlu1 %1739 }
 0x318   : > { %v1979_v48 = vsel %vm562_vm0, %v1946_v35, %v1740_v16 }
 0x319   : > { %v1750_v30 = vpop.permute.xlu0 %1749 }
 0x31a   : > { %v1984_v31 = vsel %vm562_vm0, %v1951_v58, %v1750_v30 }
 0x31b   : > { %v1872_v18 = vpop.permute.xlu1 %1871 }
 0x31c   : > { %v5684_v21 = vsel %vm1988_vm11, %v1979_v48, %v1872_v18 }
 0x31d   : > { %v2107_v22 = vrot.slane %v5684_v21, 1  ;;  %v1882_v26 = vpop.permute.xlu0 %1881 }
 0x31e   : > { %v5711_v3 = vsel %vm1988_vm11, %v1984_v31, %v1882_v26 }
 0x31f   : > { %v1612_v41 = vpop.permute.xlu1 %1611  ;;  %v2108_v24 = vsel %vm6700_vm12, %v2105_v0, %v2107_v22  ;;  %v2110_v1 = vsel %vm6700_vm12, %v2107_v22, %v2109_v23  ;;  %v2117_v35 = vrot.slane %v5711_v3, 1 }
 0x320   : > { %4605 = vmatmul.mubr.msk.f32.gmra.mrb[24].mxu0 %vm6701_vm13, %v2108_v24  ;;  %v1948_v37 = vsel %vm909_vm8, %v1315_v7, %v1612_v41  ;;  %v1325_v41 = vld [vmem:[#allocation2 + $0x3e6] ss:$4 sm:$0xff] }
 0x321   : > { %4607 = vmatprep.mubr.msk.f32.mxu0 %vm6701_vm13, %v2110_v1  ;;  %v1622_v27 = vpop.permute.xlu0 %1621 }
 0x322   : > { %v1953_v25 = vsel %vm909_vm8, %v1325_v41, %v1622_v27 }
 0x323   : > { %v1744_v15 = vpop.permute.xlu1 %1743 }
 0x324   : > { %v1981_v39 = vsel %vm562_vm0, %v1948_v37, %v1744_v15  ;;  %v1323_v15 = vld [vmem:[#allocation2 + $0x3c6] ss:$4 sm:$0xff] }
 0x325   : > { %v1754_v48 = vpop.permute.xlu0 %1753 }
 0x326   : > { %v1986_v30 = vsel %vm562_vm0, %v1953_v25, %v1754_v48 }
 0x327   : > { %v1876_v56 = vpop.permute.xlu1 %1875 }
 0x328   : > { %v5700_v43 = vsel %vm1988_vm11, %v1981_v39, %v1876_v56 }
 0x329   : > { %v2111_v44 = vrot.slane %v5700_v43, 1  ;;  %v1886_v24 = vpop.permute.xlu0 %1885 }
 0x32a   : > { %v2020_v5 = vsel %vm1988_vm11, %v1986_v30, %v1886_v24 }
 0x32b   : > { %v1616_v38 = vpop.permute.xlu1 %1615  ;;  %v2112_v57 = vsel %vm6700_vm12, %v2109_v23, %v2111_v44  ;;  %v2114_v0 = vsel %vm6700_vm12, %v2111_v44, %v2113_v47  ;;  %v2121_v56 = vrot.slane %v2020_v5, 1 }
 0x32c   : > { %4608 = vmatmul.mubr.msk.f32.gmra.mrb[26].mxu0 %vm6701_vm13, %v2112_v57  ;;  %v1950_v16 = vsel %vm909_vm8, %v1319_v59, %v1616_v38 }
 0x32d   : > { %4610 = vmatprep.mubr.msk.f32.mxu0 %vm6701_vm13, %v2114_v0  ;;  %v1327_v0 = vld [vmem:[#allocation2 + $0x406] ss:$4 sm:$0x1] }
 0x32f   : > { %v1748_v62 = vpop.permute.xlu1 %1747 }
 0x330   : > { %v1983_v20 = vsel %vm562_vm0, %v1950_v16, %v1748_v62 }
 0x333   : > { %v1880_v10 = vpop.permute.xlu1 %1879 }
 0x334   : > { %v5716_v4 = vsel %vm1988_vm11, %v1983_v20, %v1880_v10 }
 0x335   : > { %v2115_v18 = vrot.slane %v5716_v4, 1 }
 0x337   : > { %v1620_v23 = vpop.permute.xlu1 %1619  ;;  %v2116_v61 = vsel %vm6700_vm12, %v2113_v47, %v2115_v18  ;;  %v2118_v22 = vsel %vm6700_vm12, %v2115_v18, %v2117_v35 }
 0x338   : > { %4611 = vmatmul.mubr.msk.f32.gmra.mrb[28].mxu0 %vm6701_vm13, %v2116_v61  ;;  %v1952_v32 = vsel %vm909_vm8, %v1323_v15, %v1620_v23 }
 0x339   : > { %4613 = vmatprep.mubr.msk.f32.mxu0 %vm6701_vm13, %v2118_v22 }
 0x33b   : > { %v1752_v1 = vpop.permute.xlu1 %1751 }
 0x33c   : > { %v1985_v7 = vsel %vm562_vm0, %v1952_v32, %v1752_v1 }
 0x33f   : > { %v1884_v37 = vpop.permute.xlu1 %1883 }
 0x340   : > { %v2019_v39 = vsel %vm1988_vm11, %v1985_v7, %v1884_v37 }
 0x341   : > { %v2119_v47 = vrot.slane %v2019_v39, 1 }
 0x343   : > { %v1624_v26 = vpop.permute.xlu1 %1623  ;;  %v2120_v44 = vsel %vm6700_vm12, %v2117_v35, %v2119_v47  ;;  %v2122_v38 = vsel %vm6700_vm12, %v2119_v47, %v2121_v56 }
 0x344   : > { %4614 = vmatmul.mubr.msk.f32.gmra.mrb[30].mxu0 %vm6701_vm13, %v2120_v44  ;;  %v1954_v51 = vsel %vm909_vm8, %v1327_v0, %v1624_v26 }
 0x345   : > { %4616 = vmatprep.mubr.msk.f32.mxu0 %vm6701_vm13, %v2122_v38 }
 0x347   : > { %v1756_v57 = vpop.permute.xlu1 %1755 }
 0x348   : > { %v1987_v27 = vsel %vm562_vm0, %v1954_v51, %v1756_v57 }
 0x34b   : > { %v1888_v62 = vpop.permute.xlu1 %1887 }
 0x34c   : > { %v2021_v58 = vsel %vm1988_vm11, %v1987_v27, %v1888_v62 }
 0x34d   : > { %v2123_v31 = vrot.slane %v2021_v58, 1 }
 0x34f   : > { %v2124_v59 = vsel %vm6700_vm12, %v2121_v56, %v2123_v31 }
 0x350   : > { %4617 = vmatmul.mubr.msk.f32.gmra.mrb[32].mxu0 %vm6701_vm13, %v2124_v59 }
 0x351   : > { %4623 = vmatprep.mubr.msk.f32.mxu0 %vm6701_vm13, %v5383_v13  ;;  %v3146_v13 = vld [vmem:[#allocation3 + $0x108] ss:$4 sm:$0x1] }
 0x352   : > { %3226 = vrot.lane.b32.xlu0 %v3146_v13, %s5012_s1 }
 0x354   : > { %4624 = vmatmul.mubr.msk.f32.vlgmr.msra.gmra.mrb[2].mxu0 %vm6701_vm13, %v5390_v19 }
 0x355   : > { %4626 = vmatprep.mubr.msk.f32.mxu0 %vm6701_vm13, %v5423_v45 }
 0x358   : > { %4627 = vmatmul.mubr.msk.f32.gmra.mrb[4].mxu0 %vm6701_vm13, %v5490_v60 }
 0x359   : > { %4629 = vmatprep.mubr.msk.f32.mxu0 %vm6701_vm13, %v5479_v40 }
 0x35c   : > { %4630 = vmatmul.mubr.msk.f32.gmra.mrb[6].mxu0 %vm6701_vm13, %v5483_v53 }
 0x35d   : > { %4632 = vmatprep.mubr.msk.f32.mxu0 %vm6701_vm13, %v5494_v50 }
 0x360   : > { %4633 = vmatmul.mubr.msk.f32.gmra.mrb[8].mxu0 %vm6701_vm13, %v5512_v9 }
 0x361   : > { %4635 = vmatprep.mubr.msk.f32.mxu0 %vm6701_vm13, %v5521_v14 }
 0x364   : > { %4636 = vmatmul.mubr.msk.f32.gmra.mrb[10].mxu0 %vm6701_vm13, %v5537_v28 }
 0x365   : > { %4638 = vmatprep.mubr.msk.f32.mxu0 %vm6701_vm13, %v5546_v33 }
 0x368   : > { %4639 = vmatmul.mubr.msk.f32.gmra.mrb[12].mxu0 %vm6701_vm13, %v5559_v42 }
 0x369   : > { %4641 = vmatprep.mubr.msk.f32.mxu0 %vm6701_vm13, %v5567_v46 }
 0x36c   : > { %4642 = vmatmul.mubr.msk.f32.gmra.mrb[14].mxu0 %vm6701_vm13, %v5579_v55 }
 0x36d   : > { %4644 = vmatprep.mubr.msk.f32.mxu0 %vm6701_vm13, %v5603_v36 }
 0x370   : > { %4645 = vmatmul.mubr.msk.f32.gmra.mrb[16].mxu0 %vm6701_vm13, %v5595_v12 }
 0x371   : > { %4647 = vmatprep.mubr.msk.f32.mxu0 %vm6701_vm13, %v5620_v17 }
 0x374   : > { %4648 = vmatmul.mubr.msk.f32.gmra.mrb[18].mxu0 %vm6701_vm13, %v5615_v34 }
 0x375   : > { %4650 = vmatprep.mubr.msk.f32.mxu0 %vm6701_vm13, %v5636_v63 }
 0x378   : > { %4651 = vmatmul.mubr.msk.f32.gmra.mrb[20].mxu0 %vm6701_vm13, %v5631_v52 }
 0x379   : > { %4653 = vmatprep.mubr.msk.f32.mxu0 %vm6701_vm13, %v5652_v29 }
 0x37c   : > { %4654 = vmatmul.mubr.msk.f32.gmra.mrb[22].mxu0 %vm6701_vm13, %v5647_v49 }
 0x37d   : > { %4656 = vmatprep.mubr.msk.f32.mxu0 %vm6701_vm13, %v5668_v6 }
 0x380   : > { %4657 = vmatmul.mubr.msk.f32.gmra.mrb[24].mxu0 %vm6701_vm13, %v5663_v54 }
 0x381   : > { %4659 = vmatprep.mubr.msk.f32.mxu0 %vm6701_vm13, %v5684_v21 }
 0x384   : > { %4660 = vmatmul.mubr.msk.f32.gmra.mrb[26].mxu0 %vm6701_vm13, %v5679_v8 }
 0x385   : > { %4662 = vmatprep.mubr.msk.f32.mxu0 %vm6701_vm13, %v5700_v43 }
 0x388   : > { %4663 = vmatmul.mubr.msk.f32.gmra.mrb[28].mxu0 %vm6701_vm13, %v5695_v11 }
 0x389   : > { %4665 = vmatprep.mubr.msk.f32.mxu0 %vm6701_vm13, %v5716_v4 }
 0x38c   : > { %4666 = vmatmul.mubr.msk.f32.gmra.mrb[30].mxu0 %vm6701_vm13, %v5711_v3 }
 0x38d   : > { %4668 = vmatprep.mubr.msk.f32.mxu0 %vm6701_vm13, %v2019_v39 }
 0x390   : > { %4669 = vmatmul.mubr.msk.f32.gmra.mrb[32].mxu0 %vm6701_vm13, %v2020_v5 }
 0x427   : > { %v5804_v19 = vpop.f32.mrb[2].mxu0 }
 0x428   : > { %v2705_v45 = vsel %vm562_vm0, %v5804_v19, 0.0  ;;  %v2775_v40 = vmul.f32 %v5804_v19, %v5804_v19  ;;  %v5810_v53 = vpop.f32.mrb[3].mxu0 }
 0x429   : > { %v2704_v60 = vsel %vm562_vm0, %v5810_v53, 0.0  ;;  %v2774_v50 = vmul.f32 %v5810_v53, %v5810_v53 }
 0x42a   : > { %v2807_v9 = vsel %vm562_vm0, %v2775_v40, 0.0  ;;  %v2706_v14 = vadd.f32 %v2705_v45, %v2704_v60 }
 0x42b   : > { %v2806_v28 = vsel %vm562_vm0, %v2774_v50, 0.0  ;;  %v5818_v33 = vpop.f32.mrb[4].mxu0 }
 0x42c   : > { %v2808_v42 = vadd.f32 %v2807_v9, %v2806_v28  ;;  %v5820_v46 = vpop.f32.mrb[5].mxu0  ;;  %v2777_v55 = vmul.f32 %v5818_v33, %v5818_v33  ;;  %v2709_v17 = vsel %vm562_vm0, %v5818_v33, 0.0 }
 0x42d   : > { %v2707_v12 = vsel %vm562_vm0, %v5820_v46, 0.0  ;;  %v2776_v36 = vmul.f32 %v5820_v46, %v5820_v46 }
 0x42e   : > { %v2708_v34 = vadd.f32 %v2707_v12, %v2706_v14  ;;  %v2811_v6 = vsel %vm562_vm0, %v2777_v55, 0.0 }
 0x42f   : > { %v2809_v52 = vsel %vm562_vm0, %v2776_v36, 0.0  ;;  %v5831_v63 = vpop.f32.mrb[6].mxu0 }
 0x430   : > { %v2810_v49 = vadd.f32 %v2809_v52, %v2808_v42  ;;  %v5833_v29 = vpop.f32.mrb[7].mxu0  ;;  %v2710_v54 = vadd.f32 %v2709_v17, %v2708_v34  ;;  %v2779_v8 = vmul.f32 %v5831_v63, %v5831_v63  ;;  %v2713_v16 = vsel %vm562_vm0, %v5831_v63, 0.0 }
 0x431   : > { %v2711_v21 = vsel %vm562_vm0, %v5833_v29, 0.0  ;;  %v2778_v11 = vmul.f32 %v5833_v29, %v5833_v29 }
 0x432   : > { %v2712_v43 = vadd.f32 %v2711_v21, %v2710_v54  ;;  %v2812_v3 = vadd.f32 %v2811_v6, %v2810_v49  ;;  %v2815_v18 = vsel %vm562_vm0, %v2779_v8, 0.0 }
 0x433   : > { %v2813_v20 = vsel %vm562_vm0, %v2778_v11, 0.0  ;;  %v5845_v10 = vpop.f32.mrb[8].mxu0 }
 0x434   : > { %v2814_v4 = vadd.f32 %v2813_v20, %v2812_v3  ;;  %v5847_v35 = vpop.f32.mrb[9].mxu0  ;;  %v2714_v48 = vadd.f32 %v2713_v16, %v2712_v43  ;;  %v2781_v23 = vmul.f32 %v5845_v10, %v5845_v10  ;;  %v2717_v1 = vsel %vm562_vm0, %v5845_v10, 0.0 }
 0x435   : > { %v2715_v61 = vsel %vm562_vm0, %v5847_v35, 0.0  ;;  %v2780_v22 = vmul.f32 %v5847_v35, %v5847_v35 }
 0x436   : > { %v2716_v41 = vadd.f32 %v2715_v61, %v2714_v48  ;;  %v2816_v24 = vadd.f32 %v2815_v18, %v2814_v4  ;;  %v2819_v7 = vsel %vm562_vm0, %v2781_v23, 0.0 }
 0x437   : > { %v2817_v25 = vsel %vm562_vm0, %v2780_v22, 0.0  ;;  %v5859_v30 = vpop.f32.mrb[10].mxu0 }
 0x438   : > { %v2818_v15 = vadd.f32 %v2817_v25, %v2816_v24  ;;  %v5861_v5 = vpop.f32.mrb[11].mxu0  ;;  %v2718_v32 = vadd.f32 %v2717_v1, %v2716_v41  ;;  %v2783_v37 = vmul.f32 %v5859_v30, %v5859_v30  ;;  %v2721_v44 = vsel %vm562_vm0, %v5859_v30, 0.0 }
 0x439   : > { %v2719_v39 = vsel %vm562_vm0, %v5861_v5, 0.0  ;;  %v2782_v56 = vmul.f32 %v5861_v5, %v5861_v5 }
 0x43a   : > { %v2720_v47 = vadd.f32 %v2719_v39, %v2718_v32  ;;  %v2820_v26 = vadd.f32 %v2819_v7, %v2818_v15  ;;  %v2823_v62 = vsel %vm562_vm0, %v2783_v37, 0.0 }
 0x43b   : > { %v2821_v38 = vsel %vm562_vm0, %v2782_v56, 0.0  ;;  %v5873_v57 = vpop.f32.mrb[12].mxu0 }
 0x43c   : > { %v2822_v0 = vadd.f32 %v2821_v38, %v2820_v26  ;;  %v5875_v51 = vpop.f32.mrb[13].mxu0  ;;  %v2722_v27 = vadd.f32 %v2721_v44, %v2720_v47  ;;  %v2785_v58 = vmul.f32 %v5873_v57, %v5873_v57  ;;  %v2725_v40 = vsel %vm562_vm0, %v5873_v57, 0.0 }
 0x43d   : > { %v2723_v31 = vsel %vm562_vm0, %v5875_v51, 0.0  ;;  %v2784_v59 = vmul.f32 %v5875_v51, %v5875_v51 }
 0x43e   : > { %v2724_v13 = vadd.f32 %v2723_v31, %v2722_v27  ;;  %v2824_v45 = vadd.f32 %v2823_v62, %v2822_v0  ;;  %v2827_v42 = vsel %vm562_vm0, %v2785_v58, 0.0 }
 0x43f   : > { %v2825_v60 = vsel %vm562_vm0, %v2784_v59, 0.0  ;;  %v5887_v50 = vpop.f32.mrb[14].mxu0 }
 0x440   : > { %v2826_v9 = vadd.f32 %v2825_v60, %v2824_v45  ;;  %v5889_v14 = vpop.f32.mrb[15].mxu0  ;;  %v2726_v28 = vadd.f32 %v2725_v40, %v2724_v13  ;;  %v2787_v55 = vmul.f32 %v5887_v50, %v5887_v50  ;;  %v2729_v52 = vsel %vm562_vm0, %v5887_v50, 0.0 }
 0x441   : > { %v2727_v12 = vsel %vm562_vm0, %v5889_v14, 0.0  ;;  %v2786_v36 = vmul.f32 %v5889_v14, %v5889_v14 }
 0x442   : > { %v2728_v34 = vadd.f32 %v2727_v12, %v2726_v28  ;;  %v2828_v17 = vadd.f32 %v2827_v42, %v2826_v9  ;;  %v2831_v11 = vsel %vm562_vm0, %v2787_v55, 0.0 }
 0x443   : > { %v2829_v49 = vsel %vm562_vm0, %v2786_v36, 0.0  ;;  %v5901_v54 = vpop.f32.mrb[16].mxu0 }
 0x444   : > { %v2830_v6 = vadd.f32 %v2829_v49, %v2828_v17  ;;  %v5903_v8 = vpop.f32.mrb[17].mxu0  ;;  %v2730_v21 = vadd.f32 %v2729_v52, %v2728_v34  ;;  %v2789_v43 = vmul.f32 %v5901_v54, %v5901_v54  ;;  %v2733_v48 = vsel %vm562_vm0, %v5901_v54, 0.0 }
 0x445   : > { %v2731_v3 = vsel %vm562_vm0, %v5903_v8, 0.0  ;;  %v2788_v16 = vmul.f32 %v5903_v8, %v5903_v8 }
 0x446   : > { %v2732_v20 = vadd.f32 %v2731_v3, %v2730_v21  ;;  %v2832_v4 = vadd.f32 %v2831_v11, %v2830_v6  ;;  %v2835_v24 = vsel %vm562_vm0, %v2789_v43, 0.0 }
 0x447   : > { %v2833_v18 = vsel %vm562_vm0, %v2788_v16, 0.0  ;;  %v5915_v23 = vpop.f32.mrb[18].mxu0 }
 0x448   : > { %v2834_v61 = vadd.f32 %v2833_v18, %v2832_v4  ;;  %v5917_v22 = vpop.f32.mrb[19].mxu0  ;;  %v2734_v41 = vadd.f32 %v2733_v48, %v2732_v20  ;;  %v2791_v1 = vmul.f32 %v5915_v23, %v5915_v23  ;;  %v2737_v37 = vsel %vm562_vm0, %v5915_v23, 0.0 }
 0x449   : > { %v2735_v25 = vsel %vm562_vm0, %v5917_v22, 0.0  ;;  %v2790_v15 = vmul.f32 %v5917_v22, %v5917_v22 }
 0x44a   : > { %v2736_v32 = vadd.f32 %v2735_v25, %v2734_v41  ;;  %v2836_v7 = vadd.f32 %v2835_v24, %v2834_v61  ;;  %v2839_v38 = vsel %vm562_vm0, %v2791_v1, 0.0 }
 0x44b   : > { %v2837_v39 = vsel %vm562_vm0, %v2790_v15, 0.0  ;;  %v5929_v56 = vpop.f32.mrb[20].mxu0 }
 0x44c   : > { %v2838_v47 = vadd.f32 %v2837_v39, %v2836_v7  ;;  %v5931_v26 = vpop.f32.mrb[21].mxu0  ;;  %v2738_v44 = vadd.f32 %v2737_v37, %v2736_v32  ;;  %v2793_v0 = vmul.f32 %v5929_v56, %v5929_v56  ;;  %v2741_v59 = vsel %vm562_vm0, %v5929_v56, 0.0 }
 0x44d   : > { %v2739_v27 = vsel %vm562_vm0, %v5931_v26, 0.0  ;;  %v2792_v62 = vmul.f32 %v5931_v26, %v5931_v26 }
 0x44e   : > { %v2740_v58 = vadd.f32 %v2739_v27, %v2738_v44  ;;  %v2840_v31 = vadd.f32 %v2839_v38, %v2838_v47  ;;  %v2843_v28 = vsel %vm562_vm0, %v2793_v0, 0.0 }
 0x44f   : > { %v2841_v13 = vsel %vm562_vm0, %v2792_v62, 0.0  ;;  %v5943_v45 = vpop.f32.mrb[22].mxu0 }
 0x450   : > { %v2842_v40 = vadd.f32 %v2841_v13, %v2840_v31  ;;  %v5945_v60 = vpop.f32.mrb[23].mxu0  ;;  %v2742_v9 = vadd.f32 %v2741_v59, %v2740_v58  ;;  %v2795_v42 = vmul.f32 %v5943_v45, %v5943_v45  ;;  %v2745_v17 = vsel %vm562_vm0, %v5943_v45, 0.0 }
 0x451   : > { %v2743_v55 = vsel %vm562_vm0, %v5945_v60, 0.0  ;;  %v2794_v12 = vmul.f32 %v5945_v60, %v5945_v60 }
 0x452   : > { %v2744_v36 = vadd.f32 %v2743_v55, %v2742_v9  ;;  %v2844_v34 = vadd.f32 %v2843_v28, %v2842_v40  ;;  %v2847_v43 = vsel %vm562_vm0, %v2795_v42, 0.0 }
 0x453   : > { %v2845_v52 = vsel %vm562_vm0, %v2794_v12, 0.0  ;;  %v5957_v49 = vpop.f32.mrb[24].mxu0 }
 0x454   : > { %v2846_v6 = vadd.f32 %v2845_v52, %v2844_v34  ;;  %v5959_v21 = vpop.f32.mrb[25].mxu0  ;;  %v2746_v11 = vadd.f32 %v2745_v17, %v2744_v36  ;;  %v2797_v3 = vmul.f32 %v5957_v49, %v5957_v49  ;;  %v2749_v18 = vsel %vm562_vm0, %v5957_v49, 0.0 }
 0x455   : > { %v2747_v16 = vsel %vm562_vm0, %v5959_v21, 0.0  ;;  %v2796_v20 = vmul.f32 %v5959_v21, %v5959_v21 }
 0x456   : > { %v2748_v4 = vadd.f32 %v2747_v16, %v2746_v11  ;;  %v2848_v48 = vadd.f32 %v2847_v43, %v2846_v6  ;;  %v2851_v15 = vsel %vm562_vm0, %v2797_v3, 0.0 }
 0x457   : > { %v2849_v61 = vsel %vm562_vm0, %v2796_v20, 0.0  ;;  %v5971_v41 = vpop.f32.mrb[26].mxu0 }
 0x458   : > { %v2850_v24 = vadd.f32 %v2849_v61, %v2848_v48  ;;  %v5973_v1 = vpop.f32.mrb[27].mxu0  ;;  %v2750_v25 = vadd.f32 %v2749_v18, %v2748_v4  ;;  %v2799_v32 = vmul.f32 %v5971_v41, %v5971_v41  ;;  %v2753_v44 = vsel %vm562_vm0, %v5971_v41, 0.0 }
 0x459   : > { %v2751_v7 = vsel %vm562_vm0, %v5973_v1, 0.0  ;;  %v2798_v37 = vmul.f32 %v5973_v1, %v5973_v1 }
 0x45a   : > { %v2752_v39 = vadd.f32 %v2751_v7, %v2750_v25  ;;  %v2852_v47 = vadd.f32 %v2851_v15, %v2850_v24  ;;  %v2855_v31 = vsel %vm562_vm0, %v2799_v32, 0.0 }
 0x45b   : > { %v2853_v38 = vsel %vm562_vm0, %v2798_v37, 0.0  ;;  %v5985_v0 = vpop.f32.mrb[28].mxu0 }
 0x45c   : > { %v2854_v27 = vadd.f32 %v2853_v38, %v2852_v47  ;;  %v5987_v62 = vpop.f32.mrb[29].mxu0  ;;  %v2754_v58 = vadd.f32 %v2753_v44, %v2752_v39  ;;  %v2801_v59 = vmul.f32 %v5985_v0, %v5985_v0  ;;  %v2757_v42 = vsel %vm562_vm0, %v5985_v0, 0.0 }
 0x45d   : > { %v2755_v13 = vsel %vm562_vm0, %v5987_v62, 0.0  ;;  %v2800_v40 = vmul.f32 %v5987_v62, %v5987_v62 }
 0x45e   : > { %v2756_v9 = vadd.f32 %v2755_v13, %v2754_v58  ;;  %v2856_v28 = vadd.f32 %v2855_v31, %v2854_v27  ;;  %v2859_v52 = vsel %vm562_vm0, %v2801_v59, 0.0 }
 0x45f   : > { %v2857_v55 = vsel %vm562_vm0, %v2800_v40, 0.0  ;;  %v5999_v12 = vpop.f32.mrb[30].mxu0 }
 0x460   : > { %v2858_v36 = vadd.f32 %v2857_v55, %v2856_v28  ;;  %v6001_v34 = vpop.f32.mrb[31].mxu0  ;;  %v2758_v17 = vadd.f32 %v2757_v42, %v2756_v9  ;;  %v2803_v6 = vmul.f32 %v5999_v12, %v5999_v12  ;;  %v2761_v20 = vsel %vm562_vm0, %v5999_v12, 0.0 }
 0x461   : > { %v2759_v11 = vsel %vm562_vm0, %v6001_v34, 0.0  ;;  %v2802_v43 = vmul.f32 %v6001_v34, %v6001_v34 }
 0x462   : > { %v2760_v3 = vadd.f32 %v2759_v11, %v2758_v17  ;;  %v2860_v16 = vadd.f32 %v2859_v52, %v2858_v36  ;;  %v2863_v25 = vsel %vm562_vm0, %v2803_v6, 0.0 }
 0x463   : > { %v2861_v4 = vsel %vm562_vm0, %v2802_v43, 0.0  ;;  %v6013_v48 = vpop.f32.mrb[32].mxu0 }
 0x464   : > { %v2862_v18 = vadd.f32 %v2861_v4, %v2860_v16  ;;  %v2695_v61 = vpop.f32.mrb[33].mxu0  ;;  %v2762_v24 = vadd.f32 %v2761_v20, %v2760_v3  ;;  %v2805_v15 = vmul.f32 %v6013_v48, %v6013_v48  ;;  %v2765_v47 = vsel %vm562_vm0, %v6013_v48, 0.0 }
 0x465   : > { %v2763_v32 = vsel %vm562_vm0, %v2695_v61, 0.0  ;;  %v2804_v7 = vmul.f32 %v2695_v61, %v2695_v61 }
 0x466   : > { %v2764_v37 = vadd.f32 %v2763_v32, %v2762_v24  ;;  %v2864_v39 = vadd.f32 %v2863_v25, %v2862_v18  ;;  %v2867_v58 = vsel %vm562_vm0, %v2805_v15, 0.0  ;;  %v2887_v24 = vlaneseq  ;;  %v2879_v15 = vld [vmem:[%s6686_s4] sm:$0x1] }
 0x467   : > { %v2865_v44 = vsel %vm562_vm0, %v2804_v7, 0.0 }
 0x468   : > { %v2766_v38 = vadd.f32 %v2765_v47, %v2764_v37  ;;  %v2866_v27 = vadd.f32 %v2865_v44, %v2864_v39  ;;  %v2888_v25 = vshrl.u32 %v2887_v24, 7  ;;  %v2883_v39 = vld [vmem:[%s6687_s5] sm:$0x1] }
 0x46a   : > { %v2767_v31 = vrot.slane %v2766_v38, 4  ;;  %v2868_v59 = vadd.f32 %v2867_v58, %v2866_v27  ;;  %v6026_v32 = vsub.s32 0, %v2888_v25 }
 0x46c   : > { %v2768_v13 = vadd.f32 %v2767_v31, %v2766_v38  ;;  %v2869_v40 = vrot.slane %v2868_v59, 4 }
 0x46e   : > { %v2769_v9 = vrot.slane %v2768_v13, 2  ;;  %v2870_v28 = vadd.f32 %v2869_v40, %v2868_v59 }
 0x470   : > { %v2770_v42 = vadd.f32 %v2769_v9, %v2768_v13  ;;  %v2871_v55 = vrot.slane %v2870_v28, 2 }
 0x472   : > { %v2771_v36 = vrot.slane %v2770_v42, 1  ;;  %v2872_v17 = vadd.f32 %v2871_v55, %v2870_v28 }
 0x474   : > { %v2772_v52 = vadd.f32 %v2771_v36, %v2770_v42  ;;  %v2873_v6 = vrot.slane %v2872_v17, 1 }
 0x476   : > { %v2773_v11 = vmul.f32 0.00390625, %v2772_v52  ;;  %v2874_v43 = vadd.f32 %v2873_v6, %v2872_v17 }
 0x478   : > { %v2875_v3 = vmul.f32 0.00390625, %v2874_v43  ;;  %v2876_v16 = vmul.f32 %v2773_v11, %v2773_v11 }
 0x47a   : > { %v2877_v20 = vsub.f32 %v2875_v3, %v2876_v16 }
 0x47c   : > { %v2878_v4 = vmax.f32 %v2877_v20, 0.0 }
 0x47e   : > { %v2880_v18 = vadd.f32 1e-05, %v2878_v4 }
 0x480   : > { %4991 = vrsqrt.f32 %v2880_v18 }
 0x48a   : > { %v4992_v7 = vpop.eup %4991 }
 0x48b   : > { %v2882_v37 = vmul.f32 %v4992_v7, %v2879_v15 }
 0x48d   : > { %v2884_v47 = vmul.f32 %v2882_v37, %v2773_v11  ;;  %v2890_v44 = vrot.slane %v2882_v37, %v6026_v32 }
 0x48f   : > { %v2885_v38 = vsub.f32 %v2883_v39, %v2884_v47  ;;  %v2922_v27 = vmul.f32 %v2890_v44, %v2695_v61  ;;  %v2892_v58 = vmul.f32 %v2890_v44, %v5810_v53  ;;  %v2893_v31 = vmul.f32 %v5804_v19, %v2890_v44 }
 0x490   : > { %v2894_v59 = vmul.f32 %v2890_v44, %v5820_v46  ;;  %v2895_v13 = vmul.f32 %v5818_v33, %v2890_v44  ;;  %v2896_v40 = vmul.f32 %v2890_v44, %v5833_v29  ;;  %v2897_v9 = vmul.f32 %v5831_v63, %v2890_v44 }
 0x491   : > { %v2928_v28 = vrot.slane %v2885_v38, %v6026_v32  ;;  %v2898_v42 = vmul.f32 %v2890_v44, %v5847_v35  ;;  %v2899_v55 = vmul.f32 %v5845_v10, %v2890_v44  ;;  %v2900_v61 = vmul.f32 %v2890_v44, %v5861_v5 }
 0x492   : > { %v2901_v53 = vmul.f32 %v5859_v30, %v2890_v44  ;;  %v2902_v19 = vmul.f32 %v2890_v44, %v5875_v51  ;;  %v2903_v46 = vmul.f32 %v5873_v57, %v2890_v44  ;;  %v2904_v33 = vmul.f32 %v2890_v44, %v5889_v14 }
 0x493   : > { %v2960_v36 = vadd.f32 %v2928_v28, %v2922_v27  ;;  %v2905_v29 = vmul.f32 %v5887_v50, %v2890_v44  ;;  %v2906_v63 = vmul.f32 %v2890_v44, %v5903_v8  ;;  %v2907_v17 = vmul.f32 %v5901_v54, %v2890_v44 }
 0x494   : > { %v2908_v35 = vmul.f32 %v2890_v44, %v5917_v22  ;;  %v2909_v10 = vmul.f32 %v5915_v23, %v2890_v44  ;;  %v2910_v5 = vmul.f32 %v2890_v44, %v5931_v26  ;;  %v2911_v30 = vmul.f32 %v5929_v56, %v2890_v44 }
 0x495   : > { %vm2992_vm15 = vcmp.gt.f32.partialorder %v2960_v36, 0.0  ;;  %v3024_v51 = vmul.f32 0.2, %v2960_v36  ;;  %v2912_v57 = vmul.f32 %v2890_v44, %v5945_v60  ;;  %v2913_v14 = vmul.f32 %v5943_v45, %v2890_v44 }
 0x496   : > { %v2914_v50 = vmul.f32 %v2890_v44, %v5959_v21  ;;  %v2915_v8 = vmul.f32 %v5957_v49, %v2890_v44  ;;  %v2916_v54 = vmul.f32 %v2890_v44, %v5973_v1  ;;  %v2917_v22 = vmul.f32 %v5971_v41, %v2890_v44 }
 0x497   : > { %v3056_v52 = vsel %vm2992_vm15, %v2960_v36, %v3024_v51  ;;  %v2918_v23 = vmul.f32 %v2890_v44, %v5987_v62  ;;  %v2919_v26 = vmul.f32 %v5985_v0, %v2890_v44  ;;  %v2920_v56 = vmul.f32 %v2890_v44, %v6001_v34 }
 0x498   : > { %3090 = vst.msk [vmem:[#allocation3 + $0xf8] sm:$0xff] %vm562_vm0, %v3056_v52  ;;  %v2921_v60 = vmul.f32 %v5999_v12, %v2890_v44  ;;  %v2923_v45 = vmul.f32 %v6013_v48, %v2890_v44  ;;  %v6065_v21 = vadd.f32 %v2928_v28, %v2892_v58  ;;  %v6067_v49 = vadd.f32 %v2928_v28, %v2893_v31 }
 0x499   : > { %v6069_v1 = vadd.f32 %v2928_v28, %v2894_v59  ;;  %v2933_v41 = vadd.f32 %v2928_v28, %v2895_v13  ;;  %v2934_v6 = vadd.f32 %v2928_v28, %v2896_v40  ;;  %v2935_v11 = vadd.f32 %v2928_v28, %v2897_v9 }
 0x49a   : > { %v2936_v62 = vadd.f32 %v2928_v28, %v2898_v42  ;;  %v2937_v43 = vadd.f32 %v2928_v28, %v2899_v55  ;;  %v6071_v0 = vadd.f32 %v2928_v28, %v2900_v61  ;;  %v6073_v34 = vadd.f32 %v2928_v28, %v2901_v53 }
 0x49b   : > { %v6075_v3 = vadd.f32 %v2928_v28, %v2902_v19  ;;  %v6077_v12 = vadd.f32 %v2928_v28, %v2903_v46  ;;  %v6079_v48 = vadd.f32 %v2928_v28, %v2904_v33  ;;  %v6081_v16 = vadd.f32 %v2928_v28, %v2905_v29 }
 0x49c   : > { %v6083_v20 = vadd.f32 %v2928_v28, %v2906_v63  ;;  %v6085_v4 = vadd.f32 %v2928_v28, %v2907_v17  ;;  %v6087_v18 = vadd.f32 %v2928_v28, %v2908_v35  ;;  %v6089_v24 = vadd.f32 %v2928_v28, %v2909_v10 }
 0x49d   : > { %v6091_v25 = vadd.f32 %v2928_v28, %v2910_v5  ;;  %v6093_v15 = vadd.f32 %v2928_v28, %v2911_v30  ;;  %v6095_v7 = vadd.f32 %v2928_v28, %v2912_v57  ;;  %v6097_v37 = vadd.f32 %v2928_v28, %v2913_v14 }
 0x49e   : > { %v6099_v39 = vadd.f32 %v2928_v28, %v2914_v50  ;;  %v6101_v47 = vadd.f32 %v2928_v28, %v2915_v8  ;;  %v6103_v44 = vadd.f32 %v2928_v28, %v2916_v54  ;;  %v6105_v38 = vadd.f32 %v2928_v28, %v2917_v22 }
 0x49f   : > { %v6107_v27 = vadd.f32 %v2928_v28, %v2918_v23  ;;  %v6109_v58 = vadd.f32 %v2928_v28, %v2919_v26  ;;  %v6111_v31 = vadd.f32 %v2928_v28, %v2920_v56  ;;  %v6113_v59 = vadd.f32 %v2928_v28, %v2921_v60 }
 0x4a0   : > { %v6115_v13 = vadd.f32 %v2928_v28, %v2923_v45  ;;  %vm2965_vm1 = vcmp.gt.f32.partialorder %v2933_v41, 0.0  ;;  %vm2966_vm2 = vcmp.gt.f32.partialorder %v2934_v6, 0.0  ;;  %vm2967_vm3 = vcmp.gt.f32.partialorder %v2935_v11, 0.0 }
 0x4a1   : > { %vm2968_vm4 = vcmp.gt.f32.partialorder %v2936_v62, 0.0  ;;  %vm2969_vm5 = vcmp.gt.f32.partialorder %v2937_v43, 0.0  ;;  %v2997_v40 = vmul.f32 0.2, %v2933_v41  ;;  %v2998_v9 = vmul.f32 0.2, %v2934_v6 }
 0x4a2   : > { %v2999_v42 = vmul.f32 0.2, %v2935_v11  ;;  %v3000_v55 = vmul.f32 0.2, %v2936_v62  ;;  %v3001_v61 = vmul.f32 0.2, %v2937_v43 }
 0x4a3   : > { %v3029_v53 = vsel %vm2965_vm1, %v2933_v41, %v2997_v40  ;;  %v3030_v19 = vsel %vm2966_vm2, %v2934_v6, %v2998_v9  ;;  %vm2962_vm6 = vcmp.gt.f32.partialorder %v6065_v21, 0.0  ;;  %vm2963_vm7 = vcmp.gt.f32.partialorder %v6067_v49, 0.0 }
 0x4a4   : > { %v3031_v46 = vsel %vm2967_vm3, %v2935_v11, %v2999_v42  ;;  %v3032_v33 = vsel %vm2968_vm4, %v2936_v62, %v3000_v55  ;;  %v3033_v36 = vsel %vm2969_vm5, %v2937_v43, %v3001_v61  ;;  %3063 = vst.msk [vmem:[#allocation3 + $0x20] sm:$0xff] %vm562_vm0, %v3029_v53  ;;  %3064 = vst.msk [vmem:[#allocation3 + $0x28] sm:$0xff] %vm562_vm0, %v3030_v19  ;;  %vm2964_vm8 = vcmp.gt.f32.partialorder %v6069_v1, 0.0 }
 0x4a5   : > { %3065 = vst.msk [vmem:[#allocation3 + $0x30] sm:$0xff] %vm562_vm0, %v3031_v46  ;;  %3066 = vst.msk [vmem:[#allocation3 + $0x38] sm:$0xff] %vm562_vm0, %v3032_v33  ;;  %vm2970_vm9 = vcmp.gt.f32.partialorder %v6071_v0, 0.0  ;;  %vm2971_vm10 = vcmp.gt.f32.partialorder %v6073_v34, 0.0  ;;  %vm2974_vm15 = vcmp.gt.f32.partialorder %v6079_v48, 0.0  ;;  %vm2979_vm5 = vcmp.gt.f32.partialorder %v6089_v24, 0.0 }
 0x4a6   : > { %3067 = vst.msk [vmem:[#allocation3 + $0x40] sm:$0xff] %vm562_vm0, %v3033_v36  ;;  %vm2980_vm12 = vcmp.gt.f32.partialorder %v6091_v25, 0.0  ;;  %v2994_v28 = vmul.f32 0.2, %v6065_v21  ;;  %vm2985_vm2 = vcmp.gt.f32.partialorder %v6101_v47, 0.0  ;;  %vm2986_vm3 = vcmp.gt.f32.partialorder %v6103_v44, 0.0 }
 0x4a7   : > { %v2995_v29 = vmul.f32 0.2, %v6067_v49  ;;  %v2996_v63 = vmul.f32 0.2, %v6069_v1  ;;  %v3002_v17 = vmul.f32 0.2, %v6071_v0 }
 0x4a8   : > { %vm2988_vm11 = vcmp.gt.f32.partialorder %v6107_v27, 0.0  ;;  %vm2989_vm14 = vcmp.gt.f32.partialorder %v6109_v58, 0.0  ;;  %vm2990_vm13 = vcmp.gt.f32.partialorder %v6111_v31, 0.0  ;;  %vm2991_vm1 = vcmp.gt.f32.partialorder %v6113_v59, 0.0  ;;  %v3308_v36 = vld [vmem:[%s6688_s6 + $0x38] sm:$0xff] }
 0x4a9   : > { %v3003_v10 = vmul.f32 0.2, %v6073_v34  ;;  %v3004_v5 = vmul.f32 0.2, %v6075_v3  ;;  %v3026_v30 = vsel %vm2962_vm6, %v6065_v21, %v2994_v28  ;;  %vm2993_vm4 = vcmp.gt.f32.partialorder %v6115_v13, 0.0 }
 0x4aa   : > { %v3005_v51 = vmul.f32 0.2, %v6077_v12  ;;  %v3006_v57 = vmul.f32 0.2, %v6079_v48  ;;  %v3007_v14 = vmul.f32 0.2, %v6081_v16  ;;  %v3027_v50 = vsel %vm2963_vm7, %v6067_v49, %v2995_v29 }
 0x4ab   : > { %3060 = vst.msk [vmem:[#allocation3 + $0x8] sm:$0xff] %vm562_vm0, %v3026_v30  ;;  %v3008_v8 = vmul.f32 0.2, %v6083_v20  ;;  %v3009_v54 = vmul.f32 0.2, %v6085_v4  ;;  %v3028_v52 = vsel %vm2964_vm8, %v6069_v1, %v2996_v63  ;;  %3061 = vst.msk [vmem:[#allocation3 + $0x10] sm:$0xff] %vm562_vm0, %v3027_v50  ;;  %v3034_v60 = vsel %vm2970_vm9, %v6071_v0, %v3002_v17 }
 0x4ac   : > { %v3010_v22 = vmul.f32 0.2, %v6087_v18  ;;  %v3011_v23 = vmul.f32 0.2, %v6089_v24  ;;  %v3012_v26 = vmul.f32 0.2, %v6091_v25  ;;  %v3035_v1 = vsel %vm2971_vm10, %v6073_v34, %v3003_v10 }
 0x4ad   : > { %v3114_v35 = vld [vmem:[#allocation3 + $0x27] ss:$4 sm:$0xff]  ;;  %v3013_v56 = vmul.f32 0.2, %v6093_v15  ;;  %3062 = vst.msk [vmem:[#allocation3 + $0x18] sm:$0xff] %vm562_vm0, %v3028_v52  ;;  %3068 = vst.msk [vmem:[#allocation3 + $0x48] sm:$0xff] %vm562_vm0, %v3034_v60 }
 0x4ae   : > { %3176 = vrot.lane.b32.xlu1 %v3114_v35, %s5010_s23  ;;  %v3014_v45 = vmul.f32 0.2, %v6095_v7  ;;  %v3015_v21 = vmul.f32 0.2, %v6097_v37  ;;  %v3016_v49 = vmul.f32 0.2, %v6099_v39 }
 0x4af   : > { %v3017_v41 = vmul.f32 0.2, %v6101_v47  ;;  %v3018_v6 = vmul.f32 0.2, %v6103_v44  ;;  %v3019_v11 = vmul.f32 0.2, %v6105_v38 }
 0x4b0   : > { %vm6706_vm6 = vcmp.gt.f32.partialorder %v6075_v3, 0.0  ;;  %3069 = vst.msk [vmem:[#allocation3 + $0x50] sm:$0xff] %vm562_vm0, %v3035_v1  ;;  %v3020_v43 = vmul.f32 0.2, %v6107_v27  ;;  %v3021_v0 = vmul.f32 0.2, %v6109_v58 }
 0x4b1   : > { %v3036_v62 = vsel %vm6706_vm6, %v6075_v3, %v3004_v5  ;;  %v3022_v34 = vmul.f32 0.2, %v6111_v31  ;;  %vm6707_vm7 = vcmp.gt.f32.partialorder %v6077_v12, 0.0  ;;  %v3023_v9 = vmul.f32 0.2, %v6113_v59 }
 0x4b2   : > { %v3037_v40 = vsel %vm6707_vm7, %v6077_v12, %v3005_v51  ;;  %3070 = vst.msk [vmem:[#allocation3 + $0x58] sm:$0xff] %vm562_vm0, %v3036_v62  ;;  %v3025_v42 = vmul.f32 0.2, %v6115_v13  ;;  %v3038_v3 = vsel %vm2974_vm15, %v6079_v48, %v3006_v57  ;;  %vm6708_vm8 = vcmp.gt.f32.partialorder %v6081_v16, 0.0  ;;  %v3132_v29 = vld [vmem:[#allocation3 + $0x28] ss:$4 sm:$0xff] }
 0x4b3   : > { %v3039_v55 = vsel %vm6708_vm8, %v6081_v16, %v3007_v14  ;;  %3071 = vst.msk [vmem:[#allocation3 + $0x60] sm:$0xff] %vm562_vm0, %v3037_v40  ;;  %vm6709_vm9 = vcmp.gt.f32.partialorder %v6083_v20, 0.0  ;;  %vm6710_vm10 = vcmp.gt.f32.partialorder %v6085_v4, 0.0  ;;  %vm6711_vm6 = vcmp.gt.f32.partialorder %v6087_v18, 0.0  ;;  %3072 = vst.msk [vmem:[#allocation3 + $0x68] sm:$0xff] %vm562_vm0, %v3038_v3 }
 0x4b4   : > { %v3040_v12 = vsel %vm6709_vm9, %v6083_v20, %v3008_v8  ;;  %v3041_v61 = vsel %vm6710_vm10, %v6085_v4, %v3009_v54  ;;  %v3042_v53 = vsel %vm6711_vm6, %v6087_v18, %v3010_v22  ;;  %v3043_v48 = vsel %vm2979_vm5, %v6089_v24, %v3011_v23  ;;  %3073 = vst.msk [vmem:[#allocation3 + $0x70] sm:$0xff] %vm562_vm0, %v3039_v55  ;;  %v3112_v24 = vld [vmem:[#allocation3 + $0x7] ss:$4 sm:$0xff]  ;;  %v3130_v19 = vld [vmem:[#allocation3 + $0x8] ss:$4 sm:$0xff] }
 0x4b5   : > { %v3044_v16 = vsel %vm2980_vm12, %v6091_v25, %v3012_v26  ;;  %vm6712_vm15 = vcmp.gt.f32.partialorder %v6093_v15, 0.0  ;;  %vm6713_vm7 = vcmp.gt.f32.partialorder %v6095_v7, 0.0  ;;  %vm6714_vm8 = vcmp.gt.f32.partialorder %v6097_v37, 0.0  ;;  %3074 = vst.msk [vmem:[#allocation3 + $0x78] sm:$0xff] %vm562_vm0, %v3040_v12  ;;  %3075 = vst.msk [vmem:[#allocation3 + $0x80] sm:$0xff] %vm562_vm0, %v3041_v61  ;;  %3174 = vrot.lane.b32.xlu0 %v3112_v24, %s5010_s23  ;;  %3210 = vrot.lane.b32.xlu1 %v3130_v19, %s5012_s1  ;;  %v3301_v54 = vld [vmem:[%s6688_s6] sm:$0xff] }
 0x4b6   : > { %v3045_v20 = vsel %vm6712_vm15, %v6093_v15, %v3013_v56  ;;  %v3046_v4 = vsel %vm6713_vm7, %v6095_v7, %v3014_v45  ;;  %v3047_v18 = vsel %vm6714_vm8, %v6097_v37, %v3015_v21  ;;  %3076 = vst.msk [vmem:[#allocation3 + $0x88] sm:$0xff] %vm562_vm0, %v3042_v53  ;;  %3077 = vst.msk [vmem:[#allocation3 + $0x90] sm:$0xff] %vm562_vm0, %v3043_v48  ;;  %vm6715_vm12 = vcmp.gt.f32.partialorder %v6099_v39, 0.0  ;;  %v3150_v63 = vld [vmem:[#allocation3 + $0x29] ss:$4 sm:$0xff] }
 0x4b7   : > { %v3048_v25 = vsel %vm6715_vm12, %v6099_v39, %v3016_v49  ;;  %v3049_v15 = vsel %vm2985_vm2, %v6101_v47, %v3017_v41  ;;  %v3050_v7 = vsel %vm2986_vm3, %v6103_v44, %v3018_v6  ;;  %vm6716_vm5 = vcmp.gt.f32.partialorder %v6105_v38, 0.0  ;;  %3078 = vst.msk [vmem:[#allocation3 + $0x98] sm:$0xff] %vm562_vm0, %v3044_v16  ;;  %3079 = vst.msk [vmem:[#allocation3 + $0xa0] sm:$0xff] %vm562_vm0, %v3045_v20  ;;  %v3148_v17 = vld [vmem:[#allocation3 + $0x9] ss:$4 sm:$0xff]  ;;  %v6325_v6 = vpop.permute.xlu0 %3226 }
 0x4b8   : > { %v3051_v37 = vsel %vm6716_vm5, %v6105_v38, %v3019_v11  ;;  %3080 = vst.msk [vmem:[#allocation3 + $0xa8] sm:$0xff] %vm562_vm0, %v3046_v4  ;;  %3081 = vst.msk [vmem:[#allocation3 + $0xb0] sm:$0xff] %vm562_vm0, %v3047_v18  ;;  %v3052_v39 = vsel %vm2988_vm11, %v6107_v27, %v3020_v43  ;;  %v3053_v47 = vsel %vm2989_vm14, %v6109_v58, %v3021_v0  ;;  %v3305_v27 = vld [vmem:[%s6688_s6 + $0x20] sm:$0xff]  ;;  %v3306_v58 = vld [vmem:[%s6688_s6 + $0x28] sm:$0xff]  ;;  %vm6717_vm11 = vcmask 130048  }
 0x4b9   : > { %v3054_v44 = vsel %vm2990_vm13, %v6111_v31, %v3022_v34  ;;  %v3055_v38 = vsel %vm2991_vm1, %v6113_v59, %v3023_v9  ;;  %3082 = vst.msk [vmem:[#allocation3 + $0xb8] sm:$0xff] %vm562_vm0, %v3048_v25  ;;  %3083 = vst.msk [vmem:[#allocation3 + $0xc0] sm:$0xff] %vm562_vm0, %v3049_v15  ;;  %v3057_v31 = vsel %vm2993_vm4, %v6115_v13, %v3025_v42  ;;  %v3307_v13 = vld [vmem:[%s6688_s6 + $0x30] sm:$0xff]  ;;  %v3302_v22 = vld [vmem:[%s6688_s6 + $0x8] sm:$0xff]  ;;  %vm3291_vm13 = vcmask 195584  }
 0x4ba   : > { %3084 = vst.msk [vmem:[#allocation3 + $0xc8] sm:$0xff] %vm562_vm0, %v3050_v7  ;;  %3085 = vst.msk [vmem:[#allocation3 + $0xd0] sm:$0xff] %vm562_vm0, %v3051_v37  ;;  %v4827_v59 = vpack.c.bf16 %v3306_v58, %v3305_v27  ;;  %v3116_v46 = vld [vmem:[#allocation3 + $0x47] ss:$4 sm:$0xff]  ;;  %v3134_v33 = vld [vmem:[#allocation3 + $0x48] ss:$4 sm:$0xff]  ;;  %v4831_v28 = vpack.c.bf16 %v3308_v36, %v3307_v13  ;;  %v6313_v52 = vpack.c.bf16 %v3302_v22, %v3301_v54 }
 0x4bb   : > { %3086 = vst.msk [vmem:[#allocation3 + $0xd8] sm:$0xff] %vm562_vm0, %v3052_v39  ;;  %3087 = vst.msk [vmem:[#allocation3 + $0xe0] sm:$0xff] %vm562_vm0, %v3053_v47  ;;  %3178 = vrot.lane.b32.xlu0 %v3116_v46, %s5010_s23  ;;  %3214 = vrot.lane.b32.xlu1 %v3134_v33, %s5012_s1  ;;  %v3152_v10 = vld [vmem:[#allocation3 + $0x49] ss:$4 sm:$0xff]  ;;  %v3096_v40 = vld [vmem:[#allocation3 + $0x26] ss:$4 sm:$0xff] }
 0x4bc   : > { %3088 = vst.msk [vmem:[#allocation3 + $0xe8] sm:$0xff] %vm562_vm0, %v3054_v44  ;;  %3089 = vst.msk [vmem:[#allocation3 + $0xf0] sm:$0xff] %vm562_vm0, %v3055_v38  ;;  %4828 = vmatprep.subr.bf16.mxu1 %v4827_v59  ;;  %v3118_v35 = vld [vmem:[#allocation3 + $0x67] ss:$4 sm:$0xff]  ;;  %v3136_v5 = vld [vmem:[#allocation3 + $0x68] ss:$4 sm:$0xff] }
 0x4bd   : > { %3091 = vst.msk [vmem:[#allocation3 + $0x100] sm:$0xff] %vm562_vm0, %v3057_v31  ;;  %4830 = vmatpush3.bf16.msra.mxu1 %v4827_v59  ;;  %v3154_v51 = vld [vmem:[#allocation3 + $0x69] ss:$4 sm:$0xff]  ;;  %v3094_v12 = vld [vmem:[#allocation3 + $0x6] ss:$4 sm:$0xff]  ;;  %vm6718_vm14 = vmmov %vm6717_vm11  ;;  %vm3335_vm1 = vcmask 261120  }
 0x4be   : > { %4832 = vmatprep.subr.bf16.mxu1 %v4831_v28  ;;  %v3120_v30 = vld [vmem:[#allocation3 + $0x87] ss:$4 sm:$0xff]  ;;  %v3138_v57 = vld [vmem:[#allocation3 + $0x88] ss:$4 sm:$0xff]  ;;  %v3156_v50 = vld [vmem:[#allocation3 + $0x89] ss:$4 sm:$0xff] }
 0x4bf   : > { %3212 = vrot.lane.b32.xlu0 %v3132_v29, %s5012_s1  ;;  %3248 = vrot.lane.b32.xlu1 %v3150_v63, %s5013_s20  ;;  %v3164_v41 = vld [vmem:[#allocation3 + $0x109] ss:$4 sm:$0x1]  ;;  %v3098_v24 = vld [vmem:[#allocation3 + $0x46] ss:$4 sm:$0xff]  ;;  %vm6719_vm2 = vmmov %vm6717_vm11  ;;  %vm6720_vm3 = vcmask 1046528  }
 0x4c0   : > { %v3122_v14 = vld [vmem:[#allocation3 + $0xa7] ss:$4 sm:$0xff]  ;;  %v3140_v8 = vld [vmem:[#allocation3 + $0xa8] ss:$4 sm:$0xff]  ;;  %v3158_v26 = vld [vmem:[#allocation3 + $0xa9] ss:$4 sm:$0xff] }
 0x4c1   : > { %4834 = vmatpush3.bf16.msra.mxu1 %v4831_v28  ;;  %v3303_v47 = vld [vmem:[%s6688_s6 + $0x10] sm:$0xff]  ;;  %v3304_v44 = vld [vmem:[%s6688_s6 + $0x18] sm:$0xff]  ;;  %vm6721_vm4 = vmmov %vm6720_vm3 }
 0x4c2   : > { %v3124_v23 = vld [vmem:[#allocation3 + $0xc7] ss:$4 sm:$0xff]  ;;  %4836 = vmatprep.subr.bf16.mxu1 %v6313_v52  ;;  %v3142_v56 = vld [vmem:[#allocation3 + $0xc8] ss:$4 sm:$0xff]  ;;  %v3160_v45 = vld [vmem:[#allocation3 + $0xc9] ss:$4 sm:$0xff]  ;;  %v4839_v31 = vpack.c.bf16 %v3304_v44, %v3303_v47 }
 0x4c3   : > { %3246 = vrot.lane.b32.xlu0 %v3148_v17, %s5013_s20  ;;  %3180 = vrot.lane.b32.xlu1 %v3118_v35, %s5010_s23  ;;  %v3100_v58 = vld [vmem:[#allocation3 + $0x66] ss:$4 sm:$0xff]  ;;  %vm6722_vm9 = vmmov %vm6719_vm2 }
 0x4c4   : > { %v3126_v60 = vld [vmem:[#allocation3 + $0xe7] ss:$4 sm:$0xff]  ;;  %v3144_v21 = vld [vmem:[#allocation3 + $0xe8] ss:$4 sm:$0xff]  ;;  %v3162_v1 = vld [vmem:[#allocation3 + $0xe9] ss:$4 sm:$0xff] }
 0x4c5   : > { %v3128_v49 = vld [vmem:[#allocation3 + $0x107] ss:$4 sm:$0x1]  ;;  %vm6723_vm10 = vmmov %vm6720_vm3 }
 0x4c6   : > { %vm6724_vm6 = vmmov %vm6719_vm2 }
 0x4c7   : > { %3250 = vrot.lane.b32.xlu0 %v3152_v10, %s5013_s20  ;;  %3216 = vrot.lane.b32.xlu1 %v3136_v5, %s5012_s1  ;;  %v3102_v10 = vld [vmem:[#allocation3 + $0x86] ss:$4 sm:$0xff]  ;;  %vm6725_vm15 = vmmov %vm6720_vm3 }
 0x4c8   : > { %vm6726_vm7 = vmmov %vm6719_vm2 }
 0x4c9   : > { %vm6727_vm8 = vmmov %vm6720_vm3 }
 0x4ca   : > { %vm6728_vm12 = vmmov %vm6719_vm2 }
 0x4cb   : > { %3182 = vrot.lane.b32.xlu0 %v3120_v30, %s5010_s23  ;;  %3252 = vrot.lane.b32.xlu1 %v3154_v51, %s5013_s20  ;;  %vm6729_vm5 = vmmov %vm6720_vm3 }
 0x4cf   : > { %3218 = vrot.lane.b32.xlu0 %v3138_v57, %s5012_s1  ;;  %3184 = vrot.lane.b32.xlu1 %v3122_v14, %s5010_s23 }
 0x4d3   : > { %3254 = vrot.lane.b32.xlu0 %v3156_v50, %s5013_s20  ;;  %3220 = vrot.lane.b32.xlu1 %v3140_v8, %s5012_s1  ;;  %v3104_v8 = vld [vmem:[#allocation3 + $0xa6] ss:$4 sm:$0xff] }
 0x4d7   : > { %3186 = vrot.lane.b32.xlu0 %v3124_v23, %s5010_s23  ;;  %3256 = vrot.lane.b32.xlu1 %v3158_v26, %s5013_s20 }
 0x4db   : > { %3222 = vrot.lane.b32.xlu0 %v3142_v56, %s5012_s1  ;;  %3188 = vrot.lane.b32.xlu1 %v3126_v60, %s5010_s23 }
 0x4df   : > { %3258 = vrot.lane.b32.xlu0 %v3160_v45, %s5013_s20  ;;  %3224 = vrot.lane.b32.xlu1 %v3144_v21, %s5012_s1 }
 0x4e3   : > { %3190 = vrot.lane.b32.xlu0 %v3128_v49, %s5010_s23  ;;  %3260 = vrot.lane.b32.xlu1 %v3162_v1, %s5013_s20  ;;  %v3106_v1 = vld [vmem:[#allocation3 + $0xc6] ss:$4 sm:$0xff]  ;;  %s5015_s23 = smov 48  }
 0x4e7   : > { %3262 = vrot.lane.b32.xlu0 %v3164_v41, %s5013_s20 }
 0x520   : > { %v3177_v11 = vpop.permute.xlu1 %3176 }
 0x521   : > { %v3274_v9 = vsel %vm562_vm0, %v3096_v40, %v3177_v11  ;;  %v3108_v40 = vld [vmem:[#allocation3 + $0xe6] ss:$4 sm:$0xff] }
 0x527   : > { %v3175_v62 = vpop.permute.xlu0 %3174  ;;  %v3211_v43 = vpop.permute.xlu1 %3210 }
 0x528   : > { %v3273_v53 = vsel %vm562_vm0, %v3094_v12, %v3175_v62 }
 0x529   : > { %v3282_v48 = vsel %vm6718_vm14, %v3273_v53, %v3211_v43  ;;  %vm6731_vm14 = vmmov %vm6719_vm2 }
 0x52d   : > { %v3179_v0 = vpop.permute.xlu0 %3178  ;;  %v3215_v34 = vpop.permute.xlu1 %3214 }
 0x52e   : > { %v3275_v15 = vsel %vm562_vm0, %v3098_v24, %v3179_v0 }
 0x52f   : > { %v3284_v7 = vsel %vm6719_vm2, %v3275_v15, %v3215_v34 }
 0x531   : > { %v3213_v42 = vpop.permute.xlu0 %3212  ;;  %v3249_v55 = vpop.permute.xlu1 %3248 }
 0x532   : > { %v3283_v3 = vsel %vm6717_vm11, %v3274_v9, %v3213_v42  ;;  %v3110_v42 = vld [vmem:[#allocation3 + $0x106] ss:$4 sm:$0x1]  ;;  %vm6730_vm11 = vmmov %vm6719_vm2 }
 0x533   : > { %v6330_v61 = vsel %vm3291_vm13, %v3283_v3, %v3249_v55  ;;  %vm6732_vm2 = vmmov %vm6720_vm3 }
 0x534   : > { %v3319_v16 = vrot.slane %v6330_v61, 1 }
 0x535   : > { %v3247_v20 = vpop.permute.xlu0 %3246  ;;  %v3181_v18 = vpop.permute.xlu1 %3180 }
 0x536   : > { %v6336_v4 = vsel %vm3291_vm13, %v3282_v48, %v3247_v20  ;;  %v3276_v59 = vsel %vm562_vm0, %v3100_v58, %v3181_v18 }
 0x537   : > { %v3318_v25 = vrot.slane %v6336_v4, 1 }
 0x539   : > { %v3251_v37 = vpop.permute.xlu0 %3250  ;;  %v3320_v39 = vsel %vm6720_vm3, %v3318_v25, %v3319_v16  ;;  %v3217_v19 = vpop.permute.xlu1 %3216  ;;  %vm6733_vm3 = vmmov %vm6732_vm2 }
 0x53a   : > { %v6349_v38 = vsel %vm3291_vm13, %v3284_v7, %v3251_v37  ;;  %4679 = vmatprep.mubr.msk.f32.mxu1 %vm3335_vm1, %v3320_v39  ;;  %v3285_v13 = vsel %vm6722_vm9, %v3276_v59, %v3217_v19 }
 0x53b   : > { %v3321_v27 = vrot.slane %v6349_v38, 1 }
 0x53d   : > { %v3183_v46 = vpop.permute.xlu0 %3182  ;;  %v3322_v33 = vsel %vm6721_vm4, %v3319_v16, %v3321_v27  ;;  %v3253_v36 = vpop.permute.xlu1 %3252  ;;  %vm6735_vm4 = vmmov %vm6724_vm6 }
 0x53e   : > { %4680 = vmatmul.mubr.msk.f32.vlgmr.msra.gmra.mrb[6].mxu1 %vm3335_vm1, %v3322_v33  ;;  %v3295_v28 = vsel %vm3291_vm13, %v3285_v13, %v3253_v36  ;;  %v3277_v5 = vsel %vm562_vm0, %v3102_v10, %v3183_v46  ;;  %vm6736_vm9 = vmmov %vm6735_vm4 }
 0x53f   : > { %4838 = vmatpush3.bf16.msra.mxu1 %v6313_v52  ;;  %v3323_v29 = vrot.slane %v3295_v28, 1 }
 0x540   : > { %4840 = vmatprep.subr.bf16.mxu1 %v4839_v31 }
 0x541   : > { %v3219_v63 = vpop.permute.xlu0 %3218  ;;  %v3185_v17 = vpop.permute.xlu1 %3184  ;;  %v3324_v35 = vsel %vm6723_vm10, %v3321_v27, %v3323_v29  ;;  %vm6737_vm10 = vmmov %vm6735_vm4 }
 0x542   : > { %4682 = vmatprep.mubr.msk.f32.mxu1 %vm3335_vm1, %v3324_v35  ;;  %v3286_v30 = vsel %vm6724_vm6, %v3277_v5, %v3219_v63  ;;  %v3278_v54 = vsel %vm562_vm0, %v3104_v8, %v3185_v17 }
 0x543   : > { %4842 = vmatpush3.bf16.msra.mxu1 %v4839_v31 }
 0x545   : > { %v3255_v51 = vpop.permute.xlu0 %3254  ;;  %v3221_v14 = vpop.permute.xlu1 %3220 }
 0x546   : > { %v3296_v57 = vsel %vm3291_vm13, %v3286_v30, %v3255_v51  ;;  %v3287_v23 = vsel %vm6726_vm7, %v3278_v54, %v3221_v14  ;;  %vm6740_vm7 = vmmov %vm6735_vm4 }
 0x547   : > { %v3325_v50 = vrot.slane %v3296_v57, 1 }
 0x549   : > { %v3187_v22 = vpop.permute.xlu0 %3186  ;;  %v3326_v52 = vsel %vm6725_vm15, %v3323_v29, %v3325_v50  ;;  %v3257_v26 = vpop.permute.xlu1 %3256  ;;  %vm6739_vm15 = vmmov %vm6735_vm4 }
 0x54a   : > { %4683 = vmatmul.mubr.msk.f32.gmra.mrb[8].mxu1 %vm3335_vm1, %v3326_v52  ;;  %v3297_v56 = vsel %vm3291_vm13, %v3287_v23, %v3257_v26  ;;  %v3279_v41 = vsel %vm562_vm0, %v3106_v1, %v3187_v22 }
 0x54b   : > { %v3327_v60 = vrot.slane %v3297_v56, 1 }
 0x54d   : > { %v3223_v45 = vpop.permute.xlu0 %3222  ;;  %v3189_v21 = vpop.permute.xlu1 %3188  ;;  %v3328_v49 = vsel %vm6727_vm8, %v3325_v50, %v3327_v60  ;;  %vm6741_vm8 = vmmov %vm6735_vm4 }
 0x54e   : > { %4685 = vmatprep.mubr.msk.f32.mxu1 %vm3335_vm1, %v3328_v49  ;;  %v3288_v11 = vsel %vm6728_vm12, %v3279_v41, %v3223_v45  ;;  %v3280_v9 = vsel %vm562_vm0, %v3108_v40, %v3189_v21  ;;  %vm6742_vm12 = vmmov %vm6735_vm4 }
 0x551   : > { %v3259_v62 = vpop.permute.xlu0 %3258  ;;  %v3225_v0 = vpop.permute.xlu1 %3224 }
 0x552   : > { %v3298_v43 = vsel %vm3291_vm13, %v3288_v11, %v3259_v62  ;;  %v3289_v12 = vsel %vm6730_vm11, %v3280_v9, %v3225_v0  ;;  %vm6744_vm11 = vmmov %vm6735_vm4 }
 0x553   : > { %v3329_v34 = vrot.slane %v3298_v43, 1 }
 0x555   : > { %v3191_v3 = vpop.permute.xlu0 %3190  ;;  %v3330_v55 = vsel %vm6729_vm5, %v3327_v60, %v3329_v34  ;;  %v3261_v48 = vpop.permute.xlu1 %3260  ;;  %vm6743_vm5 = vmmov %vm6735_vm4 }
 0x556   : > { %v3281_v53 = vsel %vm562_vm0, %v3110_v42, %v3191_v3  ;;  %4686 = vmatmul.mubr.msk.f32.gmra.mrb[10].mxu1 %vm3335_vm1, %v3330_v55  ;;  %v3299_v16 = vsel %vm3291_vm13, %v3289_v12, %v3261_v48  ;;  %vm3692_vm0 = vcmask 123904  }
 0x557   : > { %v3331_v20 = vrot.slane %v3299_v16, 1  ;;  %v3290_v18 = vsel %vm6731_vm14, %v3281_v53, %v6325_v6  ;;  %3702 = vst.msk [vmem:[#allocation4 + $0x48] sm:$0x3] %vm3692_vm0, %v5007_v2  ;;  %3693 = vst.msk [vmem:[#allocation4 + $0x6] sm:$0x3] %vm3692_vm0, %v5007_v2 }
 0x558   : > { %vm6745_vm14 = vmmov %vm6735_vm4 }
 0x559   : > { %v3263_v24 = vpop.permute.xlu0 %3262  ;;  %v3332_v15 = vsel %vm6732_vm2, %v3329_v34, %v3331_v20  ;;  %vm6746_vm2 = vmmov %vm6735_vm4 }
 0x55a   : > { %v3300_v25 = vsel %vm3291_vm13, %v3290_v18, %v3263_v24  ;;  %4688 = vmatprep.mubr.msk.f32.mxu1 %vm3335_vm1, %v3332_v15  ;;  %vm6734_vm13 = vmmov %vm6724_vm6 }
 0x55b   : > { %v3333_v7 = vrot.slane %v3300_v25, 1  ;;  %vm6738_vm6 = vmmov %vm6735_vm4 }
 0x55c   : > { %vm6748_vm0 = vmmov %vm6746_vm2 }
 0x55d   : > { %v3334_v37 = vsel %vm6733_vm3, %v3331_v20, %v3333_v7  ;;  %vm6747_vm3 = vmmov %vm6746_vm2 }
 0x55e   : > { %4689 = vmatmul.mubr.msk.f32.gmra.mrb[12].mxu1 %vm3335_vm1, %v3334_v37  ;;  %v3720_v6 = vld [vmem:[#allocation4 + $0x48] ss:$4 sm:$0x1] }
 0x55f   : > { %4699 = vmatprep.mubr.msk.f32.mxu1 %vm3335_vm1, %v6336_v4  ;;  %3746 = vrot.lane.b32.xlu0 %v3720_v6, %s5014_s0 }
 0x562   : > { %4700 = vmatmul.mubr.msk.f32.vlgmr.msra.gmra.mrb[6].mxu1 %vm3335_vm1, %v6330_v61 }
 0x563   : > { %4702 = vmatprep.mubr.msk.f32.mxu1 %vm3335_vm1, %v6349_v38 }
 0x566   : > { %4703 = vmatmul.mubr.msk.f32.gmra.mrb[8].mxu1 %vm3335_vm1, %v3295_v28 }
 0x567   : > { %4705 = vmatprep.mubr.msk.f32.mxu1 %vm3335_vm1, %v3296_v57 }
 0x56a   : > { %4706 = vmatmul.mubr.msk.f32.gmra.mrb[10].mxu1 %vm3335_vm1, %v3297_v56 }
 0x56b   : > { %4708 = vmatprep.mubr.msk.f32.mxu1 %vm3335_vm1, %v3298_v43 }
 0x56e   : > { %4709 = vmatmul.mubr.msk.f32.gmra.mrb[12].mxu1 %vm3335_vm1, %v3299_v16 }
 0x635   : > { %v6401_v61 = vpop.f32.mrb[6].mxu1 }
 0x636   : > { %v3579_v4 = vsel %vm6734_vm13, %v6401_v61, 0.0  ;;  %v3601_v39 = vmul.f32 %v6401_v61, %v6401_v61  ;;  %v6407_v47 = vpop.f32.mrb[7].mxu1  ;;  %vm6749_vm13 = vmmov %vm6748_vm0 }
 0x637   : > { %v3578_v44 = vsel %vm6735_vm4, %v6407_v47, 0.0  ;;  %v3600_v38 = vmul.f32 %v6407_v47, %v6407_v47 }
 0x638   : > { %v3609_v19 = vsel %vm6736_vm9, %v3601_v39, 0.0  ;;  %v3580_v27 = vadd.f32 %v3579_v4, %v3578_v44  ;;  %v3633_v44 = vld [vmem:[%s6689_s7] sm:$0x1] }
 0x639   : > { %v3608_v58 = vsel %vm6737_vm10, %v3600_v38, 0.0  ;;  %v6415_v31 = vpop.f32.mrb[8].mxu1 }
 0x63a   : > { %v3610_v59 = vadd.f32 %v3609_v19, %v3608_v58  ;;  %v6417_v46 = vpop.f32.mrb[9].mxu1  ;;  %v3603_v33 = vmul.f32 %v6415_v31, %v6415_v31  ;;  %v3583_v29 = vsel %vm6739_vm15, %v6415_v31, 0.0 }
 0x63b   : > { %v3581_v13 = vsel %vm6738_vm6, %v6417_v46, 0.0  ;;  %v3602_v36 = vmul.f32 %v6417_v46, %v6417_v46 }
 0x63c   : > { %v3582_v28 = vadd.f32 %v3581_v13, %v3580_v27  ;;  %v3613_v30 = vsel %vm6741_vm8, %v3603_v33, 0.0  ;;  %v3637_v27 = vld [vmem:[%s6690_s8] sm:$0x1]  ;;  %vm6750_vm8 = vmmov %vm6748_vm0 }
 0x63d   : > { %v3611_v63 = vsel %vm6740_vm7, %v3602_v36, 0.0  ;;  %v4707_v17 = vpop.f32.mrb[10].mxu1 }
 0x63e   : > { %v3612_v35 = vadd.f32 %v3611_v63, %v3610_v59  ;;  %v3559_v10 = vpop.f32.mrb[11].mxu1  ;;  %v3584_v5 = vadd.f32 %v3583_v29, %v3582_v28  ;;  %v3605_v51 = vmul.f32 %v4707_v17, %v4707_v17  ;;  %v3587_v54 = vsel %vm6743_vm5, %v4707_v17, 0.0 }
 0x63f   : > { %v3585_v57 = vsel %vm6742_vm12, %v3559_v10, 0.0  ;;  %v3604_v14 = vmul.f32 %v3559_v10, %v3559_v10 }
 0x640   : > { %v3586_v50 = vadd.f32 %v3585_v57, %v3584_v5  ;;  %v3614_v8 = vadd.f32 %v3613_v30, %v3612_v35  ;;  %v3617_v60 = vsel %vm6745_vm14, %v3605_v51, 0.0  ;;  %vm6752_vm14 = vmmov %vm6748_vm0 }
 0x641   : > { %v3615_v22 = vsel %vm6744_vm11, %v3604_v14, 0.0  ;;  %v4710_v52 = vpop.f32.mrb[12].mxu1  ;;  %vm6751_vm11 = vmmov %vm6748_vm0 }
 0x642   : > { %v3616_v23 = vadd.f32 %v3615_v22, %v3614_v8  ;;  %v3569_v26 = vpop.f32.mrb[13].mxu1  ;;  %v3588_v56 = vadd.f32 %v3587_v54, %v3586_v50  ;;  %v3607_v45 = vmul.f32 %v4710_v52, %v4710_v52  ;;  %v3591_v11 = vsel %vm6747_vm3, %v4710_v52, 0.0  ;;  %vm6754_vm3 = vmmov %vm6748_vm0 }
 0x643   : > { %v3589_v21 = vsel %vm6746_vm2, %v3569_v26, 0.0  ;;  %v3606_v49 = vmul.f32 %v3569_v26, %v3569_v26  ;;  %vm6753_vm2 = vmmov %vm6748_vm0 }
 0x644   : > { %v3590_v1 = vadd.f32 %v3589_v21, %v3588_v56  ;;  %v3618_v41 = vadd.f32 %v3617_v60, %v3616_v23  ;;  %v3621_v34 = vsel %vm6749_vm13, %v3607_v45, 0.0  ;;  %v3781_v60 = vld [vmem:[%s6691_s9 + $0x40] sm:$0xff]  ;;  %v3782_v45 = vld [vmem:[%s6691_s9 + $0x48] sm:$0xff]  ;;  %vm6755_vm13 = vmmov %vm6748_vm0 }
 0x645   : > { %v3619_v62 = vsel %vm6748_vm0, %v3606_v49, 0.0 }
 0x646   : > { %v3592_v43 = vadd.f32 %v3591_v11, %v3590_v1  ;;  %v3620_v0 = vadd.f32 %v3619_v62, %v3618_v41  ;;  %v4843_v62 = vpack.c.bf16 %v3782_v45, %v3781_v60  ;;  %v3779_v45 = vld [vmem:[%s6691_s9 + $0x30] sm:$0xff] }
 0x648   : > { %v3593_v40 = vrot.slane %v3592_v43, 4  ;;  %v3622_v9 = vadd.f32 %v3621_v34, %v3620_v0  ;;  %4844 = vmatprep.subr.bf16.mxu1 %v4843_v62 }
 0x649   : > { %4846 = vmatpush3.bf16.msra.mxu1 %v4843_v62  ;;  %v5016_v62 = vmov 0.0|0.0  }
 0x64a   : > { %v3594_v42 = vadd.f32 %v3593_v40, %v3592_v43  ;;  %v3623_v3 = vrot.slane %v3622_v9, 4  ;;  %v3783_v40 = vld [vmem:[%s6691_s9 + $0x50] sm:$0xff] }
 0x64c   : > { %v3595_v55 = vrot.slane %v3594_v42, 2  ;;  %v3624_v12 = vadd.f32 %v3623_v3, %v3622_v9  ;;  %v3784_v9 = vld [vmem:[%s6691_s9 + $0x58] sm:$0xff] }
 0x64e   : > { %v3596_v53 = vadd.f32 %v3595_v55, %v3594_v42  ;;  %v3625_v48 = vrot.slane %v3624_v12, 2  ;;  %v4847_v42 = vpack.c.bf16 %v3784_v9, %v3783_v40  ;;  %v3785_v55 = vld [vmem:[%s6691_s9 + $0x60] sm:$0xff]  ;;  %v4060_v9 = vld [vmem:[%s6694_s12 + $0xa8] sm:$0xff] }
 0x64f   : > { %v4059_v40 = vld [vmem:[%s6694_s12 + $0xa0] sm:$0xff] }
 0x650   : > { %v3597_v16 = vrot.slane %v3596_v53, 1  ;;  %v3626_v20 = vadd.f32 %v3625_v48, %v3624_v12  ;;  %4848 = vmatprep.subr.bf16.mxu1 %v4847_v42  ;;  %v3786_v12 = vld [vmem:[%s6691_s9 + $0x68] sm:$0xff] }
 0x651   : > { %4850 = vmatpush3.bf16.msra.mxu1 %v4847_v42  ;;  %v4851_v48 = vpack.c.bf16 %v3786_v12, %v3785_v55  ;;  %v4882_v42 = vpack.c.bf16 %v4060_v9, %v4059_v40  ;;  %v4062_v55 = vld [vmem:[%s6694_s12 + $0xb8] sm:$0xff] }
 0x652   : > { %v3598_v18 = vadd.f32 %v3597_v16, %v3596_v53  ;;  %v3627_v24 = vrot.slane %v3626_v20, 1 }
 0x653   : > { %4852 = vmatprep.subr.bf16.mxu1 %v4851_v48 }
 0x654   : > { %v3599_v25 = vmul.f32 0.015625, %v3598_v18  ;;  %v3628_v15 = vadd.f32 %v3627_v24, %v3626_v20  ;;  %v3787_v20 = vld [vmem:[%s6691_s9 + $0x70] sm:$0xff]  ;;  %v3788_v18 = vld [vmem:[%s6691_s9 + $0x78] sm:$0xff] }
 0x655   : > { %v4855_v24 = vpack.c.bf16 %v3788_v18, %v3787_v20  ;;  %4854 = vmatpush3.bf16.msra.mxu1 %v4851_v48  ;;  %v4064_v48 = vld [vmem:[%s6694_s12 + $0xc8] sm:$0xff]  ;;  %v4065_v20 = vld [vmem:[%s6694_s12 + $0xd0] sm:$0xff]  ;;  %v4066_v18 = vld [vmem:[%s6694_s12 + $0xd8] sm:$0xff] }
 0x656   : > { %v3629_v7 = vmul.f32 0.015625, %v3628_v15  ;;  %v3630_v37 = vmul.f32 %v3599_v25, %v3599_v25 }
 0x657   : > { %4856 = vmatprep.subr.bf16.mxu1 %v4855_v24 }
 0x658   : > { %v3631_v6 = vsub.f32 %v3629_v7, %v3630_v37  ;;  %v3773_v7 = vld [vmem:[%s6691_s9] sm:$0xff]  ;;  %v3774_v37 = vld [vmem:[%s6691_s9 + $0x8] sm:$0xff] }
 0x659   : > { %4858 = vmatpush3.bf16.msra.mxu1 %v4855_v24  ;;  %v4891_v24 = vpack.c.bf16 %v4066_v18, %v4065_v20  ;;  %v4040_v20 = vld [vmem:[%s6694_s12 + $0x8] sm:$0xff] }
 0x65a   : > { %v3632_v4 = vmax.f32 %v3631_v6, 0.0 }
 0x65c   : > { %v3634_v39 = vadd.f32 1e-05, %v3632_v4  ;;  %v4859_v4 = vpack.c.bf16 %v3774_v37, %v3773_v7 }
 0x65e   : > { %4993 = vrsqrt.f32 %v3634_v39  ;;  %4860 = vmatprep.subr.bf16.mxu1 %v4859_v4 }
 0x668   : > { %v4994_v38 = vpop.eup %4993 }
 0x669   : > { %v3636_v19 = vmul.f32 %v4994_v38, %v3633_v44  ;;  %v3726_v44 = vld [vmem:[#allocation4 + $0x49] ss:$4 sm:$0x1]  ;;  %v3747_v38 = vpop.permute.xlu0 %3746 }
 0x66b   : > { %v3638_v58 = vmul.f32 %v3636_v19, %v3599_v25  ;;  %v3644_v59 = vrot.slane %v3636_v19, %v6026_v32 }
 0x66d   : > { %v3639_v33 = vsub.f32 %v3637_v27, %v3638_v58  ;;  %v3652_v13 = vmul.f32 %v3644_v59, %v3569_v26  ;;  %v3649_v36 = vmul.f32 %v6415_v31, %v3644_v59  ;;  %v3650_v28 = vmul.f32 %v3644_v59, %v3559_v10 }
 0x66e   : > { %v3651_v29 = vmul.f32 %v4707_v17, %v3644_v59  ;;  %v3653_v63 = vmul.f32 %v4710_v52, %v3644_v59  ;;  %v3646_v35 = vmul.f32 %v3644_v59, %v6407_v47  ;;  %v3647_v5 = vmul.f32 %v6401_v61, %v3644_v59 }
 0x66f   : > { %v3658_v30 = vrot.slane %v3639_v33, %v6026_v32  ;;  %v3648_v51 = vmul.f32 %v3644_v59, %v6417_v46 }
 0x671   : > { %v3666_v57 = vadd.f32 %v3658_v30, %v3652_v13  ;;  %v3663_v14 = vadd.f32 %v3658_v30, %v3649_v36  ;;  %v3664_v50 = vadd.f32 %v3658_v30, %v3650_v28  ;;  %v3665_v8 = vadd.f32 %v3658_v30, %v3651_v29 }
 0x672   : > { %v3667_v54 = vadd.f32 %v3658_v30, %v3653_v63  ;;  %v3660_v22 = vadd.f32 %v3658_v30, %v3646_v35  ;;  %v3661_v23 = vadd.f32 %v3658_v30, %v3647_v5  ;;  %v3662_v26 = vadd.f32 %v3658_v30, %v3648_v51 }
 0x673   : > { %vm3674_vm4 = vcmp.gt.f32.partialorder %v3666_v57, 0.0  ;;  %v3682_v31 = vmul.f32 0.2, %v3666_v57  ;;  %vm3671_vm9 = vcmp.gt.f32.partialorder %v3663_v14, 0.0  ;;  %vm3672_vm10 = vcmp.gt.f32.partialorder %v3664_v50, 0.0 }
 0x674   : > { %vm3673_vm6 = vcmp.gt.f32.partialorder %v3665_v8, 0.0  ;;  %vm3675_vm15 = vcmp.gt.f32.partialorder %v3667_v54, 0.0  ;;  %v3679_v47 = vmul.f32 0.2, %v3663_v14  ;;  %v3680_v61 = vmul.f32 0.2, %v3664_v50 }
 0x675   : > { %v3690_v17 = vsel %vm3674_vm4, %v3666_v57, %v3682_v31  ;;  %v3681_v10 = vmul.f32 0.2, %v3665_v8  ;;  %v3683_v52 = vmul.f32 0.2, %v3667_v54  ;;  %vm3668_vm7 = vcmp.gt.f32.partialorder %v3660_v22, 0.0  ;;  %vm6756_vm4 = vmmov %vm6748_vm0  ;;  %v3775_v31 = vld [vmem:[%s6691_s9 + $0x10] sm:$0xff] }
 0x676   : > { %3700 = vst.msk [vmem:[#allocation4 + $0x38] sm:$0xff] %vm6750_vm8, %v3690_v17  ;;  %v3687_v46 = vsel %vm3671_vm9, %v3663_v14, %v3679_v47  ;;  %v3688_v56 = vsel %vm3672_vm10, %v3664_v50, %v3680_v61  ;;  %vm3669_vm12 = vcmp.gt.f32.partialorder %v3661_v23, 0.0  ;;  %vm3670_vm5 = vcmp.gt.f32.partialorder %v3662_v26, 0.0  ;;  %vm6757_vm9 = vmmov %vm6748_vm0  ;;  %v3776_v47 = vld [vmem:[%s6691_s9 + $0x18] sm:$0xff] }
 0x677   : > { %v3689_v21 = vsel %vm3673_vm6, %v3665_v8, %v3681_v10  ;;  %v3691_v49 = vsel %vm3675_vm15, %v3667_v54, %v3683_v52  ;;  %3697 = vst.msk [vmem:[#allocation4 + $0x20] sm:$0xff] %vm6751_vm11, %v3687_v46  ;;  %v3676_v1 = vmul.f32 0.2, %v3660_v22  ;;  %v3677_v41 = vmul.f32 0.2, %v3661_v23  ;;  %vm6758_vm6 = vmmov %vm6748_vm0  ;;  %v3777_v46 = vld [vmem:[%s6691_s9 + $0x20] sm:$0xff] }
 0x678   : > { %3698 = vst.msk [vmem:[#allocation4 + $0x28] sm:$0xff] %vm6752_vm14, %v3688_v56  ;;  %v3678_v11 = vmul.f32 0.2, %v3662_v26  ;;  %vm3769_vm10 = vcmask 392192   ;;  %vm6759_vm15 = vmmov %vm6748_vm0  ;;  %vm6760_vm8 = vcmask 1046528   ;;  %v4863_v10 = vpack.c.bf16 %v3776_v47, %v3775_v31  ;;  %v3778_v56 = vld [vmem:[%s6691_s9 + $0x28] sm:$0xff] }
 0x679   : > { %3699 = vst.msk [vmem:[#allocation4 + $0x30] sm:$0xff] %vm6753_vm2, %v3689_v21  ;;  %v3684_v43 = vsel %vm3668_vm7, %v3660_v22, %v3676_v1  ;;  %v3685_v0 = vsel %vm3669_vm12, %v3661_v23, %v3677_v41  ;;  %vm3797_vm7 = vcmask 523264   ;;  %vm6761_vm12 = vmmov %vm6760_vm8  ;;  %v4867_v60 = vpack.c.bf16 %v3778_v56, %v3777_v46  ;;  %v3780_v21 = vld [vmem:[%s6691_s9 + $0x38] sm:$0xff]  ;;  %v4055_v1 = vld [vmem:[%s6694_s12 + $0x80] sm:$0xff] }
 0x67a   : > { %3701 = vst.msk [vmem:[#allocation4 + $0x40] sm:$0xff] %vm6754_vm3, %v3691_v49  ;;  %v3686_v34 = vsel %vm3670_vm5, %v3662_v26, %v3678_v11  ;;  %v4871_v49 = vpack.c.bf16 %v3780_v21, %v3779_v45  ;;  %vm4010_vm5 = vcmask 254976   ;;  %v4056_v41 = vld [vmem:[%s6694_s12 + $0x88] sm:$0xff]  ;;  %v4057_v11 = vld [vmem:[%s6694_s12 + $0x90] sm:$0xff]  ;;  %v3981_v31 = vld [vmem:[%s6692_s10] sm:$0x1] }
 0x67b   : > { %3694 = vst.msk [vmem:[#allocation4 + $0x8] sm:$0xff] %vm6748_vm0, %v3684_v43  ;;  %v4876_v43 = vpack.c.bf16 %v4056_v41, %v4055_v1  ;;  %v4069_v1 = vld [vmem:[%s6694_s12 + $0xf0] sm:$0xff]  ;;  %v4070_v41 = vld [vmem:[%s6694_s12 + $0xf8] sm:$0xff]  ;;  %vm5017_vm2 = vmmov 0   ;;  %vm4037_vm3 = vcmask 785408  }
 0x67c   : > { %3695 = vst.msk [vmem:[#allocation4 + $0x10] sm:$0xff] %vm6755_vm13, %v3685_v0  ;;  %v4058_v0 = vld [vmem:[%s6694_s12 + $0x98] sm:$0xff]  ;;  %vm4274_vm13 = vcmask 0  }
 0x67d   : > { %3696 = vst.msk [vmem:[#allocation4 + $0x18] sm:$0xff] %vm6756_vm4, %v3686_v34  ;;  %v4879_v34 = vpack.c.bf16 %v4058_v0, %v4057_v11  ;;  %v4897_v11 = vpack.c.bf16 %v4070_v41, %v4069_v1 }
 0x67e   : > { %4014 = vst.msk [vmem:[#allocation5 + $0x18] sm:$0x3] %vm4010_vm5, %v5007_v2  ;;  %4011 = vst.msk [vmem:[#allocation5 + $0x6] sm:$0x3] %vm4010_vm5, %v5007_v2 }
 0x681   : > { %v3712_v3 = vld [vmem:[#allocation4 + $0x27] ss:$4 sm:$0xff]  ;;  %v3724_v15 = vld [vmem:[#allocation4 + $0x29] ss:$4 sm:$0xff]  ;;  %v3718_v6 = vld [vmem:[#allocation4 + $0x28] ss:$4 sm:$0xff] }
 0x682   : > { %3732 = vrot.lane.b32.xlu0 %v3712_v3, %s5012_s1  ;;  %v3714_v25 = vld [vmem:[#allocation4 + $0x47] ss:$4 sm:$0x1]  ;;  %v3706_v33 = vld [vmem:[#allocation4 + $0x26] ss:$4 sm:$0xff] }
 0x683   : > { %v3708_v30 = vld [vmem:[#allocation4 + $0x46] ss:$4 sm:$0x1]  ;;  %v4061_v3 = vld [vmem:[%s6694_s12 + $0xb0] sm:$0xff] }
 0x684   : > { %v3710_v53 = vld [vmem:[#allocation4 + $0x7] ss:$4 sm:$0xff]  ;;  %v3716_v16 = vld [vmem:[#allocation4 + $0x8] ss:$4 sm:$0xff]  ;;  %v3722_v39 = vld [vmem:[#allocation4 + $0x9] ss:$4 sm:$0xff]  ;;  %v4885_v12 = vpack.c.bf16 %v4062_v55, %v4061_v3 }
 0x685   : > { %3730 = vrot.lane.b32.xlu1 %v3710_v53, %s5012_s1  ;;  %v3704_v63 = vld [vmem:[#allocation4 + $0x6] ss:$4 sm:$0xff] }
 0x686   : > { %3742 = vrot.lane.b32.xlu0 %v3716_v16, %s5014_s0  ;;  %v4063_v53 = vld [vmem:[%s6694_s12 + $0xc0] sm:$0xff] }
 0x687   : > { %v4888_v16 = vpack.c.bf16 %v4064_v48, %v4063_v53 }
 0x689   : > { %3734 = vrot.lane.b32.xlu1 %v3714_v25, %s5012_s1  ;;  %v4067_v25 = vld [vmem:[%s6694_s12 + $0xe0] sm:$0xff] }
 0x68a   : > { %3756 = vrot.lane.b32.xlu0 %v3724_v15, %s5015_s23  ;;  %v4068_v15 = vld [vmem:[%s6694_s12 + $0xe8] sm:$0xff] }
 0x68b   : > { %v4894_v7 = vpack.c.bf16 %v4068_v15, %v4067_v25 }
 0x68d   : > { %3744 = vrot.lane.b32.xlu1 %v3718_v6, %s5014_s0 }
 0x691   : > { %3754 = vrot.lane.b32.xlu1 %v3722_v39, %s5015_s23 }
 0x695   : > { %3758 = vrot.lane.b32.xlu1 %v3726_v44, %s5015_s23 }
 0x6f4   : > { %v3733_v19 = vpop.permute.xlu0 %3732 }
 0x6f5   : > { %v3764_v13 = vsel %vm6757_vm9, %v3706_v33, %v3733_v19 }
 0x6f7   : > { %v3731_v27 = vpop.permute.xlu1 %3730 }
 0x6f8   : > { %v3743_v58 = vpop.permute.xlu0 %3742  ;;  %v3763_v35 = vsel %vm6758_vm6, %v3704_v63, %v3731_v27 }
 0x6f9   : > { %v3766_v51 = vsel %vm3335_vm1, %v3763_v35, %v3743_v58 }
 0x6fb   : > { %v3735_v59 = vpop.permute.xlu1 %3734 }
 0x6fc   : > { %v3757_v28 = vpop.permute.xlu0 %3756  ;;  %v3765_v14 = vsel %vm6759_vm15, %v3708_v30, %v3735_v59 }
 0x6fd   : > { %v3768_v23 = vsel %vm3335_vm1, %v3765_v14, %v3747_v38 }
 0x6ff   : > { %v3745_v36 = vpop.permute.xlu1 %3744 }
 0x700   : > { %v3767_v29 = vsel %vm3335_vm1, %v3764_v13, %v3745_v36 }
 0x701   : > { %v3771_v5 = vsel %vm3769_vm10, %v3767_v29, %v3757_v28 }
 0x702   : > { %v3793_v8 = vrot.slane %v3771_v5, 1 }
 0x703   : > { %v3755_v57 = vpop.permute.xlu1 %3754 }
 0x704   : > { %v3770_v50 = vsel %vm3769_vm10, %v3766_v51, %v3755_v57 }
 0x705   : > { %v3792_v54 = vrot.slane %v3770_v50, 1 }
 0x707   : > { %v3759_v22 = vpop.permute.xlu1 %3758  ;;  %v3794_v26 = vsel %vm6760_vm8, %v3792_v54, %v3793_v8 }
 0x708   : > { %v3772_v61 = vsel %vm3769_vm10, %v3768_v23, %v3759_v22  ;;  %4727 = vmatprep.mubr.msk.f32.mxu1 %vm3797_vm7, %v3794_v26 }
 0x709   : > { %v3795_v17 = vrot.slane %v3772_v61, 1 }
 0x70b   : > { %v3796_v52 = vsel %vm6761_vm12, %v3793_v8, %v3795_v17  ;;  %v3985_v17 = vld [vmem:[%s6693_s11] sm:$0x1] }
 0x70c   : > { %4728 = vmatmul.mubr.msk.f32.vlgmr.msra.gmra.mrb[14].mxu1 %vm3797_vm7, %v3796_v52 }
 0x70d   : > { %4862 = vmatpush3.bf16.msra.mxu1 %v4859_v4  ;;  %4746 = vmatprep.mubr.msk.f32.mxu1 %vm3797_vm7, %v3770_v50 }
 0x70e   : > { %4864 = vmatprep.subr.bf16.mxu1 %v4863_v10 }
 0x711   : > { %4866 = vmatpush3.bf16.msra.mxu1 %v4863_v10 }
 0x712   : > { %4868 = vmatprep.subr.bf16.mxu1 %v4867_v60 }
 0x715   : > { %4870 = vmatpush3.bf16.msra.mxu1 %v4867_v60 }
 0x716   : > { %4872 = vmatprep.subr.bf16.mxu1 %v4871_v49 }
 0x719   : > { %4874 = vmatpush3.bf16.msra.mxu1 %v4871_v49 }
 0x71a   : > { %4875 = vmatprep.subr.bf16.mxu1 %v5016_v62 }
 0x71c   : > { %4747 = vmatmul.mubr.msk.f32.vlgmr.msra.gmra.mrb[14].mxu1 %vm3797_vm7, %v3771_v5 }
 0x71d   : > { %4877 = vmatpush3.bf16.msra.mxu1 %v4876_v43  ;;  %4781 = vmatprep.mubr.msk.f32.mxu1 %vm5017_vm2, %v5007_v2 }
 0x71e   : > { %4878 = vmatprep.subr.bf16.mxu1 %v5016_v62 }
 0x721   : > { %4880 = vmatpush3.bf16.msra.mxu1 %v4879_v34 }
 0x722   : > { %4881 = vmatprep.subr.bf16.mxu1 %v5016_v62 }
 0x725   : > { %4883 = vmatpush3.bf16.msra.mxu1 %v4882_v42 }
 0x726   : > { %4884 = vmatprep.subr.bf16.mxu1 %v5016_v62 }
 0x729   : > { %4886 = vmatpush3.bf16.msra.mxu1 %v4885_v12 }
 0x72a   : > { %4887 = vmatprep.subr.bf16.mxu1 %v5016_v62 }
 0x72d   : > { %4889 = vmatpush3.bf16.msra.mxu1 %v4888_v16  ;;  %v4039_v16 = vld [vmem:[%s6694_s12] sm:$0xff] }
 0x72e   : > { %4890 = vmatprep.subr.bf16.mxu1 %v5016_v62  ;;  %v4900_v15 = vpack.c.bf16 %v4040_v20, %v4039_v16 }
 0x731   : > { %4892 = vmatpush3.bf16.msra.mxu1 %v4891_v24 }
 0x732   : > { %4893 = vmatprep.subr.bf16.mxu1 %v5016_v62 }
 0x735   : > { %4895 = vmatpush3.bf16.msra.mxu1 %v4894_v7 }
 0x736   : > { %4896 = vmatprep.subr.bf16.mxu1 %v5016_v62 }
 0x739   : > { %4898 = vmatpush3.bf16.msra.mxu1 %v4897_v11  ;;  %v4235_v11 = vld [vmem:[%s6695_s13] sm:$0x1] }
 0x73a   : > { %4899 = vmatprep.subr.bf16.mxu1 %v5016_v62 }
 0x7ef   : > { %v4748_v37 = vpop.f32.mrb[14].mxu1 }
 0x7f0   : > { %v3957_v6 = vsel %vm3335_vm1, %v4748_v37, 0.0  ;;  %v3967_v4 = vmul.f32 %v4748_v37, %v4748_v37  ;;  %v3947_v39 = vpop.f32.mrb[15].mxu1 }
 0x7f1   : > { %v3956_v44 = vsel %vm3335_vm1, %v3947_v39, 0.0  ;;  %v3966_v38 = vmul.f32 %v3947_v39, %v3947_v39 }
 0x7f2   : > { %v3969_v19 = vsel %vm3335_vm1, %v3967_v4, 0.0  ;;  %v3958_v27 = vadd.f32 %v3957_v6, %v3956_v44  ;;  %v4042_v6 = vld [vmem:[%s6694_s12 + $0x18] sm:$0xff]  ;;  %v4044_v44 = vld [vmem:[%s6694_s12 + $0x28] sm:$0xff] }
 0x7f3   : > { %v3968_v58 = vsel %vm3335_vm1, %v3966_v38, 0.0 }
 0x7f4   : > { %v3959_v59 = vrot.slane %v3958_v27, 4  ;;  %v3970_v33 = vadd.f32 %v3969_v19, %v3968_v58  ;;  %v4045_v19 = vld [vmem:[%s6694_s12 + $0x30] sm:$0xff]  ;;  %v4047_v58 = vld [vmem:[%s6694_s12 + $0x40] sm:$0xff] }
 0x7f6   : > { %v3960_v13 = vadd.f32 %v3959_v59, %v3958_v27  ;;  %v3971_v36 = vrot.slane %v3970_v33, 4  ;;  %v4048_v59 = vld [vmem:[%s6694_s12 + $0x48] sm:$0xff] }
 0x7f8   : > { %v3961_v28 = vrot.slane %v3960_v13, 2  ;;  %v3972_v29 = vadd.f32 %v3971_v36, %v3970_v33  ;;  %v4912_v33 = vpack.c.bf16 %v4048_v59, %v4047_v58  ;;  %v4050_v36 = vld [vmem:[%s6694_s12 + $0x58] sm:$0xff] }
 0x7fa   : > { %v3962_v63 = vadd.f32 %v3961_v28, %v3960_v13  ;;  %v3973_v35 = vrot.slane %v3972_v29, 2  ;;  %v4049_v13 = vld [vmem:[%s6694_s12 + $0x50] sm:$0xff] }
 0x7fb   : > { %v4915_v28 = vpack.c.bf16 %v4050_v36, %v4049_v13 }
 0x7fc   : > { %v3963_v5 = vrot.slane %v3962_v63, 1  ;;  %v3974_v30 = vadd.f32 %v3973_v35, %v3972_v29  ;;  %v4051_v29 = vld [vmem:[%s6694_s12 + $0x60] sm:$0xff] }
 0x7fe   : > { %v3964_v51 = vadd.f32 %v3963_v5, %v3962_v63  ;;  %v3975_v57 = vrot.slane %v3974_v30, 1  ;;  %v4052_v63 = vld [vmem:[%s6694_s12 + $0x68] sm:$0xff]  ;;  %v4053_v5 = vld [vmem:[%s6694_s12 + $0x70] sm:$0xff] }
 0x7ff   : > { %v4918_v35 = vpack.c.bf16 %v4052_v63, %v4051_v29 }
 0x800   : > { %v3965_v14 = vmul.f32 0.0625, %v3964_v51  ;;  %v3976_v50 = vadd.f32 %v3975_v57, %v3974_v30  ;;  %v4054_v30 = vld [vmem:[%s6694_s12 + $0x78] sm:$0xff] }
 0x801   : > { %v4921_v51 = vpack.c.bf16 %v4054_v30, %v4053_v5 }
 0x802   : > { %v3977_v8 = vmul.f32 0.0625, %v3976_v50  ;;  %v3978_v54 = vmul.f32 %v3965_v14, %v3965_v14 }
 0x804   : > { %v3979_v22 = vsub.f32 %v3977_v8, %v3978_v54 }
 0x806   : > { %v3980_v23 = vmax.f32 %v3979_v22, 0.0 }
 0x808   : > { %v3982_v26 = vadd.f32 1e-05, %v3980_v23 }
 0x80a   : > { %4995 = vrsqrt.f32 %v3982_v26 }
 0x814   : > { %v4996_v47 = vpop.eup %4995 }
 0x815   : > { %v3984_v61 = vmul.f32 %v4996_v47, %v3981_v31 }
 0x817   : > { %v3986_v10 = vmul.f32 %v3984_v61, %v3965_v14  ;;  %v3992_v52 = vrot.slane %v3984_v61, %v6026_v32 }
 0x819   : > { %v3987_v46 = vsub.f32 %v3985_v17, %v3986_v10  ;;  %v3994_v56 = vmul.f32 %v3992_v52, %v3947_v39  ;;  %v3995_v60 = vmul.f32 %v4748_v37, %v3992_v52  ;;  %v4041_v37 = vld [vmem:[%s6694_s12 + $0x10] sm:$0xff]  ;;  %v4043_v39 = vld [vmem:[%s6694_s12 + $0x20] sm:$0xff] }
 0x81a   : > { %v4903_v4 = vpack.c.bf16 %v4042_v6, %v4041_v37  ;;  %v4906_v38 = vpack.c.bf16 %v4044_v44, %v4043_v39 }
 0x81b   : > { %v4000_v45 = vrot.slane %v3987_v46, %v6026_v32 }
 0x81d   : > { %v4002_v21 = vadd.f32 %v4000_v45, %v3994_v56  ;;  %v4003_v49 = vadd.f32 %v4000_v45, %v3995_v60 }
 0x81f   : > { %vm4004_vm11 = vcmp.gt.f32.partialorder %v4002_v21, 0.0  ;;  %vm4005_vm14 = vcmp.gt.f32.partialorder %v4003_v49, 0.0  ;;  %v4006_v43 = vmul.f32 0.2, %v4002_v21  ;;  %v4007_v0 = vmul.f32 0.2, %v4003_v49 }
 0x821   : > { %v4008_v34 = vsel %vm4004_vm11, %v4002_v21, %v4006_v43  ;;  %v4009_v40 = vsel %vm4005_vm14, %v4003_v49, %v4007_v0 }
 0x822   : > { %4012 = vst.msk [vmem:[#allocation5 + $0x8] sm:$0xff] %vm3335_vm1, %v4008_v34  ;;  %4013 = vst.msk [vmem:[#allocation5 + $0x10] sm:$0xff] %vm3335_vm1, %v4009_v40  ;;  %v4239_v34 = vld [vmem:[%s6696_s14] sm:$0x1] }
 0x829   : > { %v4020_v9 = vld [vmem:[#allocation5 + $0x8] ss:$4 sm:$0x1f]  ;;  %v4018_v42 = vld [vmem:[#allocation5 + $0x7] ss:$4 sm:$0x1f] }
 0x82a   : > { %4028 = vrot.lane.b32.xlu1 %v4020_v9, %s5018_s28  ;;  %4024 = vrot.lane.b32.xlu0 %v4018_v42, %s5014_s0  ;;  %v4022_v3 = vld [vmem:[#allocation5 + $0x9] ss:$4 sm:$0x1f]  ;;  %v4016_v12 = vld [vmem:[#allocation5 + $0x6] ss:$4 sm:$0x1f] }
 0x82e   : > { %4032 = vrot.lane.b32.xlu0 %v4022_v3, %s5019_s29  ;;  %s546_s29 = scalar_lea.vmem %s6699_s17, %s6763_s27 }
 0x89c   : > { %v4025_v55 = vpop.permute.xlu0 %4024  ;;  %v4029_v53 = vpop.permute.xlu1 %4028 }
 0x89d   : > { %v4035_v48 = vsel %vm3335_vm1, %v4016_v12, %v4025_v55  ;;  %vm4214_vm1 = vcmask 519168  }
 0x89e   : > { %v4036_v24 = vsel %vm3797_vm7, %v4035_v48, %v4029_v53  ;;  %v4259_v48 = vld [vmem:[%s6697_s15] sm:$0xf] }
 0x8a0   : > { %v4033_v18 = vpop.permute.xlu0 %4032 }
 0x8a1   : > { %v4038_v25 = vsel %vm4037_vm3, %v4036_v24, %v4033_v18 }
 0x8a2   : > { %v4072_v7 = vrot.slane %v4038_v25, 1 }
 0x8a4   : > { %4782 = vmatmul.mubr.f32.vlgmr.msra.gmra.mrb[16].mxu1 %v4072_v7 }
 0x8a5   : > { %4901 = vmatpush3.bf16.msra.mxu1 %v4900_v15  ;;  %4816 = vmatprep.mubr.msk.f32.mxu1 %vm5017_vm2, %v5007_v2  ;;  %v4046_v2 = vld [vmem:[%s6694_s12 + $0x38] sm:$0xff] }
 0x8a6   : > { %4902 = vmatprep.subr.bf16.mxu1 %v5016_v62  ;;  %v4909_v27 = vpack.c.bf16 %v4046_v2, %v4045_v19 }
 0x8a9   : > { %4904 = vmatpush3.bf16.msra.mxu1 %v4903_v4  ;;  %v4271_v4 = vld [vmem:[#allocation6] sm:$0x1] }
 0x8aa   : > { %4905 = vmatprep.subr.bf16.mxu1 %v5016_v62 }
 0x8ad   : > { %4907 = vmatpush3.bf16.msra.mxu1 %v4906_v38 }
 0x8ae   : > { %4908 = vmatprep.subr.bf16.mxu1 %v5016_v62 }
 0x8b1   : > { %4910 = vmatpush3.bf16.msra.mxu1 %v4909_v27 }
 0x8b2   : > { %4911 = vmatprep.subr.bf16.mxu1 %v5016_v62 }
 0x8b5   : > { %4913 = vmatpush3.bf16.msra.mxu1 %v4912_v33 }
 0x8b6   : > { %4914 = vmatprep.subr.bf16.mxu1 %v5016_v62 }
 0x8b9   : > { %4916 = vmatpush3.bf16.msra.mxu1 %v4915_v28 }
 0x8ba   : > { %4917 = vmatprep.subr.bf16.mxu1 %v5016_v62 }
 0x8bd   : > { %4919 = vmatpush3.bf16.msra.mxu1 %v4918_v35 }
 0x8be   : > { %4920 = vmatprep.subr.bf16.mxu1 %v5016_v62 }
 0x8c1   : > { %4922 = vmatpush3.bf16.msra.mxu1 %v4921_v51 }
 0x8c4   : > { %4817 = vmatmul.mubr.f32.vlgmr.msra.gmra.mrb[16].mxu1 %v4038_v25 }
 0x997   : > { %v4210_v57 = vpop.f32.mrb[16].mxu1 }
 0x998   : > { %v4215_v14 = vsel %vm4214_vm1, %v4210_v57, 0.0  ;;  %v4223_v50 = vmul.f32 %v4210_v57, %v4210_v57  ;;  %v4818_v8 = vpop.f32.mrb[17].mxu1 }
 0x999   : > { %v4216_v54 = vrot.slane %v4215_v14, 4 }
 0x99a   : > { %v4224_v22 = vsel %vm4214_vm1, %v4223_v50, 0.0 }
 0x99b   : > { %v4217_v23 = vadd.f32 %v4216_v54, %v4215_v14  ;;  %v4225_v26 = vrot.slane %v4224_v22, 4 }
 0x99d   : > { %v4218_v31 = vrot.slane %v4217_v23, 2  ;;  %v4226_v47 = vadd.f32 %v4225_v26, %v4224_v22 }
 0x99f   : > { %v4219_v61 = vadd.f32 %v4218_v31, %v4217_v23  ;;  %v4227_v17 = vrot.slane %v4226_v47, 2 }
 0x9a1   : > { %v4220_v10 = vrot.slane %v4219_v61, 1  ;;  %v4228_v52 = vadd.f32 %v4227_v17, %v4226_v47 }
 0x9a3   : > { %v4221_v62 = vadd.f32 %v4220_v10, %v4219_v61  ;;  %v4229_v46 = vrot.slane %v4228_v52, 1 }
 0x9a5   : > { %v4222_v56 = vmul.f32 0.25, %v4221_v62  ;;  %v4230_v60 = vadd.f32 %v4229_v46, %v4228_v52 }
 0x9a7   : > { %v4231_v45 = vmul.f32 0.25, %v4230_v60  ;;  %v4232_v21 = vmul.f32 %v4222_v56, %v4222_v56 }
 0x9a9   : > { %v4233_v49 = vsub.f32 %v4231_v45, %v4232_v21 }
 0x9ab   : > { %v4234_v1 = vmax.f32 %v4233_v49, 0.0 }
 0x9ad   : > { %v4236_v41 = vadd.f32 1e-05, %v4234_v1 }
 0x9af   : > { %4997 = vrsqrt.f32 %v4236_v41 }
 0x9b9   : > { %v4998_v43 = vpop.eup %4997 }
 0x9ba   : > { %v4238_v0 = vmul.f32 %v4998_v43, %v4235_v11 }
 0x9bc   : > { %v4240_v40 = vmul.f32 %v4238_v0, %v4222_v56  ;;  %v4246_v9 = vrot.slane %v4238_v0, %v6026_v32 }
 0x9be   : > { %v4241_v42 = vsub.f32 %v4239_v34, %v4240_v40  ;;  %v4248_v3 = vmul.f32 %v4246_v9, %v4210_v57 }
 0x9c0   : > { %v4253_v55 = vrot.slane %v4241_v42, %v6026_v32 }
 0x9c2   : > { %v4255_v12 = vadd.f32 %v4253_v55, %v4248_v3 }
 0x9c4   : > { %vm4256_vm0 = vcmp.gt.f32.partialorder %v4255_v12, 0.0  ;;  %v4257_v53 = vmul.f32 0.2, %v4255_v12 }
 0x9c6   : > { %v4258_v16 = vsel %vm4256_vm0, %v4255_v12, %v4257_v53 }
 0x9c7   : > { %v4260_v20 = vmul.f32 %v4259_v48, %v4258_v16 }
 0x9c9   : > { %v4261_v18 = vsel %vm4214_vm1, %v4260_v20, 0.0 }
 0x9ca   : > { %4262 = vadd.xlane.f32.xlu1 %v4261_v18 }
 0xa57   : > { %v4263_v24 = vpop.xlane.xlu1 %4262 }
 0xa58   : > { %v4264_v25 = vrot.slane %v4263_v24, 4 }
 0xa5a   : > { %v4265_v15 = vadd.f32 %v4264_v25, %v4263_v24 }
 0xa5c   : > { %v4266_v7 = vrot.slane %v4265_v15, 2 }
 0xa5e   : > { %v4267_v37 = vadd.f32 %v4266_v7, %v4265_v15 }
 0xa60   : > { %v4268_v6 = vrot.slane %v4267_v37, 1 }
 0xa62   : > { %v4269_v32 = vadd.f32 %v4268_v6, %v4267_v37 }
 0xa64   : > { %4967 = vpush %v4269_v32 }
 0xa95   : > { %s4968_s25 = spop %4967 }
 0xa96   : > { %v4272_v39 = vstv %s4968_s25 }
 0xa97   : > { %v4273_v44 = vadd.f32 %v4272_v39, %v4271_v4 }
 0xa99   : > { %4275 = vst.msk [vmem:[%s546_s29] sm:$0x1] %vm4274_vm13, %v4273_v44 }
 0xa9a PF: > { %s29_s26 = sadd.s32 1, %s5005_s26  }
 0xa9b   : > { %p26_p4 = scmp.ge.s32.totalorder %s29_s26, 4  }
 0xa9d   :  { %28 = sbr.rel (!%p26_p4) target bundleno = 3 (0x3), region = 302 }

</bundles_post_ra>
